<compile_context>
chip_gen: v5e
topology: v5e:2x2
jax: 0.10.0
libtpu: 0.0.40
codegen_flags: <defaults>
</compile_context>

<pallas_src>
import functools

import jax
import jax.numpy as jnp
from jax import lax
from jax.experimental import pallas as pl
from jax.experimental.pallas import tpu as pltpu


def _round_up(v, m):
    return (v + m - 1) // m * m


# ----------------------------------------------------------------------------
# Pass 1: direct conv (sum of KH*KW tap matmuls) + per-(batch,channel) sum / sumsq
# ----------------------------------------------------------------------------
def _conv_stats_kernel(x_ref, w_ref, out_ref, sum_ref, sumsq_ref, *,
                       kh, kw, stride, tile_oh, ow, c, ocp):
    t = pl.program_id(1)                       # OH-tile index (sequential axis)
    tile_m = tile_oh * ow
    row0 = t * (tile_oh * stride)              # first padded input row of this tile

    first = True
    for i in range(kh):
        if stride == 1:
            rows = x_ref[0, pl.ds(row0 + i, tile_oh), :, :]            # (tile_oh, Wp, C)
        else:
            rows = x_ref[0, pl.ds(row0 + i, tile_oh, stride=stride), :, :]
        for j in range(kw):
            if stride == 1:
                win = rows[:, j:j + ow, :]                             # (tile_oh, OW, C)
            else:
                win = lax.slice(rows, (0, j, 0),
                                (tile_oh, j + (ow - 1) * stride + 1, c),
                                (1, stride, 1))
            lhs = win.reshape(tile_m, c)                               # bf16
            contrib = jnp.dot(lhs, w_ref[i * kw + j],
                              preferred_element_type=jnp.float32)      # (tile_m, OCp) f32
            if first:
                out_ref[0] = contrib
                first = False
            else:
                out_ref[0] += contrib

    acc = out_ref[0]                                                   # (tile_m, OCp) f32

    @pl.when(t == 0)
    def _():
        sum_ref[...] = jnp.zeros_like(sum_ref)
        sumsq_ref[...] = jnp.zeros_like(sumsq_ref)

    sum_ref[...] += jnp.sum(acc, axis=0, keepdims=True)[:, None, :]
    sumsq_ref[...] += jnp.sum(acc * acc, axis=0, keepdims=True)[:, None, :]


# ----------------------------------------------------------------------------
# Pass 2: fused batch-norm (stats -> scale/shift) + affine + LeakyReLU(0.1)
# ----------------------------------------------------------------------------
def _bn_lrelu_kernel(sum_ref, sumsq_ref, gamma_ref, beta_ref, y_ref, o_ref, *,
                     inv_count, eps):
    mean = sum_ref[...] * inv_count                                    # (1, OCp)
    # Clamp: E[x^2]-E[x]^2 can go slightly negative under cancellation.
    var = jnp.maximum(sumsq_ref[...] * inv_count - mean * mean, 0.0)
    scale = gamma_ref[...] * lax.rsqrt(var + eps)
    shift = beta_ref[...] - mean * scale
    y = y_ref[0] * scale + shift                                       # (tile_m, OCp) f32
    o_ref[0] = jnp.where(y > 0, y, 0.1 * y)


@functools.partial(jax.jit, static_argnames=("stride", "padding", "eps"))
def conv_block_forward(x, weight, gamma, beta, *, stride=1, padding=1, eps=1e-5):
    """x: (N, C, H, W) f32. weight: (OC, C, KH, KW) f32. Returns (N, OC, OH, OW) f32."""
    n, c, h, w = x.shape
    oc, _, kh, kw = weight.shape
    oh = (h + 2 * padding - kh) // stride + 1
    ow = (w + 2 * padding - kw) // stride + 1
    hp, wp = h + 2 * padding, w + 2 * padding
    ocp = _round_up(oc, 128)                   # lane-dense channel dim

    # NHWC, spatially padded, bf16 streaming operand.
    xp = jnp.transpose(x, (0, 2, 3, 1))
    xp = jnp.pad(xp, ((0, 0), (padding, padding), (padding, padding), (0, 0)))
    xp = xp.astype(jnp.bfloat16)

    # Per-tap weight matrices: (KH*KW, C, OCp), zero-padded channels, bf16.
    wt = jnp.transpose(weight, (2, 3, 1, 0)).reshape(kh * kw, c, oc)
    wt = jnp.pad(wt, ((0, 0), (0, 0), (0, ocp - oc))).astype(jnp.bfloat16)

    gamma_p = jnp.pad(gamma.astype(jnp.float32), (0, ocp - oc)).reshape(1, ocp)
    beta_p = jnp.pad(beta.astype(jnp.float32), (0, ocp - oc)).reshape(1, ocp)

    # OH-tile: make tile_m = tile_oh*OW large (amortize per-step overhead) while
    # dividing OH exactly (no masking) and keeping tile_m sublane-aligned.
    target_m = 1024
    tile_oh = max(1, min(oh, target_m // max(ow, 1)))
    while oh % tile_oh:
        tile_oh -= 1
    if (tile_oh * ow) % 8 and tile_oh != oh:
        tile_oh = oh                           # fall back to one tile per image
    tile_m = tile_oh * ow
    n_t = oh // tile_oh
    m_total = n * oh * ow

    conv_kernel = functools.partial(
        _conv_stats_kernel, kh=kh, kw=kw, stride=stride,
        tile_oh=tile_oh, ow=ow, c=c, ocp=ocp)

    conv_out, psum, psumsq = pl.pallas_call(
        conv_kernel,
        out_shape=(
            jax.ShapeDtypeStruct((n, oh * ow, ocp), jnp.float32),
            jax.ShapeDtypeStruct((n, 1, ocp), jnp.float32),
            jax.ShapeDtypeStruct((n, 1, ocp), jnp.float32),
        ),
        grid_spec=pltpu.PrefetchScalarGridSpec(
            num_scalar_prefetch=0,
            grid=(n, n_t),
            in_specs=[
                # Full padded image of batch b: resident across all OH tiles of b.
                pl.BlockSpec((1, hp, wp, c), lambda b, t: (b, 0, 0, 0)),
                # All taps' weights: resident across the whole grid.
                pl.BlockSpec((kh * kw, c, ocp), lambda b, t: (0, 0, 0)),
            ],
            out_specs=[
                pl.BlockSpec((1, tile_m, ocp), lambda b, t: (b, t, 0)),
                pl.BlockSpec((1, 1, ocp), lambda b, t: (b, 0, 0)),
                pl.BlockSpec((1, 1, ocp), lambda b, t: (b, 0, 0)),
            ],
        ),
        compiler_params=pltpu.CompilerParams(
            # Batch axis is parallel (v7x dual-TC); OH-tile axis carries the per-batch
            # stats accumulators so it must stay sequential.
            dimension_semantics=("parallel", "arbitrary"),
        ),
    )(xp, wt)

    # Tiny (N,1,OCp) reductions; all remaining BN math is fused into pass 2.
    ch_sum = jnp.sum(psum, axis=0)             # (1, OCp)
    ch_sumsq = jnp.sum(psumsq, axis=0)         # (1, OCp)

    bn_kernel = functools.partial(_bn_lrelu_kernel,
                                  inv_count=1.0 / float(m_total), eps=float(eps))

    act = pl.pallas_call(
        bn_kernel,
        out_shape=jax.ShapeDtypeStruct((n, oh * ow, ocp), jnp.float32),
        grid_spec=pltpu.PrefetchScalarGridSpec(
            num_scalar_prefetch=0,
            grid=(n, n_t),
            in_specs=[
                pl.BlockSpec((1, ocp), lambda b, t: (0, 0)),
                pl.BlockSpec((1, ocp), lambda b, t: (0, 0)),
                pl.BlockSpec((1, ocp), lambda b, t: (0, 0)),
                pl.BlockSpec((1, ocp), lambda b, t: (0, 0)),
                pl.BlockSpec((1, tile_m, ocp), lambda b, t: (b, t, 0)),
            ],
            out_specs=pl.BlockSpec((1, tile_m, ocp), lambda b, t: (b, t, 0)),
        ),
        compiler_params=pltpu.CompilerParams(
            dimension_semantics=("parallel", "parallel"),
        ),
    )(ch_sum, ch_sumsq, gamma_p, beta_p, conv_out)

    # TODO(synk): BatchNorm2d running_mean/running_var buffer updates are training
    # bookkeeping only; the forward output does not depend on them, so they are omitted.
    # (N, OH*OW, OCp) -> (N, OC, OH, OW). Keeping NHWC externally would remove this
    # final transpose pass; it is kept only to match the PyTorch NCHW contract.
    out = act[:, :, :oc].reshape(n, oh, ow, oc)
    return jnp.transpose(out, (0, 3, 1, 2))


def _reference(x, weight, gamma, beta, *, stride=1, padding=1, eps=1e-5):
    # Same mixed precision as the kernel: bf16 conv operands, f32 accumulation & BN.
    y = lax.conv_general_dilated(
        x.astype(jnp.bfloat16), weight.astype(jnp.bfloat16),
        window_strides=(stride, stride),
        padding=[(padding, padding), (padding, padding)],
        dimension_numbers=("NCHW", "OIHW", "NCHW"),
        preferred_element_type=jnp.float32)
    mean = jnp.mean(y, axis=(0, 2, 3), keepdims=True)
    var = jnp.mean((y - mean) ** 2, axis=(0, 2, 3), keepdims=True)
    yb = (y - mean) * lax.rsqrt(var + eps)
    yb = yb * gamma[None, :, None, None] + beta[None, :, None, None]
    return jnp.where(yb > 0, yb, 0.1 * yb)


if __name__ == "__main__":
    key = jax.random.PRNGKey(0)
    k_x, k_w = jax.random.split(key)

    N, C_IN, H, W = 2, 4, 16, 16
    C_OUT, KH, KW = 8, 3, 3
    STRIDE, PADDING = 1, 1

    x = jax.random.normal(k_x, (N, C_IN, H, W), dtype=jnp.float32)
    weight = jax.random.normal(k_w, (C_OUT, C_IN, KH, KW), dtype=jnp.float32) * 0.1
    gamma = jnp.ones((C_OUT,), dtype=jnp.float32)   # BatchNorm2d default init
    beta = jnp.zeros((C_OUT,), dtype=jnp.float32)

    out = conv_block_forward(x, weight, gamma, beta,
                             stride=STRIDE, padding=PADDING)
    out = jax.block_until_ready(out)

    ref = _reference(x, weight, gamma, beta, stride=STRIDE, padding=PADDING)
    assert out.shape == (N, C_OUT, H, W), out.shape
    err = float(jnp.max(jnp.abs(out - ref)))
    assert jnp.allclose(out, ref, atol=2e-3, rtol=2e-3), err

    print("KERNEL_OK")
</pallas_src>

<mosaic_0001>
module attributes {stable_mosaic.version = 11 : i64} {
  func.func @_bn_lrelu_kernel(%arg0: i32, %arg1: i32, %arg2: memref<1x128xf32, #tpu.memory_space<vmem>>, %arg3: memref<1x128xf32, #tpu.memory_space<vmem>>, %arg4: memref<1x128xf32, #tpu.memory_space<vmem>>, %arg5: memref<1x128xf32, #tpu.memory_space<vmem>>, %arg6: memref<1x256x128xf32, #tpu.memory_space<vmem>>, %arg7: memref<1x256x128xf32, #tpu.memory_space<vmem>>) attributes {dimension_semantics = [#tpu.dimension_semantics<parallel>, #tpu.dimension_semantics<parallel>], iteration_bounds = array<i64: 2, 1>, scalar_prefetch = 0 : i64, scratch_operands = 0 : i64, tpu.core_type = #tpu.core_type<tc>, window_params = [{pipeline_mode = #tpu.pipeline_mode<synchronous>, transform_indices = @transform_0, window_bounds = array<i64: 1, 128>}, {pipeline_mode = #tpu.pipeline_mode<synchronous>, transform_indices = @transform_1, window_bounds = array<i64: 1, 128>}, {pipeline_mode = #tpu.pipeline_mode<synchronous>, transform_indices = @transform_2, window_bounds = array<i64: 1, 128>}, {pipeline_mode = #tpu.pipeline_mode<synchronous>, transform_indices = @transform_3, window_bounds = array<i64: 1, 128>}, {transform_indices = @transform_4, window_bounds = array<i64: 1, 256, 128>}, {transform_indices = @transform_5, window_bounds = array<i64: 1, 256, 128>}]} {
    %c0 = arith.constant 0 : index
    %c0_0 = arith.constant 0 : index
    %0 = vector.load %arg2[%c0, %c0_0] : memref<1x128xf32, #tpu.memory_space<vmem>>, vector<1x128xf32>
    %cst = arith.constant 0.001953125 : f32
    %1 = vector.broadcast %cst : f32 to vector<1x128xf32>
    %2 = arith.mulf %0, %1 : vector<1x128xf32>
    %c0_1 = arith.constant 0 : index
    %c0_2 = arith.constant 0 : index
    %3 = vector.load %arg3[%c0_1, %c0_2] : memref<1x128xf32, #tpu.memory_space<vmem>>, vector<1x128xf32>
    %cst_3 = arith.constant 0.001953125 : f32
    %4 = vector.broadcast %cst_3 : f32 to vector<1x128xf32>
    %5 = arith.mulf %3, %4 : vector<1x128xf32>
    %6 = arith.mulf %2, %2 : vector<1x128xf32>
    %7 = arith.subf %5, %6 : vector<1x128xf32>
    %cst_4 = arith.constant 0.000000e+00 : f32
    %8 = vector.broadcast %cst_4 : f32 to vector<1x128xf32>
    %9 = arith.maximumf %7, %8 : vector<1x128xf32>
    %c0_5 = arith.constant 0 : index
    %c0_6 = arith.constant 0 : index
    %10 = vector.load %arg4[%c0_5, %c0_6] : memref<1x128xf32, #tpu.memory_space<vmem>>, vector<1x128xf32>
    %cst_7 = arith.constant 9.99999974E-6 : f32
    %11 = vector.broadcast %cst_7 : f32 to vector<1x128xf32>
    %12 = arith.addf %9, %11 : vector<1x128xf32>
    %13 = math.rsqrt %12 : vector<1x128xf32>
    %14 = arith.mulf %10, %13 : vector<1x128xf32>
    %c0_8 = arith.constant 0 : index
    %c0_9 = arith.constant 0 : index
    %15 = vector.load %arg5[%c0_8, %c0_9] : memref<1x128xf32, #tpu.memory_space<vmem>>, vector<1x128xf32>
    %16 = arith.mulf %2, %14 : vector<1x128xf32>
    %17 = arith.subf %15, %16 : vector<1x128xf32>
    %c0_10 = arith.constant 0 : index
    %c0_11 = arith.constant 0 : index
    %c0_12 = arith.constant 0 : index
    %18 = vector.load %arg6[%c0_10, %c0_11, %c0_12] : memref<1x256x128xf32, #tpu.memory_space<vmem>>, vector<1x256x128xf32>
    %19 = vector.shape_cast %18 : vector<1x256x128xf32> to vector<256x128xf32>
    %20 = vector.broadcast %14 : vector<1x128xf32> to vector<256x128xf32>
    %21 = arith.mulf %19, %20 : vector<256x128xf32>
    %22 = vector.broadcast %17 : vector<1x128xf32> to vector<256x128xf32>
    %23 = arith.addf %21, %22 : vector<256x128xf32>
    %cst_13 = arith.constant 0.000000e+00 : f32
    %24 = vector.broadcast %cst_13 : f32 to vector<256x128xf32>
    %25 = arith.cmpf ogt, %23, %24 : vector<256x128xf32>
    %cst_14 = arith.constant 1.000000e-01 : f32
    %26 = vector.broadcast %cst_14 : f32 to vector<256x128xf32>
    %27 = arith.mulf %26, %23 : vector<256x128xf32>
    %28 = arith.select %25, %23, %27 : vector<256x128xi1>, vector<256x128xf32>
    %c0_15 = arith.constant 0 : index
    %c0_16 = arith.constant 0 : index
    %c0_17 = arith.constant 0 : index
    %29 = vector.load %arg7[%c0_15, %c0_16, %c0_17] : memref<1x256x128xf32, #tpu.memory_space<vmem>>, vector<1x256x128xf32>
    %30 = vector.shape_cast %29 : vector<1x256x128xf32> to vector<256x128xf32>
    %31 = vector.shape_cast %28 : vector<256x128xf32> to vector<1x256x128xf32>
    tpu.vector_store %arg7[%c0_15, %c0_16, %c0_17], %31 {strides = array<i32>} : memref<1x256x128xf32, #tpu.memory_space<vmem>>, vector<1x256x128xf32>,
    return
  }
  func.func @transform_0(%arg0: i32, %arg1: i32) -> (i32, i32) {
    %c0_i32 = arith.constant 0 : i32
    %c0_i32_0 = arith.constant 0 : i32
    %c0_i32_1 = arith.constant 0 : i32
    return %c0_i32, %c0_i32_0 : i32, i32
  }
  func.func @transform_1(%arg0: i32, %arg1: i32) -> (i32, i32) {
    %c0_i32 = arith.constant 0 : i32
    %c0_i32_0 = arith.constant 0 : i32
    %c0_i32_1 = arith.constant 0 : i32
    return %c0_i32, %c0_i32_0 : i32, i32
  }
  func.func @transform_2(%arg0: i32, %arg1: i32) -> (i32, i32) {
    %c0_i32 = arith.constant 0 : i32
    %c0_i32_0 = arith.constant 0 : i32
    %c0_i32_1 = arith.constant 0 : i32
    return %c0_i32, %c0_i32_0 : i32, i32
  }
  func.func @transform_3(%arg0: i32, %arg1: i32) -> (i32, i32) {
    %c0_i32 = arith.constant 0 : i32
    %c0_i32_0 = arith.constant 0 : i32
    %c0_i32_1 = arith.constant 0 : i32
    return %c0_i32, %c0_i32_0 : i32, i32
  }
  func.func @transform_4(%arg0: i32, %arg1: i32) -> (i32, i32, i32) {
    %c0_i32 = arith.constant 0 : i32
    %c0_i32_0 = arith.constant 0 : i32
    return %arg0, %arg1, %c0_i32 : i32, i32, i32
  }
  func.func @transform_5(%arg0: i32, %arg1: i32) -> (i32, i32, i32) {
    %c0_i32 = arith.constant 0 : i32
    %c0_i32_0 = arith.constant 0 : i32
    return %arg0, %arg1, %c0_i32 : i32, i32, i32
  }
}

module attributes {stable_mosaic.version = 11 : i64} {
  func.func @_conv_stats_kernel(%arg0: i32, %arg1: i32, %arg2: memref<1x18x18x4xbf16, #tpu.memory_space<vmem>>, %arg3: memref<9x4x128xbf16, #tpu.memory_space<vmem>>, %arg4: memref<1x256x128xf32, #tpu.memory_space<vmem>>, %arg5: memref<1x1x128xf32, #tpu.memory_space<vmem>>, %arg6: memref<1x1x128xf32, #tpu.memory_space<vmem>>) attributes {dimension_semantics = [#tpu.dimension_semantics<parallel>, #tpu.dimension_semantics<arbitrary>], iteration_bounds = array<i64: 2, 1>, scalar_prefetch = 0 : i64, scratch_operands = 0 : i64, tpu.core_type = #tpu.core_type<tc>, window_params = [{transform_indices = @transform_0, window_bounds = array<i64: 1, 18, 18, 4>}, {pipeline_mode = #tpu.pipeline_mode<synchronous>, transform_indices = @transform_1, window_bounds = array<i64: 9, 4, 128>}, {transform_indices = @transform_2, window_bounds = array<i64: 1, 256, 128>}, {transform_indices = @transform_3, window_bounds = array<i64: 1, 1, 128>}, {transform_indices = @transform_4, window_bounds = array<i64: 1, 1, 128>}]} {
    %c16_i32 = arith.constant 16 : i32
    %0 = arith.muli %arg1, %c16_i32 : i32
    %c0_i32 = arith.constant 0 : i32
    %1 = arith.addi %0, %c0_i32 : i32
    %c0 = arith.constant 0 : index
    %2 = arith.index_cast %1 : i32 to index
    %c0_0 = arith.constant 0 : index
    %c0_1 = arith.constant 0 : index
    %3 = vector.load %arg2[%c0, %2, %c0_0, %c0_1] : memref<1x18x18x4xbf16, #tpu.memory_space<vmem>>, vector<1x16x18x4xbf16>
    %4 = vector.shape_cast %3 : vector<1x16x18x4xbf16> to vector<16x18x4xbf16>
    %5 = vector.extract_strided_slice %4 {offsets = [0, 0, 0], sizes = [16, 16, 4], strides = [1, 1, 1]} : vector<16x18x4xbf16> to vector<16x16x4xbf16>
    %6 = vector.shape_cast %5 : vector<16x16x4xbf16> to vector<256x4xbf16>
    %c0_2 = arith.constant 0 : index
    %c0_3 = arith.constant 0 : index
    %c0_4 = arith.constant 0 : index
    %7 = vector.load %arg3[%c0_2, %c0_3, %c0_4] : memref<9x4x128xbf16, #tpu.memory_space<vmem>>, vector<1x4x128xbf16>
    %8 = vector.shape_cast %7 : vector<1x4x128xbf16> to vector<4x128xbf16>
    %cst = arith.constant dense<0.000000e+00> : vector<256x128xf32>
    %9 = tpu.matmul %6, %8, %cst {dimension_numbers = #tpu.dot_dimension_numbers<[1], [0], [0], [1], [0, 0, 1, 1], [], []>} : vector<256x4xbf16>, vector<4x128xbf16>, vector<256x128xf32> -> vector<256x128xf32>
    %c0_5 = arith.constant 0 : index
    %c0_6 = arith.constant 0 : index
    %c0_7 = arith.constant 0 : index
    %10 = vector.load %arg4[%c0_5, %c0_6, %c0_7] : memref<1x256x128xf32, #tpu.memory_space<vmem>>, vector<1x256x128xf32>
    %11 = vector.shape_cast %10 : vector<1x256x128xf32> to vector<256x128xf32>
    %12 = vector.shape_cast %9 : vector<256x128xf32> to vector<1x256x128xf32>
    tpu.vector_store %arg4[%c0_5, %c0_6, %c0_7], %12 {strides = array<i32>} : memref<1x256x128xf32, #tpu.memory_space<vmem>>, vector<1x256x128xf32>,
    %13 = vector.extract_strided_slice %4 {offsets = [0, 1, 0], sizes = [16, 16, 4], strides = [1, 1, 1]} : vector<16x18x4xbf16> to vector<16x16x4xbf16>
    %14 = vector.shape_cast %13 : vector<16x16x4xbf16> to vector<256x4xbf16>
    %c1 = arith.constant 1 : index
    %c0_8 = arith.constant 0 : index
    %c0_9 = arith.constant 0 : index
    %15 = vector.load %arg3[%c1, %c0_8, %c0_9] : memref<9x4x128xbf16, #tpu.memory_space<vmem>>, vector<1x4x128xbf16>
    %16 = vector.shape_cast %15 : vector<1x4x128xbf16> to vector<4x128xbf16>
    %cst_10 = arith.constant dense<0.000000e+00> : vector<256x128xf32>
    %17 = tpu.matmul %14, %16, %cst_10 {dimension_numbers = #tpu.dot_dimension_numbers<[1], [0], [0], [1], [0, 0, 1, 1], [], []>} : vector<256x4xbf16>, vector<4x128xbf16>, vector<256x128xf32> -> vector<256x128xf32>
    %c0_11 = arith.constant 0 : index
    %c0_12 = arith.constant 0 : index
    %c0_13 = arith.constant 0 : index
    %18 = vector.load %arg4[%c0_11, %c0_12, %c0_13] : memref<1x256x128xf32, #tpu.memory_space<vmem>>, vector<1x256x128xf32>
    %19 = vector.shape_cast %18 : vector<1x256x128xf32> to vector<256x128xf32>
    %20 = arith.addf %19, %17 : vector<256x128xf32>
    %c0_14 = arith.constant 0 : index
    %c0_15 = arith.constant 0 : index
    %c0_16 = arith.constant 0 : index
    %21 = vector.load %arg4[%c0_14, %c0_15, %c0_16] : memref<1x256x128xf32, #tpu.memory_space<vmem>>, vector<1x256x128xf32>
    %22 = vector.shape_cast %21 : vector<1x256x128xf32> to vector<256x128xf32>
    %23 = vector.shape_cast %20 : vector<256x128xf32> to vector<1x256x128xf32>
    tpu.vector_store %arg4[%c0_14, %c0_15, %c0_16], %23 {strides = array<i32>} : memref<1x256x128xf32, #tpu.memory_space<vmem>>, vector<1x256x128xf32>,
    %24 = vector.extract_strided_slice %4 {offsets = [0, 2, 0], sizes = [16, 16, 4], strides = [1, 1, 1]} : vector<16x18x4xbf16> to vector<16x16x4xbf16>
    %25 = vector.shape_cast %24 : vector<16x16x4xbf16> to vector<256x4xbf16>
    %c2 = arith.constant 2 : index
    %c0_17 = arith.constant 0 : index
    %c0_18 = arith.constant 0 : index
    %26 = vector.load %arg3[%c2, %c0_17, %c0_18] : memref<9x4x128xbf16, #tpu.memory_space<vmem>>, vector<1x4x128xbf16>
    %27 = vector.shape_cast %26 : vector<1x4x128xbf16> to vector<4x128xbf16>
    %cst_19 = arith.constant dense<0.000000e+00> : vector<256x128xf32>
    %28 = tpu.matmul %25, %27, %cst_19 {dimension_numbers = #tpu.dot_dimension_numbers<[1], [0], [0], [1], [0, 0, 1, 1], [], []>} : vector<256x4xbf16>, vector<4x128xbf16>, vector<256x128xf32> -> vector<256x128xf32>
    %c0_20 = arith.constant 0 : index
    %c0_21 = arith.constant 0 : index
    %c0_22 = arith.constant 0 : index
    %29 = vector.load %arg4[%c0_20, %c0_21, %c0_22] : memref<1x256x128xf32, #tpu.memory_space<vmem>>, vector<1x256x128xf32>
    %30 = vector.shape_cast %29 : vector<1x256x128xf32> to vector<256x128xf32>
    %31 = arith.addf %30, %28 : vector<256x128xf32>
    %c0_23 = arith.constant 0 : index
    %c0_24 = arith.constant 0 : index
    %c0_25 = arith.constant 0 : index
    %32 = vector.load %arg4[%c0_23, %c0_24, %c0_25] : memref<1x256x128xf32, #tpu.memory_space<vmem>>, vector<1x256x128xf32>
    %33 = vector.shape_cast %32 : vector<1x256x128xf32> to vector<256x128xf32>
    %34 = vector.shape_cast %31 : vector<256x128xf32> to vector<1x256x128xf32>
    tpu.vector_store %arg4[%c0_23, %c0_24, %c0_25], %34 {strides = array<i32>} : memref<1x256x128xf32, #tpu.memory_space<vmem>>, vector<1x256x128xf32>,
    %c1_i32 = arith.constant 1 : i32
    %35 = arith.addi %0, %c1_i32 : i32
    %c0_26 = arith.constant 0 : index
    %36 = arith.index_cast %35 : i32 to index
    %c0_27 = arith.constant 0 : index
    %c0_28 = arith.constant 0 : index
    %37 = vector.load %arg2[%c0_26, %36, %c0_27, %c0_28] : memref<1x18x18x4xbf16, #tpu.memory_space<vmem>>, vector<1x16x18x4xbf16>
    %38 = vector.shape_cast %37 : vector<1x16x18x4xbf16> to vector<16x18x4xbf16>
    %39 = vector.extract_strided_slice %38 {offsets = [0, 0, 0], sizes = [16, 16, 4], strides = [1, 1, 1]} : vector<16x18x4xbf16> to vector<16x16x4xbf16>
    %40 = vector.shape_cast %39 : vector<16x16x4xbf16> to vector<256x4xbf16>
    %c3 = arith.constant 3 : index
    %c0_29 = arith.constant 0 : index
    %c0_30 = arith.constant 0 : index
    %41 = vector.load %arg3[%c3, %c0_29, %c0_30] : memref<9x4x128xbf16, #tpu.memory_space<vmem>>, vector<1x4x128xbf16>
    %42 = vector.shape_cast %41 : vector<1x4x128xbf16> to vector<4x128xbf16>
    %cst_31 = arith.constant dense<0.000000e+00> : vector<256x128xf32>
    %43 = tpu.matmul %40, %42, %cst_31 {dimension_numbers = #tpu.dot_dimension_numbers<[1], [0], [0], [1], [0, 0, 1, 1], [], []>} : vector<256x4xbf16>, vector<4x128xbf16>, vector<256x128xf32> -> vector<256x128xf32>
    %c0_32 = arith.constant 0 : index
    %c0_33 = arith.constant 0 : index
    %c0_34 = arith.constant 0 : index
    %44 = vector.load %arg4[%c0_32, %c0_33, %c0_34] : memref<1x256x128xf32, #tpu.memory_space<vmem>>, vector<1x256x128xf32>
    %45 = vector.shape_cast %44 : vector<1x256x128xf32> to vector<256x128xf32>
    %46 = arith.addf %45, %43 : vector<256x128xf32>
    %c0_35 = arith.constant 0 : index
    %c0_36 = arith.constant 0 : index
    %c0_37 = arith.constant 0 : index
    %47 = vector.load %arg4[%c0_35, %c0_36, %c0_37] : memref<1x256x128xf32, #tpu.memory_space<vmem>>, vector<1x256x128xf32>
    %48 = vector.shape_cast %47 : vector<1x256x128xf32> to vector<256x128xf32>
    %49 = vector.shape_cast %46 : vector<256x128xf32> to vector<1x256x128xf32>
    tpu.vector_store %arg4[%c0_35, %c0_36, %c0_37], %49 {strides = array<i32>} : memref<1x256x128xf32, #tpu.memory_space<vmem>>, vector<1x256x128xf32>,
    %50 = vector.extract_strided_slice %38 {offsets = [0, 1, 0], sizes = [16, 16, 4], strides = [1, 1, 1]} : vector<16x18x4xbf16> to vector<16x16x4xbf16>
    %51 = vector.shape_cast %50 : vector<16x16x4xbf16> to vector<256x4xbf16>
    %c4 = arith.constant 4 : index
    %c0_38 = arith.constant 0 : index
    %c0_39 = arith.constant 0 : index
    %52 = vector.load %arg3[%c4, %c0_38, %c0_39] : memref<9x4x128xbf16, #tpu.memory_space<vmem>>, vector<1x4x128xbf16>
    %53 = vector.shape_cast %52 : vector<1x4x128xbf16> to vector<4x128xbf16>
    %cst_40 = arith.constant dense<0.000000e+00> : vector<256x128xf32>
    %54 = tpu.matmul %51, %53, %cst_40 {dimension_numbers = #tpu.dot_dimension_numbers<[1], [0], [0], [1], [0, 0, 1, 1], [], []>} : vector<256x4xbf16>, vector<4x128xbf16>, vector<256x128xf32> -> vector<256x128xf32>
    %c0_41 = arith.constant 0 : index
    %c0_42 = arith.constant 0 : index
    %c0_43 = arith.constant 0 : index
    %55 = vector.load %arg4[%c0_41, %c0_42, %c0_43] : memref<1x256x128xf32, #tpu.memory_space<vmem>>, vector<1x256x128xf32>
    %56 = vector.shape_cast %55 : vector<1x256x128xf32> to vector<256x128xf32>
    %57 = arith.addf %56, %54 : vector<256x128xf32>
    %c0_44 = arith.constant 0 : index
    %c0_45 = arith.constant 0 : index
    %c0_46 = arith.constant 0 : index
    %58 = vector.load %arg4[%c0_44, %c0_45, %c0_46] : memref<1x256x128xf32, #tpu.memory_space<vmem>>, vector<1x256x128xf32>
    %59 = vector.shape_cast %58 : vector<1x256x128xf32> to vector<256x128xf32>
    %60 = vector.shape_cast %57 : vector<256x128xf32> to vector<1x256x128xf32>
    tpu.vector_store %arg4[%c0_44, %c0_45, %c0_46], %60 {strides = array<i32>} : memref<1x256x128xf32, #tpu.memory_space<vmem>>, vector<1x256x128xf32>,
    %61 = vector.extract_strided_slice %38 {offsets = [0, 2, 0], sizes = [16, 16, 4], strides = [1, 1, 1]} : vector<16x18x4xbf16> to vector<16x16x4xbf16>
    %62 = vector.shape_cast %61 : vector<16x16x4xbf16> to vector<256x4xbf16>
    %c5 = arith.constant 5 : index
    %c0_47 = arith.constant 0 : index
    %c0_48 = arith.constant 0 : index
    %63 = vector.load %arg3[%c5, %c0_47, %c0_48] : memref<9x4x128xbf16, #tpu.memory_space<vmem>>, vector<1x4x128xbf16>
    %64 = vector.shape_cast %63 : vector<1x4x128xbf16> to vector<4x128xbf16>
    %cst_49 = arith.constant dense<0.000000e+00> : vector<256x128xf32>
    %65 = tpu.matmul %62, %64, %cst_49 {dimension_numbers = #tpu.dot_dimension_numbers<[1], [0], [0], [1], [0, 0, 1, 1], [], []>} : vector<256x4xbf16>, vector<4x128xbf16>, vector<256x128xf32> -> vector<256x128xf32>
    %c0_50 = arith.constant 0 : index
    %c0_51 = arith.constant 0 : index
    %c0_52 = arith.constant 0 : index
    %66 = vector.load %arg4[%c0_50, %c0_51, %c0_52] : memref<1x256x128xf32, #tpu.memory_space<vmem>>, vector<1x256x128xf32>
    %67 = vector.shape_cast %66 : vector<1x256x128xf32> to vector<256x128xf32>
    %68 = arith.addf %67, %65 : vector<256x128xf32>
    %c0_53 = arith.constant 0 : index
    %c0_54 = arith.constant 0 : index
    %c0_55 = arith.constant 0 : index
    %69 = vector.load %arg4[%c0_53, %c0_54, %c0_55] : memref<1x256x128xf32, #tpu.memory_space<vmem>>, vector<1x256x128xf32>
    %70 = vector.shape_cast %69 : vector<1x256x128xf32> to vector<256x128xf32>
    %71 = vector.shape_cast %68 : vector<256x128xf32> to vector<1x256x128xf32>
    tpu.vector_store %arg4[%c0_53, %c0_54, %c0_55], %71 {strides = array<i32>} : memref<1x256x128xf32, #tpu.memory_space<vmem>>, vector<1x256x128xf32>,
    %c2_i32 = arith.constant 2 : i32
    %72 = arith.addi %0, %c2_i32 : i32
    %c0_56 = arith.constant 0 : index
    %73 = arith.index_cast %72 : i32 to index
    %c0_57 = arith.constant 0 : index
    %c0_58 = arith.constant 0 : index
    %74 = vector.load %arg2[%c0_56, %73, %c0_57, %c0_58] : memref<1x18x18x4xbf16, #tpu.memory_space<vmem>>, vector<1x16x18x4xbf16>
    %75 = vector.shape_cast %74 : vector<1x16x18x4xbf16> to vector<16x18x4xbf16>
    %76 = vector.extract_strided_slice %75 {offsets = [0, 0, 0], sizes = [16, 16, 4], strides = [1, 1, 1]} : vector<16x18x4xbf16> to vector<16x16x4xbf16>
    %77 = vector.shape_cast %76 : vector<16x16x4xbf16> to vector<256x4xbf16>
    %c6 = arith.constant 6 : index
    %c0_59 = arith.constant 0 : index
    %c0_60 = arith.constant 0 : index
    %78 = vector.load %arg3[%c6, %c0_59, %c0_60] : memref<9x4x128xbf16, #tpu.memory_space<vmem>>, vector<1x4x128xbf16>
    %79 = vector.shape_cast %78 : vector<1x4x128xbf16> to vector<4x128xbf16>
    %cst_61 = arith.constant dense<0.000000e+00> : vector<256x128xf32>
    %80 = tpu.matmul %77, %79, %cst_61 {dimension_numbers = #tpu.dot_dimension_numbers<[1], [0], [0], [1], [0, 0, 1, 1], [], []>} : vector<256x4xbf16>, vector<4x128xbf16>, vector<256x128xf32> -> vector<256x128xf32>
    %c0_62 = arith.constant 0 : index
    %c0_63 = arith.constant 0 : index
    %c0_64 = arith.constant 0 : index
    %81 = vector.load %arg4[%c0_62, %c0_63, %c0_64] : memref<1x256x128xf32, #tpu.memory_space<vmem>>, vector<1x256x128xf32>
    %82 = vector.shape_cast %81 : vector<1x256x128xf32> to vector<256x128xf32>
    %83 = arith.addf %82, %80 : vector<256x128xf32>
    %c0_65 = arith.constant 0 : index
    %c0_66 = arith.constant 0 : index
    %c0_67 = arith.constant 0 : index
    %84 = vector.load %arg4[%c0_65, %c0_66, %c0_67] : memref<1x256x128xf32, #tpu.memory_space<vmem>>, vector<1x256x128xf32>
    %85 = vector.shape_cast %84 : vector<1x256x128xf32> to vector<256x128xf32>
    %86 = vector.shape_cast %83 : vector<256x128xf32> to vector<1x256x128xf32>
    tpu.vector_store %arg4[%c0_65, %c0_66, %c0_67], %86 {strides = array<i32>} : memref<1x256x128xf32, #tpu.memory_space<vmem>>, vector<1x256x128xf32>,
    %87 = vector.extract_strided_slice %75 {offsets = [0, 1, 0], sizes = [16, 16, 4], strides = [1, 1, 1]} : vector<16x18x4xbf16> to vector<16x16x4xbf16>
    %88 = vector.shape_cast %87 : vector<16x16x4xbf16> to vector<256x4xbf16>
    %c7 = arith.constant 7 : index
    %c0_68 = arith.constant 0 : index
    %c0_69 = arith.constant 0 : index
    %89 = vector.load %arg3[%c7, %c0_68, %c0_69] : memref<9x4x128xbf16, #tpu.memory_space<vmem>>, vector<1x4x128xbf16>
    %90 = vector.shape_cast %89 : vector<1x4x128xbf16> to vector<4x128xbf16>
    %cst_70 = arith.constant dense<0.000000e+00> : vector<256x128xf32>
    %91 = tpu.matmul %88, %90, %cst_70 {dimension_numbers = #tpu.dot_dimension_numbers<[1], [0], [0], [1], [0, 0, 1, 1], [], []>} : vector<256x4xbf16>, vector<4x128xbf16>, vector<256x128xf32> -> vector<256x128xf32>
    %c0_71 = arith.constant 0 : index
    %c0_72 = arith.constant 0 : index
    %c0_73 = arith.constant 0 : index
    %92 = vector.load %arg4[%c0_71, %c0_72, %c0_73] : memref<1x256x128xf32, #tpu.memory_space<vmem>>, vector<1x256x128xf32>
    %93 = vector.shape_cast %92 : vector<1x256x128xf32> to vector<256x128xf32>
    %94 = arith.addf %93, %91 : vector<256x128xf32>
    %c0_74 = arith.constant 0 : index
    %c0_75 = arith.constant 0 : index
    %c0_76 = arith.constant 0 : index
    %95 = vector.load %arg4[%c0_74, %c0_75, %c0_76] : memref<1x256x128xf32, #tpu.memory_space<vmem>>, vector<1x256x128xf32>
    %96 = vector.shape_cast %95 : vector<1x256x128xf32> to vector<256x128xf32>
    %97 = vector.shape_cast %94 : vector<256x128xf32> to vector<1x256x128xf32>
    tpu.vector_store %arg4[%c0_74, %c0_75, %c0_76], %97 {strides = array<i32>} : memref<1x256x128xf32, #tpu.memory_space<vmem>>, vector<1x256x128xf32>,
    %98 = vector.extract_strided_slice %75 {offsets = [0, 2, 0], sizes = [16, 16, 4], strides = [1, 1, 1]} : vector<16x18x4xbf16> to vector<16x16x4xbf16>
    %99 = vector.shape_cast %98 : vector<16x16x4xbf16> to vector<256x4xbf16>
    %c8 = arith.constant 8 : index
    %c0_77 = arith.constant 0 : index
    %c0_78 = arith.constant 0 : index
    %100 = vector.load %arg3[%c8, %c0_77, %c0_78] : memref<9x4x128xbf16, #tpu.memory_space<vmem>>, vector<1x4x128xbf16>
    %101 = vector.shape_cast %100 : vector<1x4x128xbf16> to vector<4x128xbf16>
    %cst_79 = arith.constant dense<0.000000e+00> : vector<256x128xf32>
    %102 = tpu.matmul %99, %101, %cst_79 {dimension_numbers = #tpu.dot_dimension_numbers<[1], [0], [0], [1], [0, 0, 1, 1], [], []>} : vector<256x4xbf16>, vector<4x128xbf16>, vector<256x128xf32> -> vector<256x128xf32>
    %c0_80 = arith.constant 0 : index
    %c0_81 = arith.constant 0 : index
    %c0_82 = arith.constant 0 : index
    %103 = vector.load %arg4[%c0_80, %c0_81, %c0_82] : memref<1x256x128xf32, #tpu.memory_space<vmem>>, vector<1x256x128xf32>
    %104 = vector.shape_cast %103 : vector<1x256x128xf32> to vector<256x128xf32>
    %105 = arith.addf %104, %102 : vector<256x128xf32>
    %c0_83 = arith.constant 0 : index
    %c0_84 = arith.constant 0 : index
    %c0_85 = arith.constant 0 : index
    %106 = vector.load %arg4[%c0_83, %c0_84, %c0_85] : memref<1x256x128xf32, #tpu.memory_space<vmem>>, vector<1x256x128xf32>
    %107 = vector.shape_cast %106 : vector<1x256x128xf32> to vector<256x128xf32>
    %108 = vector.shape_cast %105 : vector<256x128xf32> to vector<1x256x128xf32>
    tpu.vector_store %arg4[%c0_83, %c0_84, %c0_85], %108 {strides = array<i32>} : memref<1x256x128xf32, #tpu.memory_space<vmem>>, vector<1x256x128xf32>,
    %c0_86 = arith.constant 0 : index
    %c0_87 = arith.constant 0 : index
    %c0_88 = arith.constant 0 : index
    %109 = vector.load %arg4[%c0_86, %c0_87, %c0_88] : memref<1x256x128xf32, #tpu.memory_space<vmem>>, vector<1x256x128xf32>
    %110 = vector.shape_cast %109 : vector<1x256x128xf32> to vector<256x128xf32>
    %c0_i32_89 = arith.constant 0 : i32
    %111 = arith.cmpi eq, %arg1, %c0_i32_89 : i32
    %112 = arith.extui %111 : i1 to i32
    %c0_i32_90 = arith.constant 0 : i32
    %113 = arith.cmpi ne, %112, %c0_i32_90 : i32
    scf.if %113 {
      %cst_105 = arith.constant 0.000000e+00 : f32
      %127 = vector.broadcast %cst_105 : f32 to vector<1x1x128xf32>
      %c0_106 = arith.constant 0 : index
      %c0_107 = arith.constant 0 : index
      %c0_108 = arith.constant 0 : index
      %128 = vector.load %arg5[%c0_106, %c0_107, %c0_108] : memref<1x1x128xf32, #tpu.memory_space<vmem>>, vector<1x1x128xf32>
      tpu.vector_store %arg5[%c0_106, %c0_107, %c0_108], %127 {strides = array<i32>} : memref<1x1x128xf32, #tpu.memory_space<vmem>>, vector<1x1x128xf32>,
      %cst_109 = arith.constant 0.000000e+00 : f32
      %129 = vector.broadcast %cst_109 : f32 to vector<1x1x128xf32>
      %c0_110 = arith.constant 0 : index
      %c0_111 = arith.constant 0 : index
      %c0_112 = arith.constant 0 : index
      %130 = vector.load %arg6[%c0_110, %c0_111, %c0_112] : memref<1x1x128xf32, #tpu.memory_space<vmem>>, vector<1x1x128xf32>
      tpu.vector_store %arg6[%c0_110, %c0_111, %c0_112], %129 {strides = array<i32>} : memref<1x1x128xf32, #tpu.memory_space<vmem>>, vector<1x1x128xf32>,
    } else {
    }
    %c0_91 = arith.constant 0 : index
    %c0_92 = arith.constant 0 : index
    %c0_93 = arith.constant 0 : index
    %114 = vector.load %arg5[%c0_91, %c0_92, %c0_93] : memref<1x1x128xf32, #tpu.memory_space<vmem>>, vector<1x1x128xf32>
    %cst_94 = arith.constant dense<0.000000e+00> : vector<128xf32>
    %115 = vector.multi_reduction <add>, %110, %cst_94 [0] : vector<256x128xf32> to vector<128xf32>
    %116 = vector.shape_cast %115 : vector<128xf32> to vector<1x128xf32>
    %117 = vector.shape_cast %116 : vector<1x128xf32> to vector<1x1x128xf32>
    %118 = arith.addf %114, %117 : vector<1x1x128xf32>
    %c0_95 = arith.constant 0 : index
    %c0_96 = arith.constant 0 : index
    %c0_97 = arith.constant 0 : index
    %119 = vector.load %arg5[%c0_95, %c0_96, %c0_97] : memref<1x1x128xf32, #tpu.memory_space<vmem>>, vector<1x1x128xf32>
    tpu.vector_store %arg5[%c0_95, %c0_96, %c0_97], %118 {strides = array<i32>} : memref<1x1x128xf32, #tpu.memory_space<vmem>>, vector<1x1x128xf32>,
    %c0_98 = arith.constant 0 : index
    %c0_99 = arith.constant 0 : index
    %c0_100 = arith.constant 0 : index
    %120 = vector.load %arg6[%c0_98, %c0_99, %c0_100] : memref<1x1x128xf32, #tpu.memory_space<vmem>>, vector<1x1x128xf32>
    %121 = arith.mulf %110, %110 : vector<256x128xf32>
    %cst_101 = arith.constant dense<0.000000e+00> : vector<128xf32>
    %122 = vector.multi_reduction <add>, %121, %cst_101 [0] : vector<256x128xf32> to vector<128xf32>
    %123 = vector.shape_cast %122 : vector<128xf32> to vector<1x128xf32>
    %124 = vector.shape_cast %123 : vector<1x128xf32> to vector<1x1x128xf32>
    %125 = arith.addf %120, %124 : vector<1x1x128xf32>
    %c0_102 = arith.constant 0 : index
    %c0_103 = arith.constant 0 : index
    %c0_104 = arith.constant 0 : index
    %126 = vector.load %arg6[%c0_102, %c0_103, %c0_104] : memref<1x1x128xf32, #tpu.memory_space<vmem>>, vector<1x1x128xf32>
    tpu.vector_store %arg6[%c0_102, %c0_103, %c0_104], %125 {strides = array<i32>} : memref<1x1x128xf32, #tpu.memory_space<vmem>>, vector<1x1x128xf32>,
    return
  }
  func.func @transform_0(%arg0: i32, %arg1: i32) -> (i32, i32, i32, i32) {
    %c0_i32 = arith.constant 0 : i32
    %c0_i32_0 = arith.constant 0 : i32
    %c0_i32_1 = arith.constant 0 : i32
    %c0_i32_2 = arith.constant 0 : i32
    return %arg0, %c0_i32, %c0_i32_0, %c0_i32_1 : i32, i32, i32, i32
  }
  func.func @transform_1(%arg0: i32, %arg1: i32) -> (i32, i32, i32) {
    %c0_i32 = arith.constant 0 : i32
    %c0_i32_0 = arith.constant 0 : i32
    %c0_i32_1 = arith.constant 0 : i32
    %c0_i32_2 = arith.constant 0 : i32
    return %c0_i32, %c0_i32_0, %c0_i32_1 : i32, i32, i32
  }
  func.func @transform_2(%arg0: i32, %arg1: i32) -> (i32, i32, i32) {
    %c0_i32 = arith.constant 0 : i32
    %c0_i32_0 = arith.constant 0 : i32
    return %arg0, %arg1, %c0_i32 : i32, i32, i32
  }
  func.func @transform_3(%arg0: i32, %arg1: i32) -> (i32, i32, i32) {
    %c0_i32 = arith.constant 0 : i32
    %c0_i32_0 = arith.constant 0 : i32
    %c0_i32_1 = arith.constant 0 : i32
    return %arg0, %c0_i32, %c0_i32_0 : i32, i32, i32
  }
  func.func @transform_4(%arg0: i32, %arg1: i32) -> (i32, i32, i32) {
    %c0_i32 = arith.constant 0 : i32
    %c0_i32_0 = arith.constant 0 : i32
    %c0_i32_1 = arith.constant 0 : i32
    return %arg0, %c0_i32, %c0_i32_0 : i32, i32, i32
  }
}

</mosaic_0001>

<bundles_post_ra>
// kernel: conv_block_forward.3
= control target key start
LH: loop header
LB: loop body
LE: loop exit
PB: predicated region body
PF: predicated region fallthrough
CT: control target
= control target key end

     0   :  { %s697_s18 = smov 0   ;;  %s699_s19 = smov 0   ;;  %s888_s0 = inlined_call_operand.vmem [shape: f32[1,128], index: 0, kind: input, shape index: {}]   ;;  %s889_s1 = inlined_call_operand.vmem [shape: f32[1,128], index: 1, kind: input, shape index: {}]   ;;  %s890_s2 = inlined_call_operand.vmem [shape: f32[1,128], index: 2, kind: input, shape index: {}]   ;;  %s891_s3 = inlined_call_operand.vmem [shape: f32[1,128], index: 3, kind: input, shape index: {}]   ;;  %s892_s4 = inlined_call_operand.vmem [shape: f32[2,256,128], index: 4, kind: input, shape index: {}]   ;;  %s893_s5 = inlined_call_operand.vmem [shape: f32[2,256,128], index: 5, kind: output, shape index: {}]  }
   0x1   :  { %s701_s20 = smov 0  }
   0x2 LB: > { %s27_s21 = sadd.s32 1, %s661_s19  ;;  %p608_p0 = scmp.ge.s32.totalorder %s665_s20, 1  ;;  %s665_s20 = sphi %s701_s20, %s15_s20   ;;  %s661_s19 = sphi %s699_s19, %s895_s19   ;;  %s657_s18 = sphi %s697_s18, %s894_s18  }
   0x3   : > { %p29_p1 = scmp.ge.s32.totalorder %s27_s21, 2  ;;  %p208_p2 = scmp.lt.s32.totalorder %s665_s20, 3 }
   0x5   : > { %s897_s21 = smov (%p29_p1, %s27_s21), 0  ;;  %p209_p3 = pnand %p608_p0, %p208_p2 }
   0x6   : > { %p245_p4 = scmp.lt.s32.totalorder (!%p209_p3), %s657_s18, 1 }
   0x7   : > { %212 = sbr.rel (%p209_p3) target bundleno = 90 (0x5a), region = 40 }
   0xc   : > { %v264_v0 = vld [vmem:[%s888_s0] sm:$0x1]  ;;  %s899_s18 = smov (!%p245_p4, %s657_s18), 1 }
   0xd   : > { %v266_v1 = vld [vmem:[%s889_s1] sm:$0x1]  ;;  %v265_v2 = vmul.f32 0.001953125, %v264_v0  ;;  %s615_s26 = sshll.u32 %s899_s18, 8 }
   0xe   : > { %v267_v3 = vmul.f32 0.001953125, %v266_v1  ;;  %s729_s29 = scalar_lea.vmem %s892_s4, %s615_s26  ;;  %v271_v13 = vld [vmem:[%s890_s2] sm:$0x1]  ;;  %s782_s11 = scalar_lea.vmem %s893_s5, %s615_s26 }
   0xf   : > { %v268_v4 = vmul.f32 %v265_v2, %v265_v2  ;;  %v284_v17 = vld [vmem:[%s891_s3] sm:$0x1]  ;;  %v288_v19 = vld [vmem:[%s729_s29 + $0x8] sm:$0xff]  ;;  %v289_v20 = vld [vmem:[%s729_s29 + $0x10] sm:$0xff] }
  0x10   : > { %v287_v18 = vld [vmem:[%s729_s29] sm:$0xff]  ;;  %v290_v21 = vld [vmem:[%s729_s29 + $0x18] sm:$0xff]  ;;  %v292_v25 = vld [vmem:[%s729_s29 + $0x28] sm:$0xff] }
  0x11   : > { %v269_v5 = vsub.f32 %v267_v3, %v268_v4  ;;  %v291_v22 = vld [vmem:[%s729_s29 + $0x20] sm:$0xff]  ;;  %v293_v26 = vld [vmem:[%s729_s29 + $0x30] sm:$0xff]  ;;  %v294_v27 = vld [vmem:[%s729_s29 + $0x38] sm:$0xff] }
  0x12   : > { %v295_v28 = vld [vmem:[%s729_s29 + $0x40] sm:$0xff]  ;;  %v296_v29 = vld [vmem:[%s729_s29 + $0x48] sm:$0xff]  ;;  %v297_v30 = vld [vmem:[%s729_s29 + $0x50] sm:$0xff] }
  0x13   : > { %v270_v6 = vmax.f32 %v269_v5, 0.0  ;;  %v298_v35 = vld [vmem:[%s729_s29 + $0x58] sm:$0xff]  ;;  %v299_v36 = vld [vmem:[%s729_s29 + $0x60] sm:$0xff]  ;;  %v300_v37 = vld [vmem:[%s729_s29 + $0x68] sm:$0xff] }
  0x15   : > { %v272_v7 = vadd.f32 1e-05, %v270_v6 }
  0x17   : > { %641 = vrsqrt.f32 %v272_v7  ;;  %vm279_vm0 = vweird.f32 %v272_v7 }
  0x1d   : > { %v642_v8 = vpop.eup %641 }
  0x1e   : > { %v274_v9 = vmul.f32 %v642_v8, %v272_v7  ;;  %vm280_vm1 = vweird.f32 %v642_v8 }
  0x1f   : > { %vm281_vm2 = vmor %vm279_vm0, %vm280_vm1 }
  0x20   : > { %v275_v10 = vmul.f32 %v642_v8, %v274_v9 }
  0x22   : > { %v276_v11 = vmul.f32 0.5, %v275_v10 }
  0x24   : > { %v277_v12 = vsub.f32 1.5, %v276_v11 }
  0x26   : > { %v278_v14 = vmul.f32 %v642_v8, %v277_v12 }
  0x28   : > { %v282_v15 = vsel %vm281_vm2, %v642_v8, %v278_v14  ;;  %v301_v14 = vld [vmem:[%s729_s29 + $0x70] sm:$0xff] }
  0x29   : > { %v283_v16 = vmul.f32 %v282_v15, %v271_v13  ;;  %v302_v15 = vld [vmem:[%s729_s29 + $0x78] sm:$0xff] }
  0x2b   : > { %v285_v23 = vmul.f32 %v283_v16, %v265_v2  ;;  %v742_v24 = vperm.slane %v283_v16, 0 }
  0x2d   : > { %v286_v31 = vsub.f32 %v284_v17, %v285_v23  ;;  %v322_v32 = vmul.f32 %v742_v24, %v287_v18  ;;  %v323_v33 = vmul.f32 %v742_v24, %v288_v19  ;;  %v324_v34 = vmul.f32 %v742_v24, %v289_v20  ;;  %v303_v18 = vld [vmem:[%s729_s29 + $0x80] sm:$0xff]  ;;  %v304_v19 = vld [vmem:[%s729_s29 + $0x88] sm:$0xff] }
  0x2e   : > { %v325_v38 = vmul.f32 %v742_v24, %v290_v21  ;;  %v326_v39 = vmul.f32 %v742_v24, %v291_v22  ;;  %v327_v40 = vmul.f32 %v742_v24, %v292_v25  ;;  %v328_v41 = vmul.f32 %v742_v24, %v293_v26  ;;  %v305_v26 = vld [vmem:[%s729_s29 + $0x90] sm:$0xff] }
  0x2f   : > { %v760_v42 = vperm.slane %v286_v31, 0  ;;  %v329_v43 = vmul.f32 %v742_v24, %v294_v27  ;;  %v330_v44 = vmul.f32 %v742_v24, %v295_v28  ;;  %v331_v45 = vmul.f32 %v742_v24, %v296_v29 }
  0x30   : > { %v332_v46 = vmul.f32 %v742_v24, %v297_v30  ;;  %v333_v47 = vmul.f32 %v742_v24, %v298_v35  ;;  %v334_v48 = vmul.f32 %v742_v24, %v299_v36  ;;  %v335_v49 = vmul.f32 %v742_v24, %v300_v37  ;;  %v306_v30 = vld [vmem:[%s729_s29 + $0x98] sm:$0xff]  ;;  %v307_v35 = vld [vmem:[%s729_s29 + $0xa0] sm:$0xff] }
  0x31   : > { %v357_v50 = vadd.f32 %v760_v42, %v322_v32  ;;  %v358_v51 = vadd.f32 %v760_v42, %v323_v33  ;;  %v359_v52 = vadd.f32 %v760_v42, %v324_v34  ;;  %v360_v53 = vadd.f32 %v760_v42, %v325_v38 }
  0x32   : > { %v361_v54 = vadd.f32 %v760_v42, %v326_v39  ;;  %v362_v55 = vadd.f32 %v760_v42, %v327_v40  ;;  %v363_v56 = vadd.f32 %v760_v42, %v328_v41  ;;  %v364_v57 = vadd.f32 %v760_v42, %v329_v43 }
  0x33   : > { %vm389_vm3 = vcmp.gt.f32.partialorder %v357_v50, 0.0  ;;  %v421_v58 = vmul.f32 0.1, %v357_v50  ;;  %vm390_vm4 = vcmp.gt.f32.partialorder %v358_v51, 0.0  ;;  %v422_v59 = vmul.f32 0.1, %v358_v51 }
  0x34   : > { %vm391_vm5 = vcmp.gt.f32.partialorder %v359_v52, 0.0  ;;  %v423_v60 = vmul.f32 0.1, %v359_v52  ;;  %vm392_vm6 = vcmp.gt.f32.partialorder %v360_v53, 0.0  ;;  %v424_v61 = vmul.f32 0.1, %v360_v53 }
  0x35   : > { %v453_v62 = vsel %vm389_vm3, %v357_v50, %v421_v58  ;;  %v454_v63 = vsel %vm390_vm4, %v358_v51, %v422_v59  ;;  %vm393_vm7 = vcmp.gt.f32.partialorder %v361_v54, 0.0  ;;  %v425_v0 = vmul.f32 0.1, %v361_v54  ;;  %v308_v51 = vld [vmem:[%s729_s29 + $0xa8] sm:$0xff]  ;;  %v310_v58 = vld [vmem:[%s729_s29 + $0xb8] sm:$0xff]  ;;  %v311_v59 = vld [vmem:[%s729_s29 + $0xc0] sm:$0xff] }
  0x36   : > { %485 = vst [vmem:[%s782_s11] sm:$0xff] %v453_v62  ;;  %v455_v1 = vsel %vm391_vm5, %v359_v52, %v423_v60  ;;  %v456_v2 = vsel %vm392_vm6, %v360_v53, %v424_v61  ;;  %vm394_vm8 = vcmp.gt.f32.partialorder %v362_v55, 0.0  ;;  %v426_v3 = vmul.f32 0.1, %v362_v55  ;;  %v309_v52 = vld [vmem:[%s729_s29 + $0xb0] sm:$0xff] }
  0x37   : > { %486 = vst [vmem:[%s782_s11 + $0x8] sm:$0xff] %v454_v63  ;;  %v457_v4 = vsel %vm393_vm7, %v361_v54, %v425_v0  ;;  %vm395_vm9 = vcmp.gt.f32.partialorder %v363_v56, 0.0  ;;  %v427_v5 = vmul.f32 0.1, %v363_v56  ;;  %vm396_vm10 = vcmp.gt.f32.partialorder %v364_v57, 0.0  ;;  %v312_v63 = vld [vmem:[%s729_s29 + $0xc8] sm:$0xff] }
  0x38   : > { %487 = vst [vmem:[%s782_s11 + $0x10] sm:$0xff] %v455_v1  ;;  %v458_v6 = vsel %vm394_vm8, %v362_v55, %v426_v3  ;;  %v428_v7 = vmul.f32 0.1, %v364_v57  ;;  %v365_v8 = vadd.f32 %v760_v42, %v330_v44  ;;  %v366_v9 = vadd.f32 %v760_v42, %v331_v45  ;;  %v313_v0 = vld [vmem:[%s729_s29 + $0xd0] sm:$0xff] }
  0x39   : > { %488 = vst [vmem:[%s782_s11 + $0x18] sm:$0xff] %v456_v2  ;;  %v459_v10 = vsel %vm395_vm9, %v363_v56, %v427_v5  ;;  %v367_v11 = vadd.f32 %v760_v42, %v332_v46  ;;  %v368_v12 = vadd.f32 %v760_v42, %v333_v47  ;;  %v369_v13 = vadd.f32 %v760_v42, %v334_v48 }
  0x3a   : > { %489 = vst [vmem:[%s782_s11 + $0x20] sm:$0xff] %v457_v4  ;;  %v460_v16 = vsel %vm396_vm10, %v364_v57, %v428_v7  ;;  %vm397_vm11 = vcmp.gt.f32.partialorder %v365_v8, 0.0  ;;  %v429_v17 = vmul.f32 0.1, %v365_v8  ;;  %vm398_vm12 = vcmp.gt.f32.partialorder %v366_v9, 0.0 }
  0x3b   : > { %490 = vst [vmem:[%s782_s11 + $0x28] sm:$0xff] %v458_v6  ;;  %v430_v20 = vmul.f32 0.1, %v366_v9  ;;  %vm399_vm13 = vcmp.gt.f32.partialorder %v367_v11, 0.0  ;;  %v431_v21 = vmul.f32 0.1, %v367_v11  ;;  %v370_v22 = vadd.f32 %v760_v42, %v335_v49 }
  0x3c   : > { %491 = vst [vmem:[%s782_s11 + $0x30] sm:$0xff] %v459_v10  ;;  %v461_v23 = vsel %vm397_vm11, %v365_v8, %v429_v17  ;;  %vm400_vm14 = vcmp.gt.f32.partialorder %v368_v12, 0.0  ;;  %v432_v25 = vmul.f32 0.1, %v368_v12  ;;  %vm401_vm15 = vcmp.gt.f32.partialorder %v369_v13, 0.0  ;;  %v314_v8 = vld [vmem:[%s729_s29 + $0xd8] sm:$0xff] }
  0x3d   : > { %492 = vst [vmem:[%s782_s11 + $0x38] sm:$0xff] %v460_v16  ;;  %v462_v27 = vsel %vm398_vm12, %v366_v9, %v430_v20  ;;  %v463_v28 = vsel %vm399_vm13, %v367_v11, %v431_v21  ;;  %v433_v29 = vmul.f32 0.1, %v369_v13  ;;  %vm402_vm0 = vcmp.gt.f32.partialorder %v370_v22, 0.0  ;;  %v315_v9 = vld [vmem:[%s729_s29 + $0xe0] sm:$0xff] }
  0x3e   : > { %493 = vst [vmem:[%s782_s11 + $0x40] sm:$0xff] %v461_v23  ;;  %v464_v31 = vsel %vm400_vm14, %v368_v12, %v432_v25  ;;  %v434_v32 = vmul.f32 0.1, %v370_v22  ;;  %v336_v33 = vmul.f32 %v742_v24, %v301_v14  ;;  %v337_v34 = vmul.f32 %v742_v24, %v302_v15 }
  0x3f   : > { %494 = vst [vmem:[%s782_s11 + $0x48] sm:$0xff] %v462_v27  ;;  %v465_v36 = vsel %vm401_vm15, %v369_v13, %v433_v29  ;;  %v338_v37 = vmul.f32 %v742_v24, %v303_v18  ;;  %v339_v38 = vmul.f32 %v742_v24, %v304_v19  ;;  %v340_v39 = vmul.f32 %v742_v24, %v305_v26 }
  0x40   : > { %495 = vst [vmem:[%s782_s11 + $0x50] sm:$0xff] %v463_v28  ;;  %v466_v40 = vsel %vm402_vm0, %v370_v22, %v434_v32  ;;  %v371_v41 = vadd.f32 %v760_v42, %v336_v33  ;;  %v372_v43 = vadd.f32 %v760_v42, %v337_v34  ;;  %v341_v44 = vmul.f32 %v742_v24, %v306_v30  ;;  %v316_v30 = vld [vmem:[%s729_s29 + $0xe8] sm:$0xff] }
  0x41   : > { %496 = vst [vmem:[%s782_s11 + $0x58] sm:$0xff] %v464_v31  ;;  %v373_v45 = vadd.f32 %v760_v42, %v338_v37  ;;  %v374_v46 = vadd.f32 %v760_v42, %v339_v38  ;;  %v375_v47 = vadd.f32 %v760_v42, %v340_v39  ;;  %v342_v48 = vmul.f32 %v742_v24, %v307_v35  ;;  %v317_v35 = vld [vmem:[%s729_s29 + $0xf0] sm:$0xff] }
  0x42   : > { %497 = vst [vmem:[%s782_s11 + $0x60] sm:$0xff] %v465_v36  ;;  %vm403_vm1 = vcmp.gt.f32.partialorder %v371_v41, 0.0  ;;  %v435_v49 = vmul.f32 0.1, %v371_v41  ;;  %vm404_vm2 = vcmp.gt.f32.partialorder %v372_v43, 0.0  ;;  %v376_v50 = vadd.f32 %v760_v42, %v341_v44  ;;  %v318_v36 = vld [vmem:[%s729_s29 + $0xf8] sm:$0xff] }
  0x43   : > { %498 = vst [vmem:[%s782_s11 + $0x68] sm:$0xff] %v466_v40  ;;  %v436_v53 = vmul.f32 0.1, %v372_v43  ;;  %vm405_vm3 = vcmp.gt.f32.partialorder %v373_v45, 0.0  ;;  %v437_v54 = vmul.f32 0.1, %v373_v45  ;;  %v377_v55 = vadd.f32 %v760_v42, %v342_v48 }
  0x44   : > { %v467_v56 = vsel %vm403_vm1, %v371_v41, %v435_v49  ;;  %vm406_vm4 = vcmp.gt.f32.partialorder %v374_v46, 0.0  ;;  %v438_v57 = vmul.f32 0.1, %v374_v46  ;;  %vm407_vm5 = vcmp.gt.f32.partialorder %v375_v47, 0.0 }
  0x45   : > { %499 = vst [vmem:[%s782_s11 + $0x70] sm:$0xff] %v467_v56  ;;  %v468_v60 = vsel %vm404_vm2, %v372_v43, %v436_v53  ;;  %v469_v61 = vsel %vm405_vm3, %v373_v45, %v437_v54  ;;  %v439_v62 = vmul.f32 0.1, %v375_v47  ;;  %vm408_vm6 = vcmp.gt.f32.partialorder %v376_v50, 0.0 }
  0x46   : > { %500 = vst [vmem:[%s782_s11 + $0x78] sm:$0xff] %v468_v60  ;;  %v470_v1 = vsel %vm406_vm4, %v374_v46, %v438_v57  ;;  %v440_v2 = vmul.f32 0.1, %v376_v50  ;;  %vm409_vm7 = vcmp.gt.f32.partialorder %v377_v55, 0.0  ;;  %v441_v3 = vmul.f32 0.1, %v377_v55 }
  0x47   : > { %501 = vst [vmem:[%s782_s11 + $0x80] sm:$0xff] %v469_v61  ;;  %v471_v4 = vsel %vm407_vm5, %v375_v47, %v439_v62  ;;  %v343_v5 = vmul.f32 %v742_v24, %v308_v51  ;;  %v344_v6 = vmul.f32 %v742_v24, %v309_v52  ;;  %v345_v7 = vmul.f32 %v742_v24, %v310_v58 }
  0x48   : > { %502 = vst [vmem:[%s782_s11 + $0x88] sm:$0xff] %v470_v1  ;;  %v472_v10 = vsel %vm408_vm6, %v376_v50, %v440_v2  ;;  %v473_v11 = vsel %vm409_vm7, %v377_v55, %v441_v3  ;;  %v346_v12 = vmul.f32 %v742_v24, %v311_v59  ;;  %v347_v13 = vmul.f32 %v742_v24, %v312_v63 }
  0x49   : > { %503 = vst [vmem:[%s782_s11 + $0x90] sm:$0xff] %v471_v4  ;;  %v378_v14 = vadd.f32 %v760_v42, %v343_v5  ;;  %v379_v15 = vadd.f32 %v760_v42, %v344_v6  ;;  %v380_v16 = vadd.f32 %v760_v42, %v345_v7  ;;  %v348_v17 = vmul.f32 %v742_v24, %v313_v0 }
  0x4a   : > { %504 = vst [vmem:[%s782_s11 + $0x98] sm:$0xff] %v472_v10  ;;  %v381_v18 = vadd.f32 %v760_v42, %v346_v12  ;;  %v382_v19 = vadd.f32 %v760_v42, %v347_v13  ;;  %v349_v20 = vmul.f32 %v742_v24, %v314_v8  ;;  %v350_v21 = vmul.f32 %v742_v24, %v315_v9 }
  0x4b   : > { %505 = vst [vmem:[%s782_s11 + $0xa0] sm:$0xff] %v473_v11  ;;  %vm410_vm8 = vcmp.gt.f32.partialorder %v378_v14, 0.0  ;;  %v442_v22 = vmul.f32 0.1, %v378_v14  ;;  %vm411_vm9 = vcmp.gt.f32.partialorder %v379_v15, 0.0  ;;  %vm412_vm10 = vcmp.gt.f32.partialorder %v380_v16, 0.0 }
  0x4c   : > { %v443_v23 = vmul.f32 0.1, %v379_v15  ;;  %v444_v25 = vmul.f32 0.1, %v380_v16  ;;  %vm413_vm11 = vcmp.gt.f32.partialorder %v381_v18, 0.0  ;;  %vm414_vm12 = vcmp.gt.f32.partialorder %v382_v19, 0.0 }
  0x4d   : > { %v474_v26 = vsel %vm410_vm8, %v378_v14, %v442_v22  ;;  %v445_v27 = vmul.f32 0.1, %v381_v18  ;;  %v446_v28 = vmul.f32 0.1, %v382_v19  ;;  %v383_v29 = vadd.f32 %v760_v42, %v348_v17 }
  0x4e   : > { %506 = vst [vmem:[%s782_s11 + $0xa8] sm:$0xff] %v474_v26  ;;  %v475_v31 = vsel %vm411_vm9, %v379_v15, %v443_v23  ;;  %v476_v32 = vsel %vm412_vm10, %v380_v16, %v444_v25  ;;  %v384_v33 = vadd.f32 %v760_v42, %v349_v20  ;;  %v385_v34 = vadd.f32 %v760_v42, %v350_v21 }
  0x4f   : > { %507 = vst [vmem:[%s782_s11 + $0xb0] sm:$0xff] %v475_v31  ;;  %v477_v37 = vsel %vm413_vm11, %v381_v18, %v445_v27  ;;  %v478_v38 = vsel %vm414_vm12, %v382_v19, %v446_v28  ;;  %vm415_vm13 = vcmp.gt.f32.partialorder %v383_v29, 0.0  ;;  %v447_v39 = vmul.f32 0.1, %v383_v29 }
  0x50   : > { %508 = vst [vmem:[%s782_s11 + $0xb8] sm:$0xff] %v476_v32  ;;  %vm416_vm14 = vcmp.gt.f32.partialorder %v384_v33, 0.0  ;;  %v448_v40 = vmul.f32 0.1, %v384_v33  ;;  %vm417_vm15 = vcmp.gt.f32.partialorder %v385_v34, 0.0  ;;  %v351_v41 = vmul.f32 %v742_v24, %v316_v30 }
  0x51   : > { %509 = vst [vmem:[%s782_s11 + $0xc0] sm:$0xff] %v477_v37  ;;  %v479_v43 = vsel %vm415_vm13, %v383_v29, %v447_v39  ;;  %v449_v44 = vmul.f32 0.1, %v385_v34  ;;  %v352_v45 = vmul.f32 %v742_v24, %v317_v35  ;;  %v353_v46 = vmul.f32 %v742_v24, %v318_v36 }
  0x52   : > { %510 = vst [vmem:[%s782_s11 + $0xc8] sm:$0xff] %v478_v38  ;;  %v480_v47 = vsel %vm416_vm14, %v384_v33, %v448_v40  ;;  %v386_v48 = vadd.f32 %v760_v42, %v351_v41 }
  0x53   : > { %511 = vst [vmem:[%s782_s11 + $0xd0] sm:$0xff] %v479_v43  ;;  %v481_v49 = vsel %vm417_vm15, %v385_v34, %v449_v44  ;;  %v387_v50 = vadd.f32 %v760_v42, %v352_v45  ;;  %v388_v51 = vadd.f32 %v760_v42, %v353_v46 }
  0x54   : > { %512 = vst [vmem:[%s782_s11 + $0xd8] sm:$0xff] %v480_v47  ;;  %vm418_vm0 = vcmp.gt.f32.partialorder %v386_v48, 0.0  ;;  %v450_v52 = vmul.f32 0.1, %v386_v48 }
  0x55   : > { %513 = vst [vmem:[%s782_s11 + $0xe0] sm:$0xff] %v481_v49  ;;  %vm419_vm1 = vcmp.gt.f32.partialorder %v387_v50, 0.0  ;;  %v451_v53 = vmul.f32 0.1, %v387_v50  ;;  %vm420_vm2 = vcmp.gt.f32.partialorder %v388_v51, 0.0 }
  0x56   : > { %v482_v24 = vsel %vm418_vm0, %v386_v48, %v450_v52  ;;  %v452_v54 = vmul.f32 0.1, %v388_v51 }
  0x57   : > { %514 = vst [vmem:[%s782_s11 + $0xe8] sm:$0xff] %v482_v24  ;;  %v483_v55 = vsel %vm419_vm1, %v387_v50, %v451_v53 }
  0x58   : > { %515 = vst [vmem:[%s782_s11 + $0xf0] sm:$0xff] %v483_v55  ;;  %v484_v56 = vsel %vm420_vm2, %v388_v51, %v452_v54 }
  0x59   : > { %516 = vst [vmem:[%s782_s11 + $0xf8] sm:$0xff] %v484_v56 }
  0x5a PF: > { %s15_s20 = sadd.s32 1, %s665_s20   ;;  %s894_s18 = smov %s661_s19 }
  0x5b   : > { %p12_p5 = scmp.ge.s32.totalorder %s15_s20, 4   ;;  %s895_s19 = smov %s897_s21 }
  0x5d   :  { %14 = sbr.rel (!%p12_p5) target bundleno = 2 (0x2), region = 70 }

// kernel: conv_block_forward.2
= control target key start
LH: loop header
LB: loop body
LE: loop exit
PB: predicated region body
PF: predicated region fallthrough
CT: control target
= control target key end

     0   :  { %s5509_s15 = smov 0   ;;  %s5511_s16 = smov 0   ;;  %s7063_s0 = inlined_call_operand.vmem [shape: bf16[2,18,18,4], index: 0, kind: input, shape index: {}]   ;;  %s7064_s1 = inlined_call_operand.vmem [shape: bf16[9,4,128], index: 1, kind: input, shape index: {}]   ;;  %s7065_s2 = inlined_call_operand.vmem [shape: f32[2,256,128], index: 2, kind: output, shape index: {0}]   ;;  %s7066_s3 = inlined_call_operand.vmem [shape: f32[2,1,128], index: 3, kind: output, shape index: {1}]   ;;  %s7067_s4 = inlined_call_operand.vmem [shape: f32[2,1,128], index: 4, kind: output, shape index: {2}]  }
   0x1   :  { %s5513_s17 = smov 0  }
   0x2 LB: > { %s27_s18 = sadd.s32 1, %s5477_s16  ;;  %p4839_p0 = scmp.ge.s32.totalorder %s5481_s17, 1  ;;  %s5481_s17 = sphi %s5513_s17, %s15_s17   ;;  %s5477_s16 = sphi %s5511_s16, %s7073_s16   ;;  %s5473_s15 = sphi %s5509_s15, %s7072_s15  }
   0x3   : > { %p29_p1 = scmp.ge.s32.totalorder %s27_s18, 2  ;;  %p181_p2 = scmp.lt.s32.totalorder %s5481_s17, 3 }
   0x5   : > { %s7075_s18 = smov (%p29_p1, %s27_s18), 0  ;;  %p182_p3 = pnand %p4839_p0, %p181_p2 }
   0x6   : > { %p217_p4 = scmp.lt.s32.totalorder (!%p182_p3), %s5473_s15, 1 }
   0x7   : > { %185 = sbr.rel (%p182_p3) target bundleno = 745 (0x2e9), region = 28 }
   0xc   : > { %v291_v0 = vld [vmem:[%s7064_s1] sm:$0x3]  ;;  %vm421_vm0 = vcmask 1041408   ;;  %v4923_v2 = vld [vmem:[%s7064_s1 + $0x2] sm:$0x3]  ;;  %s7077_s15 = smov (!%p217_p4, %s5473_s15), 1 }
   0xd   : > { %v423_v1 = vsel %vm421_vm0, %v291_v0, 0  ;;  %v4956_v3 = vld [vmem:[%s7064_s1 + $0x4] sm:$0x3]  ;;  %v1032_v4 = vsel %vm421_vm0, %v4923_v2, 0  ;;  %v5021_v6 = vld [vmem:[%s7064_s1 + $0x6] sm:$0x3]  ;;  %s7014_s25 = scalar_lea.vmem %s7066_s3, %s7077_s15  ;;  %s7021_s28 = scalar_lea.vmem %s7067_s4, %s7077_s15 }
   0xe   : > { %5382 = vmatpush.bf16.msra.mxu1 %v423_v1  ;;  %5383 = vmatpush.bf16.msra.mxu2 %v423_v1  ;;  %v1449_v5 = vsel %vm421_vm0, %v4956_v3, 0  ;;  %v1819_v7 = vsel %vm421_vm0, %v5021_v6, 0  ;;  %v5102_v8 = vld [vmem:[%s7064_s1 + $0x8] sm:$0x3]  ;;  %s5385_s29 = smul.u32 216, %s7077_s15  ;;  %vm372_vm1 = vcmask 31744  }
   0xf   : > { %5384 = vmatpush.bf16.msra.mxu3 %v423_v1  ;;  %v2489_v9 = vsel %vm421_vm0, %v5102_v8, 0  ;;  %432 = vmatpush.bf16.msra.mxu0 %v423_v1  ;;  %v5135_v25 = vld [vmem:[%s7064_s1 + $0xa] sm:$0x3]  ;;  %v5200_v26 = vld [vmem:[%s7064_s1 + $0xc] sm:$0x3]  ;;  %vm1235_vm4 = vcmask 1042432  }
  0x10   : > { %s5553_s6 = scalar_lea.vmem %s7063_s0, %s5385_s29  ;;  %v2903_v29 = vsel %vm421_vm0, %v5135_v25, 0  ;;  %v3273_v30 = vsel %vm421_vm0, %v5200_v26, 0  ;;  %v5281_v31 = vld [vmem:[%s7064_s1 + $0xe] sm:$0x3]  ;;  %vm546_vm2 = vsmask.f32 3328 }
  0x11   : > { %v5338_v10 = vld [vmem:[%s5553_s6 + $0x30] sm:$0xff]  ;;  %v5342_v11 = vld [vmem:[%s5553_s6 + $0x60] sm:$0xff]  ;;  %v5340_v18 = vld [vmem:[%s5553_s6 + $0x48] sm:$0xff]  ;;  %v3943_v35 = vsel %vm421_vm0, %v5281_v31, 0  ;;  %vm547_vm3 = vsmask.f32 7440 }
  0x12   : > { %1041 = vmatpush.bf16.msrb.mxu1 %v1032_v4  ;;  %1458 = vmatpush.bf16.msrb.mxu2 %v1449_v5  ;;  %v5346_v12 = vld [vmem:[%s5553_s6 + $0x90] sm:$0xff]  ;;  %v5334_v13 = vld [vmem:[%s5553_s6] sm:$0xff]  ;;  %v5344_v19 = vld [vmem:[%s5553_s6 + $0x78] sm:$0xff]  ;;  %vm1236_vm5 = vcmask 1046532   ;;  %s5333_s19 = sshll.u32 %s7077_s15, 8 }
  0x13   : > { %1828 = vmatpush.bf16.msrb.mxu3 %v1819_v7  ;;  %2498 = vmatpush.bf16.msrb.mxu0 %v2489_v9  ;;  %v5339_v14 = vld [vmem:[%s5553_s6 + $0x3c] sm:$0xff]  ;;  %v5343_v15 = vld [vmem:[%s5553_s6 + $0x6c] sm:$0xff]  ;;  %v5579_v23 = vld [vmem:[%s5553_s6 + $0x4] sm:$0xf]  ;;  %s5790_s22 = scalar_lea.vmem %s7065_s2, %s5333_s19 }
  0x14   : > { %4911 = vmatmul.msk.bf16.vlgmr.msra.gmra.mxu1 %vm372_vm1, %v5338_v10  ;;  %4915 = vmatmul.msk.bf16.vlgmr.msra.gmra.mxu2 %vm372_vm1, %v5342_v11  ;;  %v5347_v16 = vld [vmem:[%s5553_s6 + $0x9c] sm:$0xff]  ;;  %v5335_v17 = vld [vmem:[%s5553_s6 + $0xc] sm:$0xff]  ;;  %v559_v33 = vshll.u32 %v5579_v23, 16  ;;  %v563_v34 = vshrl.u32 %v5579_v23, 16  ;;  %v245_v40 = vld [vmem:[%s5553_s6 + $0x8] sm:$0x1] }
  0x15   : > { %4919 = vmatmul.msk.bf16.vlgmr.msra.gmra.mxu3 %vm372_vm1, %v5346_v12  ;;  %4907 = vmatmul.msk.bf16.vlgmr.msra.gmra.mxu0 %vm372_vm1, %v5334_v13  ;;  %v5348_v20 = vld [vmem:[%s5553_s6 + $0xa8] sm:$0xff]  ;;  %v5336_v21 = vld [vmem:[%s5553_s6 + $0x18] sm:$0xff]  ;;  %v5576_v22 = vld [vmem:[%s5553_s6] sm:$0xf]  ;;  %v569_v50 = vshll.u32 %v245_v40, 16  ;;  %v1240_v53 = vrot.slane %v5579_v23, 5 }
  0x16   : > { %v4973_v24 = vld [vmem:[%s5553_s6 + $0xc] sm:$0xf]  ;;  %v4974_v27 = vld [vmem:[%s5553_s6 + $0x10] sm:$0xf]  ;;  %v550_v28 = vshrl.u32 %v5576_v22, 16  ;;  %v553_v32 = vshll.u32 %v5576_v22, 16  ;;  %2912 = vmatpush.bf16.msra.mxu1 %v2903_v29  ;;  %3282 = vmatpush.bf16.msra.mxu2 %v3273_v30  ;;  %vm5611_vm6 = vmor %vm546_vm2, %vm547_vm3 }
  0x17   : > { %3952 = vmatpush.bf16.msra.mxu3 %v3943_v35  ;;  %v2007_v36 = vshrl.u32 %v4973_v24, 16  ;;  %v2010_v37 = vshll.u32 %v4973_v24, 16  ;;  %v2016_v38 = vshll.u32 %v4974_v27, 16  ;;  %v2020_v39 = vshrl.u32 %v4974_v27, 16  ;;  %v4975_v49 = vld [vmem:[%s5553_s6 + $0x14] sm:$0x1]  ;;  %vm5617_vm7 = vmor %vm1235_vm4, %vm1236_vm5 }
  0x18   : > { %v552_v41 = vrot.slane %v550_v28, 4  ;;  %v555_v42 = vrot.slane %v553_v32, 5  ;;  %v561_v43 = vrot.slane %v559_v33, 5  ;;  %v565_v44 = vrot.slane %v563_v34, 4  ;;  %v5341_v57 = vld [vmem:[%s5553_s6 + $0x54] sm:$0xff]  ;;  %v5345_v58 = vld [vmem:[%s5553_s6 + $0x84] sm:$0xff] }
  0x19   : > { %v2009_v45 = vrot.slane %v2007_v36, 4  ;;  %v2012_v46 = vrot.slane %v2010_v37, 5  ;;  %v2018_v47 = vrot.slane %v2016_v38, 5  ;;  %v2022_v48 = vrot.slane %v2020_v39, 4  ;;  %v5349_v59 = vld [vmem:[%s5553_s6 + $0xb4] sm:$0xff]  ;;  %v5337_v61 = vld [vmem:[%s5553_s6 + $0x24] sm:$0xff] }
  0x1a   : > { %v556_v51 = vor.u32 %v555_v42, %v552_v41  ;;  %v566_v52 = vor.u32 %v565_v44, %v561_v43  ;;  %v2026_v56 = vshll.u32 %v4975_v49, 16  ;;  %v571_v60 = vrot.slane %v569_v50, 5  ;;  %v5624_v8 = vld [vmem:[%s5553_s6 + $0xc] sm:$0xf]  ;;  %v5627_v9 = vld [vmem:[%s5553_s6 + $0x10] sm:$0xf] }
  0x1b   : > { %v2013_v54 = vor.u32 %v2012_v46, %v2009_v45  ;;  %v2023_v55 = vor.u32 %v2022_v48, %v2018_v47  ;;  %v4940_v0 = vrot.slane %v5576_v22, 9  ;;  %v1242_v1 = vrot.slane %v1240_v53, 4  ;;  %v5314_v10 = vld [vmem:[%s7064_s1 + $0x10] sm:$0x3]  ;;  %v248_v34 = vld [vmem:[%s5553_s6 + $0x14] sm:$0x1] }
  0x1c   : > { %v557_v62 = vrot.slane %v556_v51, 4  ;;  %v567_v63 = vrot.slane %v566_v52, 4  ;;  %v1243_v3 = vrot.slane %v245_v40, 5  ;;  %v2028_v6 = vrot.slane %v2026_v56, 5  ;;  %v5350_v50 = vld [vmem:[%s5553_s6 + $0xc] sm:$0xff] }
  0x1d   : > { %v2014_v4 = vrot.slane %v2013_v54, 4  ;;  %v2024_v5 = vrot.slane %v2023_v55, 4  ;;  %v4357_v13 = vsel %vm421_vm0, %v5314_v10, 0  ;;  %v583_v22 = vshll.u32 %v5627_v9, 16  ;;  %v5656_v56 = vld [vmem:[%s5553_s6 + $0x18] sm:$0xf] }
  0x1e   : > { %v562_v11 = vsel %vm5611_vm6, %v557_v62, %v561_v43  ;;  %v572_v12 = vsel %vm5611_vm6, %v567_v63, %v571_v60  ;;  %4366 = vmatpush.bf16.msra.mxu0 %v4357_v13  ;;  %v587_v23 = vshrl.u32 %v5627_v9, 16  ;;  %v4978_v43 = vld [vmem:[%s5553_s6 + $0x20] sm:$0x1]  ;;  %v593_v45 = vshll.u32 %v248_v34, 16  ;;  %v4979_v62 = vld [vmem:[%s5553_s6 + $0x24] sm:$0xf] }
  0x1f   : > { %v935_v28 = vunpack.c.l.b16 %v562_v11  ;;  %v936_v29 = vunpack.c.l.b16 %v572_v12  ;;  %v585_v37 = vrot.slane %v583_v22, 5  ;;  %v1247_v49 = vrot.slane %v5627_v9, 5  ;;  %v5381_v7 = vld [vmem:[%s5553_s6 + $0xcc] sm:$0xff] }
  0x20   : > { %v589_v38 = vrot.slane %v587_v23, 4  ;;  %v2050_v54 = vshll.u32 %v4978_v43, 16  ;;  %v595_v55 = vrot.slane %v593_v45, 5  ;;  %v4941_v60 = vrot.slane %v5624_v8, 9  ;;  %v5351_v45 = vld [vmem:[%s5553_s6 + $0x18] sm:$0xff] }
  0x21   : > { %v967_v44 = vpack.c.b16 %v936_v29, %v935_v28  ;;  %v1250_v63 = vrot.slane %v248_v34, 5  ;;  %v2058_v11 = vshll.u32 %v4979_v62, 16 }
  0x22   : > { %v590_v48 = vor.u32 %v589_v38, %v585_v37 }
  0x23   : > { %v2060_v28 = vrot.slane %v2058_v11, 5 }
  0x24   : > { %4912 = vmatmul.msk.bf16.gmra.mxu1 %vm372_vm1, %v5339_v14  ;;  %4916 = vmatmul.msk.bf16.gmra.mxu2 %vm372_vm1, %v5343_v15  ;;  %v4976_v14 = vld [vmem:[%s5553_s6 + $0x18] sm:$0xf]  ;;  %v4977_v15 = vld [vmem:[%s5553_s6 + $0x1c] sm:$0xf] }
  0x25   : > { %4920 = vmatmul.msk.bf16.gmra.mxu3 %vm372_vm1, %v5347_v16  ;;  %4908 = vmatmul.msk.bf16.gmra.mxu0 %vm372_vm1, %v5335_v17  ;;  %v1241_v16 = vsel %vm5617_vm7, %v4940_v0, %v1240_v53  ;;  %v1244_v17 = vsel %vm5617_vm7, %v1242_v1, %v1243_v3  ;;  %v2031_v24 = vshrl.u32 %v4976_v14, 16  ;;  %v2034_v25 = vshll.u32 %v4976_v14, 16 }
  0x26   : > { %v2040_v26 = vshll.u32 %v4977_v15, 16  ;;  %v2044_v27 = vshrl.u32 %v4977_v15, 16  ;;  %v1352_v30 = vunpack.c.l.b16 %v1241_v16  ;;  %v1353_v31 = vunpack.c.l.b16 %v1244_v17 }
  0x27   : > { %v2033_v39 = vrot.slane %v2031_v24, 4  ;;  %v2036_v40 = vrot.slane %v2034_v25, 5  ;;  %v2052_v3 = vrot.slane %v2050_v54, 5  ;;  %v1248_v16 = vsel %vm5617_vm7, %v4941_v60, %v1247_v49 }
  0x28   : > { %v2042_v41 = vrot.slane %v2040_v26, 5  ;;  %v2046_v42 = vrot.slane %v2044_v27, 4  ;;  %v1384_v46 = vpack.c.b16 %v1353_v31, %v1352_v30  ;;  %v251_v26 = vld [vmem:[%s5553_s6 + $0x20] sm:$0x1]  ;;  %v1354_v29 = vunpack.c.l.b16 %v1248_v16 }
  0x29   : > { %v2037_v52 = vor.u32 %v2036_v40, %v2033_v39  ;;  %v617_v38 = vshll.u32 %v251_v26, 16  ;;  %v1257_v54 = vrot.slane %v251_v26, 5 }
  0x2a   : > { %v2047_v53 = vor.u32 %v2046_v42, %v2042_v41 }
  0x2b   : > { %v2038_v0 = vrot.slane %v2037_v52, 4  ;;  %v4942_v52 = vrot.slane %v5656_v56, 9 }
  0x2c   : > { %v2048_v1 = vrot.slane %v2047_v53, 4 }
  0x34   : > { %4913 = vmatmul.msk.bf16.gmra.mxu1 %vm372_vm1, %v5340_v18  ;;  %4917 = vmatmul.msk.bf16.gmra.mxu2 %vm372_vm1, %v5344_v19  ;;  %v2019_v18 = vsel %vm5611_vm6, %v2014_v4, %v2018_v47  ;;  %v2029_v19 = vsel %vm5611_vm6, %v2024_v5, %v2028_v6  ;;  %v4980_v4 = vld [vmem:[%s5553_s6 + $0x28] sm:$0xf]  ;;  %v598_v5 = vshrl.u32 %v5656_v56, 16  ;;  %v601_v6 = vshll.u32 %v5656_v56, 16 }
  0x35   : > { %4921 = vmatmul.msk.bf16.gmra.mxu3 %vm372_vm1, %v5348_v20  ;;  %4909 = vmatmul.msk.bf16.gmra.mxu0 %vm372_vm1, %v5336_v21  ;;  %v574_v20 = vshrl.u32 %v5624_v8, 16  ;;  %v577_v21 = vshll.u32 %v5624_v8, 16  ;;  %v2392_v32 = vunpack.c.l.b16 %v2019_v18  ;;  %v2393_v33 = vunpack.c.l.b16 %v2029_v19 }
  0x36   : > { %v2055_v8 = vshrl.u32 %v4979_v62, 16  ;;  %v2064_v14 = vshll.u32 %v4980_v4, 16  ;;  %v2068_v15 = vshrl.u32 %v4980_v4, 16  ;;  %v2043_v18 = vsel %vm5611_vm6, %v2038_v0, %v2042_v41  ;;  %v4982_v62 = vld [vmem:[%s5553_s6 + $0x30] sm:$0xf] }
  0x37   : > { %v576_v35 = vrot.slane %v574_v20, 4  ;;  %v579_v36 = vrot.slane %v577_v21, 5  ;;  %v2424_v51 = vpack.c.b16 %v2393_v33, %v2392_v32  ;;  %v2053_v19 = vsel %vm5611_vm6, %v2048_v1, %v2052_v3  ;;  %v4983_v4 = vld [vmem:[%s5553_s6 + $0x34] sm:$0xf] }
  0x38   : > { %v600_v20 = vrot.slane %v598_v5, 4  ;;  %v603_v21 = vrot.slane %v601_v6, 5  ;;  %v2057_v27 = vrot.slane %v2055_v8, 4  ;;  %v2066_v31 = vrot.slane %v2064_v14, 5  ;;  %v254_v8 = vld [vmem:[%s5553_s6 + $0x2c] sm:$0x1] }
  0x39   : > { %v580_v47 = vor.u32 %v579_v36, %v576_v35  ;;  %v2070_v32 = vrot.slane %v2068_v15, 4  ;;  %v2394_v33 = vunpack.c.l.b16 %v2043_v18  ;;  %v2395_v34 = vunpack.c.l.b16 %v2053_v19  ;;  %v4981_v35 = vld [vmem:[%s5553_s6 + $0x2c] sm:$0x1] }
  0x3a   : > { %v604_v36 = vor.u32 %v603_v21, %v600_v20  ;;  %v2061_v40 = vor.u32 %v2060_v28, %v2057_v27  ;;  %v2082_v14 = vshll.u32 %v4982_v62, 16  ;;  %v2088_v15 = vshll.u32 %v4983_v4, 16 }
  0x3b   : > { %v2071_v43 = vor.u32 %v2070_v32, %v2066_v31  ;;  %v2092_v16 = vshrl.u32 %v4983_v4, 16  ;;  %v641_v21 = vshll.u32 %v254_v8, 16 }
  0x3c   : > { %v2084_v27 = vrot.slane %v2082_v14, 5  ;;  %v2090_v28 = vrot.slane %v2088_v15, 5 }
  0x44   : > { %4914 = vmatmul.msk.bf16.gmra.mxu1 %vm372_vm1, %v5341_v57  ;;  %4918 = vmatmul.msk.bf16.gmra.mxu2 %vm372_vm1, %v5345_v58  ;;  %v5659_v57 = vld [vmem:[%s5553_s6 + $0x1c] sm:$0xf]  ;;  %v581_v58 = vrot.slane %v580_v47, 4  ;;  %v5689_v47 = vld [vmem:[%s5553_s6 + $0x24] sm:$0xf] }
  0x45   : > { %4922 = vmatmul.msk.bf16.gmra.mxu3 %vm372_vm1, %v5349_v59  ;;  %4910 = vmatmul.msk.bf16.gmra.mxu0 %vm372_vm1, %v5337_v61  ;;  %v591_v59 = vrot.slane %v590_v48, 4  ;;  %v1249_v61 = vrot.slane %v1247_v49, 4  ;;  %v607_v9 = vshll.u32 %v5659_v57, 16  ;;  %v611_v10 = vshrl.u32 %v5659_v57, 16 }
  0x46   : > { %v586_v12 = vsel %vm5611_vm6, %v581_v58, %v585_v37  ;;  %v1254_v39 = vrot.slane %v5659_v57, 5  ;;  %v605_v48 = vrot.slane %v604_v36, 4  ;;  %v622_v57 = vshrl.u32 %v5689_v47, 16 }
  0x47   : > { %v596_v13 = vsel %vm5611_vm6, %v591_v59, %v595_v55  ;;  %v1251_v17 = vsel %vm5617_vm7, %v1249_v61, %v1250_v63  ;;  %v609_v22 = vrot.slane %v607_v9, 5  ;;  %v613_v23 = vrot.slane %v611_v10, 4 }
  0x48   : > { %v937_v24 = vunpack.c.l.b16 %v586_v12  ;;  %v938_v25 = vunpack.c.l.b16 %v596_v13  ;;  %v1355_v30 = vunpack.c.l.b16 %v1251_v17  ;;  %v1256_v53 = vrot.slane %v1254_v39, 4 }
  0x49   : > { %v614_v37 = vor.u32 %v613_v23, %v609_v22  ;;  %v2062_v55 = vrot.slane %v2061_v40, 4  ;;  %v625_v58 = vshll.u32 %v5689_v47, 16  ;;  %v2072_v59 = vrot.slane %v2071_v43, 4 }
  0x4a   : > { %v968_v41 = vpack.c.b16 %v938_v25, %v937_v24  ;;  %v1385_v42 = vpack.c.b16 %v1355_v30, %v1354_v29  ;;  %v610_v63 = vsel %vm5611_vm6, %v605_v48, %v609_v22  ;;  %v1255_v1 = vsel %vm5617_vm7, %v4942_v52, %v1254_v39 }
  0x4b   : > { %v615_v49 = vrot.slane %v614_v37, 4  ;;  %v1258_v3 = vsel %vm5617_vm7, %v1256_v53, %v1257_v54  ;;  %v624_v5 = vrot.slane %v622_v57, 4  ;;  %v627_v6 = vrot.slane %v625_v58, 5 }
  0x4c   : > { %v2067_v9 = vsel %vm5611_vm6, %v2062_v55, %v2066_v31  ;;  %v2079_v13 = vshrl.u32 %v4982_v62, 16  ;;  %v939_v17 = vunpack.c.l.b16 %v610_v63  ;;  %v1356_v19 = vunpack.c.l.b16 %v1255_v1  ;;  %v4984_v31 = vld [vmem:[%s5553_s6 + $0x38] sm:$0x1] }
  0x4d   : > { %v1357_v20 = vunpack.c.l.b16 %v1258_v3  ;;  %v2396_v22 = vunpack.c.l.b16 %v2067_v9  ;;  %v628_v24 = vor.u32 %v627_v6, %v624_v5  ;;  %v2094_v29 = vrot.slane %v2092_v16, 4 }
  0x4e   : > { %v2081_v26 = vrot.slane %v2079_v13, 4 }
  0x4f   : > { %v629_v36 = vrot.slane %v628_v24, 4  ;;  %v2095_v40 = vor.u32 %v2094_v29, %v2090_v28  ;;  %v5353_v29 = vld [vmem:[%s5553_s6 + $0x30] sm:$0xff] }
  0x50   : > { %v2085_v39 = vor.u32 %v2084_v27, %v2081_v26 }
  0x51   : > { %v2096_v54 = vrot.slane %v2095_v40, 4 }
  0x54   : > { %4924 = vmatmul.msk.bf16.vlgmr.msrb.gmra.mxu1 %vm372_vm1, %v967_v44  ;;  %4957 = vmatmul.msk.bf16.vlgmr.msrb.gmra.mxu2 %vm372_vm1, %v1384_v46  ;;  %v2074_v44 = vshll.u32 %v4981_v35, 16  ;;  %v2425_v46 = vpack.c.b16 %v2395_v34, %v2394_v33  ;;  %v1386_v33 = vpack.c.b16 %v1357_v20, %v1356_v19  ;;  %v5352_v35 = vld [vmem:[%s5553_s6 + $0x24] sm:$0xff] }
  0x55   : > { %5086 = vmatmul.msk.bf16.vlgmr.msrb.gmra.mxu3 %vm372_vm1, %v5350_v50  ;;  %5103 = vmatmul.msk.bf16.vlgmr.msrb.gmra.mxu0 %vm372_vm1, %v2424_v51  ;;  %v619_v50 = vrot.slane %v617_v38, 5  ;;  %v5692_v51 = vld [vmem:[%s5553_s6 + $0x28] sm:$0xf]  ;;  %v643_v38 = vrot.slane %v641_v21, 5  ;;  %v4987_v19 = vld [vmem:[%s5553_s6 + $0x44] sm:$0x1] }
  0x56   : > { %v2076_v60 = vrot.slane %v2074_v44, 5  ;;  %v631_v56 = vshll.u32 %v5692_v51, 16  ;;  %v635_v61 = vshrl.u32 %v5692_v51, 16  ;;  %v1261_v30 = vrot.slane %v5692_v51, 5  ;;  %v4986_v51 = vld [vmem:[%s5553_s6 + $0x40] sm:$0xf] }
  0x57   : > { %v620_v0 = vsel %vm5611_vm6, %v615_v49, %v619_v50  ;;  %v1264_v44 = vrot.slane %v254_v8, 5  ;;  %v4985_v50 = vld [vmem:[%s5553_s6 + $0x3c] sm:$0xf]  ;;  %v2112_v62 = vshll.u32 %v4986_v51, 16  ;;  %v2116_v63 = vshrl.u32 %v4986_v51, 16 }
  0x58   : > { %v2077_v10 = vsel %vm5611_vm6, %v2072_v59, %v2076_v60  ;;  %v633_v11 = vrot.slane %v631_v56, 5  ;;  %v637_v12 = vrot.slane %v635_v61, 4  ;;  %v940_v18 = vunpack.c.l.b16 %v620_v0 }
  0x59   : > { %v2397_v23 = vunpack.c.l.b16 %v2077_v10  ;;  %v1263_v43 = vrot.slane %v1261_v30, 4  ;;  %v2103_v56 = vshrl.u32 %v4985_v50, 16  ;;  %v2106_v61 = vshll.u32 %v4985_v50, 16 }
  0x5a   : > { %v638_v25 = vor.u32 %v637_v12, %v633_v11  ;;  %v969_v32 = vpack.c.b16 %v940_v18, %v939_v17  ;;  %v634_v48 = vsel %vm5611_vm6, %v629_v36, %v633_v11  ;;  %v257_v12 = vld [vmem:[%s5553_s6 + $0x38] sm:$0x1]  ;;  %v2114_v15 = vrot.slane %v2112_v62, 5 }
  0x5b   : > { %v2426_v34 = vpack.c.b16 %v2397_v23, %v2396_v22  ;;  %v1265_v58 = vsel %vm5617_vm7, %v1263_v43, %v1264_v44  ;;  %v941_v0 = vunpack.c.l.b16 %v634_v48  ;;  %v2105_v13 = vrot.slane %v2103_v56, 4  ;;  %v5765_v43 = vld [vmem:[%s5553_s6 + $0x40] sm:$0xf]  ;;  %v4989_v48 = vld [vmem:[%s5553_s6 + $0x4c] sm:$0xf] }
  0x5c   : > { %v639_v37 = vrot.slane %v638_v25, 4  ;;  %v1359_v10 = vunpack.c.l.b16 %v1265_v58  ;;  %v2108_v14 = vrot.slane %v2106_v61, 5  ;;  %v2118_v16 = vrot.slane %v2116_v63, 4 }
  0x5d   : > { %v665_v23 = vshll.u32 %v257_v12, 16 }
  0x5e   : > { %v644_v49 = vsel %vm5611_vm6, %v639_v37, %v643_v38  ;;  %v2109_v26 = vor.u32 %v2108_v14, %v2105_v13  ;;  %v2119_v27 = vor.u32 %v2118_v16, %v2114_v15  ;;  %v1271_v37 = vrot.slane %v257_v12, 5  ;;  %v4990_v12 = vld [vmem:[%s5553_s6 + $0x50] sm:$0x1] }
  0x5f   : > { %v942_v1 = vunpack.c.l.b16 %v644_v49 }
  0x60   : > { %v2110_v38 = vrot.slane %v2109_v26, 4  ;;  %v2146_v26 = vshll.u32 %v4990_v12, 16 }
  0x61   : > { %v970_v21 = vpack.c.b16 %v942_v1, %v941_v0  ;;  %v260_v1 = vld [vmem:[%s5553_s6 + $0x44] sm:$0x1] }
  0x62   : > { %v2115_v50 = vsel %vm5611_vm6, %v2110_v38, %v2114_v15  ;;  %v689_v15 = vshll.u32 %v260_v1, 16  ;;  %v2148_v38 = vrot.slane %v2146_v26, 5 }
  0x63   : > { %v2400_v0 = vunpack.c.l.b16 %v2115_v50 }
  0x64   : > { %4925 = vmatmul.msk.bf16.gmra.mxu1 %vm372_vm1, %v968_v41  ;;  %4958 = vmatmul.msk.bf16.gmra.mxu2 %vm372_vm1, %v1385_v42  ;;  %v2098_v41 = vshll.u32 %v4984_v31, 16  ;;  %v4943_v42 = vrot.slane %v5689_v47, 9  ;;  %v2086_v47 = vrot.slane %v2085_v39, 4  ;;  %v2120_v39 = vrot.slane %v2119_v27, 4 }
  0x65   : > { %5087 = vmatmul.msk.bf16.gmra.mxu3 %vm372_vm1, %v5351_v45  ;;  %5104 = vmatmul.msk.bf16.gmra.mxu0 %vm372_vm1, %v2425_v46  ;;  %v5723_v45 = vld [vmem:[%s5553_s6 + $0x30] sm:$0xf]  ;;  %v5728_v46 = vld [vmem:[%s5553_s6 + $0x34] sm:$0xf]  ;;  %v691_v27 = vrot.slane %v689_v15, 5 }
  0x66   : > { %v646_v52 = vshrl.u32 %v5723_v45, 16  ;;  %v649_v53 = vshll.u32 %v5723_v45, 16  ;;  %v2100_v55 = vrot.slane %v2098_v41, 5  ;;  %v1262_v57 = vsel %vm5617_vm7, %v4943_v42, %v1261_v30 }
  0x67   : > { %v655_v59 = vshll.u32 %v5728_v46, 16  ;;  %v659_v60 = vshrl.u32 %v5728_v46, 16  ;;  %v2091_v5 = vsel %vm5611_vm6, %v2086_v47, %v2090_v28  ;;  %v1358_v9 = vunpack.c.l.b16 %v1262_v57 }
  0x68   : > { %v648_v3 = vrot.slane %v646_v52, 4  ;;  %v651_v4 = vrot.slane %v649_v53, 5  ;;  %v2101_v6 = vsel %vm5611_vm6, %v2096_v54, %v2100_v55  ;;  %v2398_v17 = vunpack.c.l.b16 %v2091_v5 }
  0x69   : > { %v657_v8 = vrot.slane %v655_v59, 5  ;;  %v661_v11 = vrot.slane %v659_v60, 4  ;;  %v2399_v18 = vunpack.c.l.b16 %v2101_v6  ;;  %v1268_v24 = vrot.slane %v5728_v46, 5  ;;  %v4988_v46 = vld [vmem:[%s5553_s6 + $0x48] sm:$0xf] }
  0x6a   : > { %v652_v20 = vor.u32 %v651_v4, %v648_v3  ;;  %v1387_v25 = vpack.c.b16 %v1359_v10, %v1358_v9  ;;  %v2122_v28 = vshll.u32 %v4987_v19, 16  ;;  %v679_v54 = vshll.u32 %v5765_v43, 16 }
  0x6b   : > { %v662_v22 = vor.u32 %v661_v11, %v657_v8  ;;  %v2427_v30 = vpack.c.b16 %v2399_v18, %v2398_v17  ;;  %v1270_v36 = vrot.slane %v1268_v24, 4  ;;  %v683_v55 = vshrl.u32 %v5765_v43, 16  ;;  %v5354_v17 = vld [vmem:[%s5553_s6 + $0x3c] sm:$0xff] }
  0x6c   : > { %v653_v31 = vrot.slane %v652_v20, 4  ;;  %v2124_v40 = vrot.slane %v2122_v28, 5  ;;  %v2127_v57 = vshrl.u32 %v4988_v46, 16  ;;  %v2130_v58 = vshll.u32 %v4988_v46, 16  ;;  %v5803_v28 = vld [vmem:[%s5553_s6 + $0x48] sm:$0xf] }
  0x6d   : > { %v1272_v47 = vsel %vm5617_vm7, %v1270_v36, %v1271_v37  ;;  %v2136_v59 = vshll.u32 %v4989_v48, 16  ;;  %v2140_v60 = vshrl.u32 %v4989_v48, 16  ;;  %v681_v4 = vrot.slane %v679_v54, 5 }
  0x6e   : > { %v658_v44 = vsel %vm5611_vm6, %v653_v31, %v657_v8  ;;  %v2125_v51 = vsel %vm5611_vm6, %v2120_v39, %v2124_v40  ;;  %v1361_v63 = vunpack.c.l.b16 %v1272_v47  ;;  %v685_v5 = vrot.slane %v683_v55, 4 }
  0x6f   : > { %v943_v56 = vunpack.c.l.b16 %v658_v44  ;;  %v2401_v6 = vunpack.c.l.b16 %v2125_v51  ;;  %v2129_v9 = vrot.slane %v2127_v57, 4  ;;  %v2132_v10 = vrot.slane %v2130_v58, 5  ;;  %v4992_v44 = vld [vmem:[%s5553_s6 + $0x58] sm:$0xf] }
  0x70   : > { %v5785_v8 = vrot.slane %v2136_v59, 5  ;;  %v2142_v11 = vrot.slane %v2140_v60, 4  ;;  %v686_v19 = vor.u32 %v685_v5, %v681_v4  ;;  %v1275_v20 = vrot.slane %v5765_v43, 5 }
  0x71   : > { %v694_v40 = vshrl.u32 %v5803_v28, 16  ;;  %v2160_v57 = vshll.u32 %v4992_v44, 16  ;;  %v2164_v58 = vshrl.u32 %v4992_v44, 16  ;;  %v4995_v44 = vld [vmem:[%s5553_s6 + $0x64] sm:$0xf] }
  0x72   : > { %v687_v31 = vrot.slane %v686_v19, 4 }
  0x73   : > { %v696_v59 = vrot.slane %v694_v40, 4 }
  0x74   : > { %4926 = vmatmul.msk.bf16.gmra.mxu1 %vm372_vm1, %v969_v32  ;;  %4959 = vmatmul.msk.bf16.gmra.mxu2 %vm372_vm1, %v1386_v33  ;;  %v5755_v32 = vld [vmem:[%s5553_s6 + $0x3c] sm:$0xf]  ;;  %v663_v33 = vrot.slane %v662_v22, 4  ;;  %v692_v47 = vsel %vm5611_vm6, %v687_v31, %v691_v27 }
  0x75   : > { %5088 = vmatmul.msk.bf16.gmra.mxu3 %vm372_vm1, %v5352_v35  ;;  %5105 = vmatmul.msk.bf16.gmra.mxu0 %vm372_vm1, %v2426_v34  ;;  %v667_v34 = vrot.slane %v665_v23, 5  ;;  %v4944_v35 = vrot.slane %v5723_v45, 9  ;;  %v670_v41 = vshrl.u32 %v5755_v32, 16  ;;  %v673_v42 = vshll.u32 %v5755_v32, 16 }
  0x76   : > { %v4945_v22 = vrot.slane %v5755_v32, 9  ;;  %v1277_v32 = vrot.slane %v1275_v20, 4 }
  0x77   : > { %v668_v45 = vsel %vm5611_vm6, %v663_v33, %v667_v34  ;;  %v1269_v49 = vsel %vm5617_vm7, %v4944_v35, %v1268_v24  ;;  %v672_v52 = vrot.slane %v670_v41, 4  ;;  %v675_v53 = vrot.slane %v673_v42, 5  ;;  %v4991_v34 = vld [vmem:[%s5553_s6 + $0x54] sm:$0xf] }
  0x78   : > { %v944_v61 = vunpack.c.l.b16 %v668_v45  ;;  %v1360_v62 = vunpack.c.l.b16 %v1269_v49  ;;  %v2133_v24 = vor.u32 %v2132_v10, %v2129_v9  ;;  %v1278_v33 = vrot.slane %v260_v1, 5 }
  0x79   : > { %v676_v3 = vor.u32 %v675_v53, %v672_v52  ;;  %v1276_v35 = vsel %vm5617_vm7, %v4945_v22, %v1275_v20  ;;  %v697_v41 = vshll.u32 %v5803_v28, 16  ;;  %v2151_v46 = vshrl.u32 %v4991_v34, 16  ;;  %v5355_v20 = vld [vmem:[%s5553_s6 + $0x48] sm:$0xff] }
  0x7a   : > { %v971_v13 = vpack.c.b16 %v944_v61, %v943_v56  ;;  %v1388_v14 = vpack.c.b16 %v1361_v63, %v1360_v62  ;;  %v2134_v36 = vrot.slane %v2133_v24, 4  ;;  %v2154_v48 = vshll.u32 %v4991_v34, 16  ;;  %v5849_v24 = vld [vmem:[%s5553_s6 + $0x54] sm:$0xf] }
  0x7b   : > { %v677_v18 = vrot.slane %v676_v3, 4  ;;  %v1279_v51 = vsel %vm5617_vm7, %v1277_v32, %v1278_v33  ;;  %v1362_v52 = vunpack.c.l.b16 %v1276_v35  ;;  %v699_v60 = vrot.slane %v697_v41, 5  ;;  %v5858_v35 = vld [vmem:[%s5553_s6 + $0x58] sm:$0xf] }
  0x7c   : > { %v2139_v54 = vsel %vm5611_vm6, %v2134_v36, %v5785_v8  ;;  %v946_v62 = vunpack.c.l.b16 %v692_v47  ;;  %v1363_v63 = vunpack.c.l.b16 %v1279_v51  ;;  %v2153_v1 = vrot.slane %v2151_v46, 4 }
  0x7d   : > { %v2156_v3 = vrot.slane %v2154_v48, 5  ;;  %v2166_v9 = vrot.slane %v2164_v58, 4  ;;  %v718_v36 = vshrl.u32 %v5849_v24, 16  ;;  %v727_v48 = vshll.u32 %v5858_v35, 16 }
  0x7e   : > { %v1389_v15 = vpack.c.b16 %v1363_v63, %v1362_v52 }
  0x7f   : > { %v720_v51 = vrot.slane %v718_v36, 4 }
  0x84   : > { %4927 = vmatmul.msk.bf16.gmra.mxu1 %vm372_vm1, %v970_v21  ;;  %4960 = vmatmul.msk.bf16.gmra.mxu2 %vm372_vm1, %v1387_v25  ;;  %v2428_v21 = vpack.c.b16 %v2401_v6, %v2400_v0  ;;  %v2143_v25 = vor.u32 %v2142_v11, %v5785_v8  ;;  %v263_v0 = vld [vmem:[%s5553_s6 + $0x50] sm:$0x1]  ;;  %v5837_v6 = vrot.slane %v2160_v57, 5  ;;  %v700_v8 = vor.u32 %v699_v60, %v696_v59 }
  0x85   : > { %5089 = vmatmul.msk.bf16.gmra.mxu3 %vm372_vm1, %v5353_v29  ;;  %5106 = vmatmul.msk.bf16.gmra.mxu0 %vm372_vm1, %v2427_v30  ;;  %v5806_v29 = vld [vmem:[%s5553_s6 + $0x4c] sm:$0xf]  ;;  %v682_v30 = vsel %vm5611_vm6, %v677_v18, %v681_v4  ;;  %v2402_v4 = vunpack.c.l.b16 %v2139_v54  ;;  %v713_v12 = vshll.u32 %v263_v0, 16  ;;  %v2157_v18 = vor.u32 %v2156_v3, %v2153_v1 }
  0x86   : > { %v2144_v37 = vrot.slane %v2143_v25, 4  ;;  %v703_v42 = vshll.u32 %v5806_v29, 16  ;;  %v707_v43 = vshrl.u32 %v5806_v29, 16  ;;  %v945_v50 = vunpack.c.l.b16 %v682_v30 }
  0x87   : > { %v2167_v25 = vor.u32 %v2166_v9, %v5837_v6  ;;  %v701_v27 = vrot.slane %v700_v8, 4  ;;  %v715_v31 = vrot.slane %v713_v12, 5  ;;  %v1285_v33 = vrot.slane %v263_v0, 5  ;;  %v5886_v0 = vld [vmem:[%s5553_s6 + $0x5c] sm:$0x1] }
  0x88   : > { %v2149_v55 = vsel %vm5611_vm6, %v2144_v37, %v2148_v38  ;;  %v5834_v56 = vrot.slane %v703_v42, 5  ;;  %v709_v61 = vrot.slane %v707_v43, 4  ;;  %v2158_v34 = vrot.slane %v2157_v18, 4 }
  0x89   : > { %v2403_v5 = vunpack.c.l.b16 %v2149_v55  ;;  %v721_v37 = vshll.u32 %v5849_v24, 16  ;;  %v2184_v59 = vshll.u32 %v4995_v44, 16  ;;  %v2188_v60 = vshrl.u32 %v4995_v44, 16 }
  0x8a   : > { %v710_v11 = vor.u32 %v709_v61, %v5834_v56  ;;  %v706_v41 = vsel %vm5611_vm6, %v701_v27, %v5834_v56  ;;  %v2163_v47 = vsel %vm5611_vm6, %v2158_v34, %v5837_v6  ;;  %v729_v1 = vrot.slane %v727_v48, 5  ;;  %v5902_v34 = vld [vmem:[%s5553_s6 + $0x60] sm:$0xf] }
  0x8b   : > { %v723_v52 = vrot.slane %v721_v37, 5  ;;  %v947_v56 = vunpack.c.l.b16 %v706_v41  ;;  %v5888_v8 = vrot.slane %v2184_v59, 5  ;;  %v5907_v37 = vld [vmem:[%s5553_s6 + $0x64] sm:$0xf]  ;;  %v4998_v41 = vld [vmem:[%s5553_s6 + $0x70] sm:$0xf] }
  0x8c   : > { %v711_v30 = vrot.slane %v710_v11, 4  ;;  %v2190_v11 = vrot.slane %v2188_v60, 4  ;;  %v751_v48 = vshll.u32 %v5907_v37, 16 }
  0x8e   : > { %v716_v42 = vsel %vm5611_vm6, %v711_v30, %v715_v31 }
  0x8f   : > { %v948_v61 = vunpack.c.l.b16 %v716_v42  ;;  %v742_v42 = vshrl.u32 %v5902_v34, 16 }
  0x91   : > { %v454_v16 = vpop.f32.mrf.mxu1 }
  0x92   : > { %522 = vst [vmem:[%s5790_s22 + $0x40] sm:$0xff] %v454_v16  ;;  %v5797_v23 = vpop.f32.mrf.mxu0 }
  0x94   : > { %4928 = vmatmul.msk.bf16.gmra.mxu1 %vm372_vm1, %v971_v13  ;;  %4961 = vmatmul.msk.bf16.gmra.mxu2 %vm372_vm1, %v1388_v14  ;;  %v4993_v13 = vld [vmem:[%s5553_s6 + $0x5c] sm:$0x1]  ;;  %v972_v14 = vpack.c.b16 %v946_v62, %v945_v50 }
  0x95   : > { %5090 = vmatmul.msk.bf16.gmra.mxu3 %vm372_vm1, %v5354_v17  ;;  %5107 = vmatmul.msk.bf16.gmra.mxu0 %vm372_vm1, %v2428_v21  ;;  %v1282_v17 = vrot.slane %v5806_v29, 5  ;;  %v2429_v21 = vpack.c.b16 %v2403_v5, %v2402_v4  ;;  %v2170_v26 = vshll.u32 %v4993_v13, 16  ;;  %v4946_v29 = vrot.slane %v5803_v28, 9 }
  0x96   : > { %v2168_v28 = vrot.slane %v2167_v25, 4  ;;  %v2404_v4 = vunpack.c.l.b16 %v2163_v47  ;;  %v724_v5 = vor.u32 %v723_v52, %v720_v51  ;;  %v737_v13 = vshll.u32 %v5886_v0, 16 }
  0x97   : > { %v474_v39 = vpop.f32.mrf.mxu2  ;;  %v1284_v32 = vrot.slane %v1282_v17, 4  ;;  %v2172_v38 = vrot.slane %v2170_v26, 5  ;;  %v1283_v43 = vsel %vm5617_vm7, %v4946_v29, %v1282_v17  ;;  %v4947_v26 = vrot.slane %v5849_v24, 9  ;;  %v4997_v24 = vld [vmem:[%s5553_s6 + $0x6c] sm:$0xf] }
  0x98   : > { %530 = vst [vmem:[%s5790_s22 + $0x80] sm:$0xff] %v474_v39  ;;  %v494_v45 = vpop.f32.mrf.mxu3  ;;  %v4994_v39 = vld [vmem:[%s5553_s6 + $0x60] sm:$0xf]  ;;  %v1364_v62 = vunpack.c.l.b16 %v1283_v43  ;;  %v725_v25 = vrot.slane %v724_v5, 4  ;;  %v2191_v29 = vor.u32 %v2190_v11, %v5888_v8  ;;  %v745_v43 = vshll.u32 %v5902_v34, 16 }
  0x99   : > { %v456_v49 = vpop.f32.mrf.mxu1  ;;  %538 = vst [vmem:[%s5790_s22 + $0xc0] sm:$0xff] %v494_v45  ;;  %v1286_v46 = vsel %vm5617_vm7, %v1284_v32, %v1285_v33  ;;  %v2175_v54 = vshrl.u32 %v4994_v39, 16  ;;  %v2178_v55 = vshll.u32 %v4994_v39, 16  ;;  %v2173_v58 = vsel %vm5611_vm6, %v2168_v28, %v2172_v38 }
  0x9a   : > { %523 = vst [vmem:[%s5790_s22 + $0x48] sm:$0xff] %v456_v49  ;;  %v5827_v53 = vpop.f32.mrf.mxu0  ;;  %v731_v49 = vshrl.u32 %v5858_v35, 16  ;;  %v1365_v63 = vunpack.c.l.b16 %v1286_v46  ;;  %v2405_v6 = vunpack.c.l.b16 %v2173_v58  ;;  %v739_v33 = vrot.slane %v737_v13, 5 }
  0x9b   : > { %v2177_v9 = vrot.slane %v2175_v54, 4  ;;  %v730_v28 = vsel %vm5611_vm6, %v725_v25, %v729_v1  ;;  %v1292_v39 = vrot.slane %v5886_v0, 5  ;;  %v2192_v44 = vrot.slane %v2191_v29, 4 }
  0x9c   : > { %v733_v3 = vrot.slane %v731_v49, 4  ;;  %v2430_v27 = vpack.c.b16 %v2405_v6, %v2404_v4  ;;  %v755_v49 = vshrl.u32 %v5907_v37, 16  ;;  %v2199_v47 = vshrl.u32 %v4997_v24, 16 }
  0x9d   : > { %v2208_v52 = vshll.u32 %v4998_v41, 16  ;;  %v2212_v54 = vshrl.u32 %v4998_v41, 16  ;;  %v949_v59 = vunpack.c.l.b16 %v730_v28  ;;  %v5937_v4 = vrot.slane %v751_v48, 5 }
  0x9e   : > { %v734_v18 = vor.u32 %v733_v3, %v729_v1  ;;  %v269_v3 = vld [vmem:[%s5553_s6 + $0x68] sm:$0x1]  ;;  %v757_v5 = vrot.slane %v755_v49, 4  ;;  %v2201_v6 = vrot.slane %v2199_v47, 4  ;;  %v5000_v47 = vld [vmem:[%s5553_s6 + $0x78] sm:$0xf] }
  0x9f   : > { %v476_v10 = vpop.f32.mrf.mxu2  ;;  %v2214_v13 = vrot.slane %v2212_v54, 4  ;;  %v1299_v41 = vrot.slane %v269_v3, 5 }
  0xa0   : > { %531 = vst [vmem:[%s5790_s22 + $0x88] sm:$0xff] %v476_v10  ;;  %v496_v16 = vpop.f32.mrf.mxu3  ;;  %v2180_v10 = vrot.slane %v2178_v55, 5 }
  0xa1   : > { %v459_v19 = vpop.f32.mrf.mxu1  ;;  %539 = vst [vmem:[%s5790_s22 + $0xc8] sm:$0xff] %v496_v16  ;;  %v1390_v16 = vpack.c.b16 %v1365_v63, %v1364_v62  ;;  %v744_v62 = vrot.slane %v742_v42, 4  ;;  %v747_v63 = vrot.slane %v745_v43, 5  ;;  %v5958_v43 = vld [vmem:[%s5553_s6 + $0x70] sm:$0xf] }
  0xa2   : > { %524 = vst [vmem:[%s5790_s22 + $0x50] sm:$0xff] %v459_v19  ;;  %v5846_v22 = vpop.f32.mrf.mxu0  ;;  %v1289_v19 = vrot.slane %v5858_v35, 5  ;;  %v2181_v30 = vor.u32 %v2180_v10, %v2177_v9  ;;  %v735_v35 = vrot.slane %v734_v18, 4 }
  0xa4   : > { %4929 = vmatmul.msk.bf16.gmra.mxu1 %vm372_vm1, %v972_v14  ;;  %4962 = vmatmul.msk.bf16.gmra.mxu2 %vm372_vm1, %v1389_v15  ;;  %v4996_v14 = vld [vmem:[%s5553_s6 + $0x68] sm:$0x1]  ;;  %v973_v15 = vpack.c.b16 %v948_v61, %v947_v56  ;;  %v1291_v36 = vrot.slane %v1289_v19, 4  ;;  %v1290_v38 = vsel %vm5617_vm7, %v4947_v26, %v1289_v19  ;;  %v740_v58 = vsel %vm5611_vm6, %v735_v35, %v739_v33  ;;  %v5357_v33 = vld [vmem:[%s5553_s6 + $0x60] sm:$0xff] }
  0xa5   : > { %5091 = vmatmul.msk.bf16.gmra.mxu3 %vm372_vm1, %v5355_v20  ;;  %5108 = vmatmul.msk.bf16.gmra.mxu0 %vm372_vm1, %v2429_v21  ;;  %v5356_v21 = vld [vmem:[%s5553_s6 + $0x54] sm:$0xff]  ;;  %v2194_v32 = vshll.u32 %v4996_v14, 16  ;;  %v1366_v56 = vunpack.c.l.b16 %v1290_v38  ;;  %v950_v10 = vunpack.c.l.b16 %v740_v58  ;;  %v758_v19 = vor.u32 %v757_v5, %v5937_v4 }
  0xa6   : > { %v1293_v60 = vsel %vm5617_vm7, %v1291_v36, %v1292_v39  ;;  %v5949_v36 = vld [vmem:[%s5553_s6 + $0x6c] sm:$0xf]  ;;  %v779_v58 = vshrl.u32 %v5958_v43, 16 }
  0xa7   : > { %v479_v40 = vpop.f32.mrf.mxu2  ;;  %v1367_v11 = vunpack.c.l.b16 %v1293_v60  ;;  %v974_v25 = vpack.c.b16 %v950_v10, %v949_v59  ;;  %v759_v39 = vrot.slane %v758_v19, 4 }
  0xa8   : > { %532 = vst [vmem:[%s5790_s22 + $0x90] sm:$0xff] %v479_v40  ;;  %v499_v45 = vpop.f32.mrf.mxu3  ;;  %v2182_v40 = vrot.slane %v2181_v30, 4 }
  0xa9   : > { %v461_v50 = vpop.f32.mrf.mxu1  ;;  %540 = vst [vmem:[%s5790_s22 + $0xd0] sm:$0xff] %v499_v45  ;;  %v2196_v45 = vrot.slane %v2194_v32, 5  ;;  %v1391_v26 = vpack.c.b16 %v1367_v11, %v1366_v56 }
  0xaa   : > { %525 = vst [vmem:[%s5790_s22 + $0x58] sm:$0xff] %v461_v50  ;;  %v5881_v57 = vpop.f32.mrf.mxu0  ;;  %v2202_v50 = vshll.u32 %v4997_v24, 16  ;;  %v2187_v0 = vsel %vm5611_vm6, %v2182_v40, %v5888_v8  ;;  %v4999_v8 = vld [vmem:[%s5553_s6 + $0x74] sm:$0x1] }
  0xab   : > { %v2197_v1 = vsel %vm5611_vm6, %v2192_v44, %v2196_v45  ;;  %v2406_v14 = vunpack.c.l.b16 %v2187_v0  ;;  %v2218_v29 = vshll.u32 %v4999_v8, 16  ;;  %v766_v44 = vshrl.u32 %v5949_v36, 16 }
  0xac   : > { %v2204_v9 = vrot.slane %v2202_v50, 5  ;;  %v769_v45 = vshll.u32 %v5949_v36, 16  ;;  %v5001_v50 = vld [vmem:[%s5553_s6 + $0x7c] sm:$0xf] }
  0xad   : > { %v768_v60 = vrot.slane %v766_v44, 4  ;;  %v2236_v5 = vshrl.u32 %v5001_v50, 16 }
  0xae   : > { %v771_v56 = vrot.slane %v769_v45, 5  ;;  %v5997_v45 = vld [vmem:[%s5553_s6 + $0x78] sm:$0xf] }
  0xaf   : > { %v481_v12 = vpop.f32.mrf.mxu2 }
  0xb0   : > { %533 = vst [vmem:[%s5790_s22 + $0x98] sm:$0xff] %v481_v12  ;;  %v501_v17 = vpop.f32.mrf.mxu3  ;;  %v5939_v12 = vrot.slane %v2208_v52, 5  ;;  %v772_v8 = vor.u32 %v771_v56, %v768_v60  ;;  %v793_v60 = vshll.u32 %v5997_v45, 16 }
  0xb1   : > { %v464_v20 = vpop.f32.mrf.mxu1  ;;  %541 = vst [vmem:[%s5790_s22 + $0xd8] sm:$0xff] %v501_v17  ;;  %v761_v17 = vshll.u32 %v269_v3, 16  ;;  %v2226_v3 = vshll.u32 %v5000_v47, 16 }
  0xb2   : > { %526 = vst [vmem:[%s5790_s22 + $0x60] sm:$0xff] %v464_v20  ;;  %v5898_v31 = vpop.f32.mrf.mxu0  ;;  %v1296_v20 = vrot.slane %v5907_v37, 5  ;;  %v2215_v30 = vor.u32 %v2214_v13, %v5939_v12  ;;  %v4948_v37 = vrot.slane %v5902_v34, 9 }
  0xb3   : > { %v763_v28 = vrot.slane %v761_v17, 5  ;;  %v2228_v19 = vrot.slane %v2226_v3, 5 }
  0xb4   : > { %4930 = vmatmul.msk.bf16.gmra.mxu1 %vm372_vm1, %v973_v15  ;;  %4963 = vmatmul.msk.bf16.gmra.mxu2 %vm372_vm1, %v1390_v16  ;;  %v2407_v15 = vunpack.c.l.b16 %v2197_v1  ;;  %v748_v16 = vor.u32 %v747_v63, %v744_v62  ;;  %v1298_v40 = vrot.slane %v1296_v20, 4  ;;  %v2216_v34 = vrot.slane %v2215_v30, 4 }
  0xb5   : > { %5092 = vmatmul.msk.bf16.gmra.mxu3 %vm372_vm1, %v5356_v21  ;;  %5109 = vmatmul.msk.bf16.gmra.mxu0 %vm372_vm1, %v2430_v27  ;;  %v2205_v21 = vor.u32 %v2204_v9, %v2201_v6  ;;  %v1297_v49 = vsel %vm5617_vm7, %v4948_v37, %v1296_v20  ;;  %v764_v52 = vsel %vm5611_vm6, %v759_v39, %v763_v28  ;;  %v2223_v1 = vshrl.u32 %v5000_v47, 16  ;;  %v5358_v37 = vld [vmem:[%s5553_s6 + $0x6c] sm:$0xff] }
  0xb6   : > { %v2431_v35 = vpack.c.b16 %v2407_v15, %v2406_v14  ;;  %v749_v24 = vrot.slane %v748_v16, 4  ;;  %v1300_v54 = vsel %vm5617_vm7, %v1298_v40, %v1299_v41  ;;  %v952_v10 = vunpack.c.l.b16 %v764_v52  ;;  %v272_v15 = vld [vmem:[%s5553_s6 + $0x74] sm:$0x1] }
  0xb7   : > { %v484_v46 = vpop.f32.mrf.mxu2  ;;  %v2206_v42 = vrot.slane %v2205_v21, 4  ;;  %v1368_v11 = vunpack.c.l.b16 %v1297_v49  ;;  %v1369_v14 = vunpack.c.l.b16 %v1300_v54  ;;  %v2238_v21 = vrot.slane %v2236_v5, 4  ;;  %v6001_v49 = vld [vmem:[%s5553_s6 + $0x7c] sm:$0xf] }
  0xb8   : > { %534 = vst [vmem:[%s5790_s22 + $0xa0] sm:$0xff] %v484_v46  ;;  %v504_v51 = vpop.f32.mrf.mxu3  ;;  %v2220_v46 = vrot.slane %v2218_v29, 5  ;;  %v754_v48 = vsel %vm5611_vm6, %v749_v24, %v5937_v4  ;;  %v2232_v4 = vshll.u32 %v5001_v50, 16  ;;  %v785_v30 = vshll.u32 %v272_v15, 16 }
  0xb9   : > { %v466_v55 = vpop.f32.mrf.mxu1  ;;  %542 = vst [vmem:[%s5790_s22 + $0xe0] sm:$0xff] %v504_v51  ;;  %v2211_v62 = vsel %vm5611_vm6, %v2206_v42, %v5939_v12  ;;  %v951_v6 = vunpack.c.l.b16 %v754_v48  ;;  %v781_v12 = vrot.slane %v779_v58, 4  ;;  %v1303_v24 = vrot.slane %v5958_v43, 5  ;;  %v5004_v58 = vld [vmem:[%s5553_s6 + $0x88] sm:$0xf] }
  0xba   : > { %527 = vst [vmem:[%s5790_s22 + $0x68] sm:$0xff] %v466_v55  ;;  %v5929_v61 = vpop.f32.mrf.mxu0  ;;  %v775_v55 = vshll.u32 %v5958_v43, 16  ;;  %v2221_v63 = vsel %vm5611_vm6, %v2216_v34, %v2220_v46  ;;  %v2408_v16 = vunpack.c.l.b16 %v2211_v62  ;;  %v5988_v20 = vrot.slane %v2232_v4, 5 }
  0xbb   : > { %v2409_v17 = vunpack.c.l.b16 %v2221_v63  ;;  %v975_v29 = vpack.c.b16 %v952_v10, %v951_v6  ;;  %v787_v46 = vrot.slane %v785_v30, 5  ;;  %v4949_v48 = vrot.slane %v5949_v36, 9 }
  0xbc   : > { %v777_v13 = vrot.slane %v775_v55, 5  ;;  %v2239_v41 = vor.u32 %v2238_v21, %v5988_v20  ;;  %v1305_v47 = vrot.slane %v1303_v24, 4  ;;  %v1306_v50 = vrot.slane %v272_v15, 5 }
  0xbd   : > { %v2432_v39 = vpack.c.b16 %v2409_v17, %v2408_v16  ;;  %v790_v52 = vshrl.u32 %v5997_v45, 16  ;;  %v799_v56 = vshll.u32 %v6001_v49, 16  ;;  %v803_v62 = vshrl.u32 %v6001_v49, 16 }
  0xbe   : > { %v2240_v36 = vrot.slane %v2239_v41, 4 }
  0xbf   : > { %v486_v18 = vpop.f32.mrf.mxu2  ;;  %v805_v21 = vrot.slane %v803_v62, 4 }
  0xc0   : > { %535 = vst [vmem:[%s5790_s22 + $0xa8] sm:$0xff] %v486_v18  ;;  %v506_v27 = vpop.f32.mrf.mxu3  ;;  %v2225_v18 = vrot.slane %v2223_v1, 4  ;;  %v1304_v1 = vsel %vm5617_vm7, %v4949_v48, %v1303_v24  ;;  %v1310_v48 = vrot.slane %v6001_v49, 5  ;;  %v4950_v49 = vrot.slane %v5997_v45, 9 }
  0xc1   : > { %v469_v32 = vpop.f32.mrf.mxu1  ;;  %543 = vst [vmem:[%s5790_s22 + $0xe8] sm:$0xff] %v506_v27  ;;  %v782_v27 = vor.u32 %v781_v12, %v777_v13  ;;  %v1307_v12 = vsel %vm5617_vm7, %v1305_v47, %v1306_v50 }
  0xc2   : > { %528 = vst [vmem:[%s5790_s22 + $0x70] sm:$0xff] %v469_v32  ;;  %v5953_v38 = vpop.f32.mrf.mxu0  ;;  %v1392_v32 = vpack.c.b16 %v1369_v14, %v1368_v11  ;;  %v2229_v40 = vor.u32 %v2228_v19, %v2225_v18  ;;  %v2260_v11 = vshrl.u32 %v5004_v58, 16  ;;  %v792_v14 = vrot.slane %v790_v52, 4 }
  0xc3   : > { %v783_v34 = vrot.slane %v782_v27, 4  ;;  %v795_v18 = vrot.slane %v793_v60, 5  ;;  %v6027_v19 = vrot.slane %v799_v56, 5  ;;  %v275_v27 = vld [vmem:[%s5553_s6 + $0x80] sm:$0x1] }
  0xc4   : > { %4931 = vmatmul.msk.bf16.gmra.mxu1 %vm372_vm1, %v974_v25  ;;  %4964 = vmatmul.msk.bf16.gmra.mxu2 %vm372_vm1, %v1391_v26  ;;  %v5002_v25 = vld [vmem:[%s5553_s6 + $0x80] sm:$0x1]  ;;  %v2230_v54 = vrot.slane %v2229_v40, 4 }
  0xc5   : > { %5093 = vmatmul.msk.bf16.gmra.mxu3 %vm372_vm1, %v5357_v33  ;;  %5110 = vmatmul.msk.bf16.gmra.mxu0 %vm372_vm1, %v2431_v35  ;;  %v773_v35 = vrot.slane %v772_v8, 4  ;;  %v2242_v42 = vshll.u32 %v5002_v25, 16  ;;  %v796_v40 = vor.u32 %v795_v18, %v792_v14  ;;  %v806_v41 = vor.u32 %v805_v21, %v6027_v19 }
  0xc6   : > { %v2235_v15 = vsel %vm5611_vm6, %v2230_v54, %v5988_v20  ;;  %v2262_v20 = vrot.slane %v2260_v11, 4 }
  0xc7   : > { %v489_v51 = vpop.f32.mrf.mxu2  ;;  %v778_v43 = vsel %vm5611_vm6, %v773_v35, %v777_v13  ;;  %v2244_v55 = vrot.slane %v2242_v42, 5  ;;  %v2410_v24 = vunpack.c.l.b16 %v2235_v15  ;;  %v809_v42 = vshll.u32 %v275_v27, 16 }
  0xc8   : > { %536 = vst [vmem:[%s5790_s22 + $0xb0] sm:$0xff] %v489_v51  ;;  %v509_v59 = vpop.f32.mrf.mxu3  ;;  %v5003_v51 = vld [vmem:[%s5553_s6 + $0x84] sm:$0xf]  ;;  %v953_v10 = vunpack.c.l.b16 %v778_v43  ;;  %v807_v60 = vrot.slane %v806_v41, 4 }
  0xc9   : > { %v471_v0 = vpop.f32.mrf.mxu1  ;;  %544 = vst [vmem:[%s5790_s22 + $0xf0] sm:$0xff] %v509_v59  ;;  %v2247_v3 = vshrl.u32 %v5003_v51, 16  ;;  %v2250_v4 = vshll.u32 %v5003_v51, 16  ;;  %v2245_v8 = vsel %vm5611_vm6, %v2240_v36, %v2244_v55  ;;  %v6040_v55 = vld [vmem:[%s5553_s6 + $0x84] sm:$0xf]  ;;  %v811_v56 = vrot.slane %v809_v42, 5 }
  0xca   : > { %529 = vst [vmem:[%s5790_s22 + $0x78] sm:$0xff] %v471_v0  ;;  %v5985_v9 = vpop.f32.mrf.mxu0  ;;  %v788_v0 = vsel %vm5611_vm6, %v783_v34, %v787_v46  ;;  %v817_v45 = vshll.u32 %v6040_v55, 16 }
  0xcb   : > { %v954_v25 = vunpack.c.l.b16 %v788_v0  ;;  %v2249_v30 = vrot.slane %v2247_v3, 4  ;;  %v1312_v0 = vrot.slane %v1310_v48, 4 }
  0xcd   : > { %v976_v46 = vpack.c.b16 %v954_v25, %v953_v10 }
  0xcf   : > { %v491_v26 = vpop.f32.mrf.mxu2 }
  0xd0   : > { %537 = vst [vmem:[%s5790_s22 + $0xb8] sm:$0xff] %v491_v26  ;;  %v511_v33 = vpop.f32.mrf.mxu3  ;;  %v1370_v26 = vunpack.c.l.b16 %v1304_v1  ;;  %v1313_v1 = vrot.slane %v275_v27, 5 }
  0xd1   : > { %v1043_v28 = vpop.f32.mrf.mxu1  ;;  %545 = vst [vmem:[%s5790_s22 + $0xf8] sm:$0xff] %v511_v33 }
  0xd2   : > { %v2500_v44 = vpop.f32.mrf.mxu0  ;;  %v1155_v59 = vadd.f32 %v1043_v28, %v5797_v23  ;;  %v2256_v23 = vshll.u32 %v5004_v58, 16  ;;  %v2411_v28 = vunpack.c.l.b16 %v2245_v8  ;;  %v812_v8 = vsel %vm5611_vm6, %v807_v60, %v811_v56  ;;  %v5008_v60 = vld [vmem:[%s5553_s6 + $0x98] sm:$0x1] }
  0xd3   : > { %v956_v42 = vunpack.c.l.b16 %v812_v8  ;;  %v6088_v8 = vld [vmem:[%s5553_s6 + $0x90] sm:$0xf] }
  0xd4   : > { %4932 = vmatmul.msk.bf16.gmra.mxu1 %vm372_vm1, %v975_v29  ;;  %4965 = vmatmul.msk.bf16.gmra.mxu2 %vm372_vm1, %v1392_v32  ;;  %v2252_v29 = vrot.slane %v2250_v4, 5  ;;  %v1371_v32 = vunpack.c.l.b16 %v1307_v12  ;;  %v6030_v35 = vrot.slane %v2256_v23, 5  ;;  %v2433_v36 = vpack.c.b16 %v2411_v28, %v2410_v24  ;;  %v5006_v12 = vld [vmem:[%s5553_s6 + $0x90] sm:$0xf]  ;;  %v278_v28 = vld [vmem:[%s5553_s6 + $0x8c] sm:$0x1] }
  0xd5   : > { %5094 = vmatmul.msk.bf16.gmra.mxu3 %vm372_vm1, %v5358_v37  ;;  %5111 = vmatmul.msk.bf16.gmra.mxu0 %vm372_vm1, %v2432_v39  ;;  %v5005_v37 = vld [vmem:[%s5553_s6 + $0x8c] sm:$0x1] }
  0xd6   : > { %v1393_v47 = vpack.c.b16 %v1371_v32, %v1370_v26  ;;  %v2263_v51 = vor.u32 %v2262_v20, %v6030_v35  ;;  %v2266_v52 = vshll.u32 %v5005_v37, 16  ;;  %v2271_v32 = vshrl.u32 %v5006_v12, 16 }
  0xd7   : > { %v1460_v63 = vpop.f32.mrf.mxu2 }
  0xd8   : > { %v1572_v5 = vadd.f32 %v1460_v63, %v1155_v59  ;;  %v1830_v6 = vpop.f32.mrf.mxu3  ;;  %v797_v59 = vrot.slane %v796_v40, 4  ;;  %v6043_v63 = vld [vmem:[%s5553_s6 + $0x88] sm:$0xf]  ;;  %v2268_v10 = vrot.slane %v2266_v52, 5 }
  0xd9   : > { %v1045_v13 = vpop.f32.mrf.mxu1  ;;  %v823_v23 = vshll.u32 %v6043_v63, 16 }
  0xda   : > { %v1942_v16 = vadd.f32 %v1830_v6, %v1572_v5  ;;  %v2502_v17 = vpop.f32.mrf.mxu0  ;;  %v1156_v39 = vadd.f32 %v1045_v13, %v5827_v53  ;;  %v5359_v53 = vld [vmem:[%s5553_s6 + $0x78] sm:$0xff]  ;;  %v814_v5 = vshrl.u32 %v6040_v55, 16  ;;  %v2264_v6 = vrot.slane %v2263_v51, 4 }
  0xdb   : > { %v827_v13 = vshrl.u32 %v6043_v63, 16  ;;  %v802_v15 = vsel %vm5611_vm6, %v797_v59, %v6027_v19  ;;  %v1317_v59 = vrot.slane %v6043_v63, 5 }
  0xdc   : > { %v2612_v33 = vadd.f32 %v2500_v44, %v1942_v16  ;;  %v2253_v44 = vor.u32 %v2252_v29, %v2249_v30  ;;  %v1311_v16 = vsel %vm5617_vm7, %v4950_v49, %v1310_v48  ;;  %v816_v25 = vrot.slane %v814_v5, 4 }
  0xdd   : > { %v2269_v19 = vsel %vm5611_vm6, %v2264_v6, %v2268_v10  ;;  %v819_v30 = vrot.slane %v817_v45, 5  ;;  %v6072_v29 = vrot.slane %v823_v23, 5  ;;  %v829_v37 = vrot.slane %v827_v13, 4 }
  0xde   : > { %2644 = vst [vmem:[%s5790_s22] sm:$0xff] %v2612_v33  ;;  %v2254_v3 = vrot.slane %v2253_v44, 4  ;;  %v2274_v33 = vshll.u32 %v5006_v12, 16  ;;  %v955_v41 = vunpack.c.l.b16 %v802_v15  ;;  %v2413_v44 = vunpack.c.l.b16 %v2269_v19 }
  0xdf   : > { %v1462_v34 = vpop.f32.mrf.mxu2  ;;  %v4951_v6 = vrot.slane %v6040_v55, 9  ;;  %v2290_v13 = vshll.u32 %v5008_v60, 16  ;;  %v1319_v12 = vrot.slane %v1317_v59, 4 }
  0xe0   : > { %v1573_v43 = vadd.f32 %v1462_v34, %v1156_v39  ;;  %v1832_v50 = vpop.f32.mrf.mxu3  ;;  %v2259_v26 = vsel %vm5611_vm6, %v2254_v3, %v6030_v35  ;;  %v1372_v34 = vunpack.c.l.b16 %v1311_v16  ;;  %v2276_v51 = vrot.slane %v2274_v33, 5  ;;  %v6091_v16 = vld [vmem:[%s5553_s6 + $0x94] sm:$0xf] }
  0xe1   : > { %v1048_v54 = vpop.f32.mrf.mxu1  ;;  %v2412_v48 = vunpack.c.l.b16 %v2259_v26  ;;  %v2292_v19 = vrot.slane %v2290_v13, 5  ;;  %v847_v33 = vshll.u32 %v6091_v16, 16 }
  0xe2   : > { %v1943_v58 = vadd.f32 %v1832_v50, %v1573_v43  ;;  %v2505_v62 = vpop.f32.mrf.mxu0  ;;  %v1157_v11 = vadd.f32 %v1048_v54, %v5846_v22  ;;  %v5007_v22 = vld [vmem:[%s5553_s6 + $0x94] sm:$0xf]  ;;  %v820_v43 = vor.u32 %v819_v30, %v816_v25  ;;  %v2273_v50 = vrot.slane %v2271_v32, 4 }
  0xe3   : > { %v2280_v39 = vshll.u32 %v5007_v22, 16  ;;  %v2284_v40 = vshrl.u32 %v5007_v22, 16  ;;  %v830_v54 = vor.u32 %v829_v37, %v6072_v29  ;;  %v841_v32 = vshll.u32 %v6088_v8, 16 }
  0xe4   : > { %4933 = vmatmul.msk.bf16.gmra.mxu1 %vm372_vm1, %v976_v46  ;;  %4966 = vmatmul.msk.bf16.gmra.mxu2 %vm372_vm1, %v1393_v47  ;;  %v2613_v4 = vadd.f32 %v2502_v17, %v1943_v58  ;;  %v1314_v17 = vsel %vm5617_vm7, %v1312_v0, %v1313_v1  ;;  %v833_v47 = vshll.u32 %v278_v28, 16  ;;  %v2434_v1 = vpack.c.b16 %v2413_v44, %v2412_v48 }
  0xe5   : > { %5095 = vmatmul.msk.bf16.gmra.mxu3 %vm372_vm1, %v5359_v53  ;;  %5112 = vmatmul.msk.bf16.gmra.mxu0 %vm372_vm1, %v2433_v36  ;;  %v1373_v35 = vunpack.c.l.b16 %v1314_v17  ;;  %v6078_v53 = vrot.slane %v2280_v39, 5  ;;  %v2286_v36 = vrot.slane %v2284_v40, 4  ;;  %v2277_v10 = vor.u32 %v2276_v51, %v2273_v50 }
  0xe6   : > { %2645 = vst [vmem:[%s5790_s22 + $0x8] sm:$0xff] %v2613_v4  ;;  %v5360_v4 = vld [vmem:[%s5553_s6 + $0x84] sm:$0xff]  ;;  %v835_v5 = vrot.slane %v833_v47, 5  ;;  %v831_v23 = vrot.slane %v830_v54, 4  ;;  %v1318_v17 = vsel %vm5617_vm7, %v4951_v6, %v1317_v59  ;;  %v6117_v54 = vrot.slane %v847_v33, 5 }
  0xe7   : > { %v1465_v14 = vpop.f32.mrf.mxu2  ;;  %v1394_v49 = vpack.c.b16 %v1373_v35, %v1372_v34  ;;  %v2287_v63 = vor.u32 %v2286_v36, %v6078_v53  ;;  %v2278_v22 = vrot.slane %v2277_v10, 4  ;;  %v1374_v34 = vunpack.c.l.b16 %v1318_v17  ;;  %v5011_v10 = vld [vmem:[%s5553_s6 + $0xa4] sm:$0x1]  ;;  %v6129_v17 = vld [vmem:[%s5553_s6 + $0x9c] sm:$0xf] }
  0xe8   : > { %v1574_v18 = vadd.f32 %v1465_v14, %v1157_v11  ;;  %v1835_v21 = vpop.f32.mrf.mxu3  ;;  %v1320_v14 = vrot.slane %v278_v28, 5  ;;  %v836_v25 = vsel %vm5611_vm6, %v831_v23, %v835_v5  ;;  %v1324_v6 = vrot.slane %v6091_v16, 5 }
  0xe9   : > { %v1050_v27 = vpop.f32.mrf.mxu1  ;;  %v2288_v26 = vrot.slane %v2287_v63, 4  ;;  %v2283_v35 = vsel %vm5611_vm6, %v2278_v22, %v6078_v53  ;;  %v862_v33 = vshrl.u32 %v6129_v17, 16 }
  0xea   : > { %v1944_v20 = vadd.f32 %v1835_v21, %v1574_v18  ;;  %v2507_v24 = vpop.f32.mrf.mxu0  ;;  %v1158_v52 = vadd.f32 %v1050_v27, %v5881_v57  ;;  %v821_v57 = vrot.slane %v820_v43, 4  ;;  %v5009_v18 = vld [vmem:[%s5553_s6 + $0x9c] sm:$0xf]  ;;  %v1321_v30 = vsel %vm5617_vm7, %v1319_v12, %v1320_v14  ;;  %v5361_v12 = vld [vmem:[%s5553_s6 + $0x90] sm:$0xff] }
  0xeb   : > { %v2295_v37 = vshrl.u32 %v5009_v18, 16  ;;  %v2298_v39 = vshll.u32 %v5009_v18, 16  ;;  %v2293_v44 = vsel %vm5611_vm6, %v2288_v26, %v2292_v19  ;;  %v1375_v50 = vunpack.c.l.b16 %v1321_v30 }
  0xec   : > { %v2614_v46 = vadd.f32 %v2505_v62, %v1944_v20  ;;  %v977_v62 = vpack.c.b16 %v956_v42, %v955_v41  ;;  %v826_v55 = vsel %vm5611_vm6, %v821_v57, %v6072_v29  ;;  %v838_v29 = vshrl.u32 %v6088_v8, 16  ;;  %v5010_v20 = vld [vmem:[%s5553_s6 + $0xa0] sm:$0xf] }
  0xed   : > { %v957_v41 = vunpack.c.l.b16 %v826_v55  ;;  %v958_v42 = vunpack.c.l.b16 %v836_v25  ;;  %v2304_v43 = vshll.u32 %v5010_v20, 16  ;;  %v2308_v47 = vshrl.u32 %v5010_v20, 16 }
  0xee   : > { %2646 = vst [vmem:[%s5790_s22 + $0x10] sm:$0xff] %v2614_v46  ;;  %v840_v51 = vrot.slane %v838_v29, 4  ;;  %v2297_v60 = vrot.slane %v2295_v37, 4  ;;  %v2414_v53 = vunpack.c.l.b16 %v2283_v35  ;;  %v1395_v23 = vpack.c.b16 %v1375_v50, %v1374_v34  ;;  %v6136_v29 = vld [vmem:[%s5553_s6 + $0xa0] sm:$0xf] }
  0xef   : > { %v1467_v58 = vpop.f32.mrf.mxu2  ;;  %v2314_v18 = vshll.u32 %v5011_v10, 16  ;;  %v4952_v25 = vrot.slane %v6088_v8, 9  ;;  %v1326_v26 = vrot.slane %v1324_v6, 4  ;;  %v865_v8 = vshll.u32 %v6129_v17, 16  ;;  %v5013_v34 = vld [vmem:[%s5553_s6 + $0xac] sm:$0xf] }
  0xf0   : > { %v1575_v56 = vadd.f32 %v1467_v58, %v1158_v52  ;;  %v1837_v0 = vpop.f32.mrf.mxu3  ;;  %v843_v52 = vrot.slane %v841_v32, 5  ;;  %v281_v58 = vld [vmem:[%s5553_s6 + $0x98] sm:$0x1] }
  0xf1   : > { %v1053_v3 = vpop.f32.mrf.mxu1  ;;  %v857_v5 = vshll.u32 %v281_v58, 16  ;;  %v1327_v30 = vrot.slane %v281_v58, 5  ;;  %v867_v50 = vrot.slane %v865_v8, 5 }
  0xf2   : > { %v1945_v45 = vadd.f32 %v1837_v0, %v1575_v56  ;;  %v2510_v11 = vpop.f32.mrf.mxu0  ;;  %v1159_v21 = vadd.f32 %v1053_v3, %v5898_v31  ;;  %v851_v31 = vshrl.u32 %v6091_v16, 16  ;;  %v2300_v56 = vrot.slane %v2298_v39, 5 }
  0xf3   : > { %v6122_v0 = vrot.slane %v2304_v43, 5  ;;  %v844_v57 = vor.u32 %v843_v52, %v840_v51  ;;  %v859_v16 = vrot.slane %v857_v5, 5 }
  0xf4   : > { %4934 = vmatmul.msk.bf16.gmra.mxu1 %vm372_vm1, %v977_v62  ;;  %4967 = vmatmul.msk.bf16.gmra.mxu2 %vm372_vm1, %v1394_v49  ;;  %v2615_v15 = vadd.f32 %v2507_v24, %v1945_v45  ;;  %v853_v59 = vrot.slane %v851_v31, 4  ;;  %v2415_v62 = vunpack.c.l.b16 %v2293_v44  ;;  %v2301_v13 = vor.u32 %v2300_v56, %v2297_v60  ;;  %v5012_v31 = vld [vmem:[%s5553_s6 + $0xa8] sm:$0xf] }
  0xf5   : > { %5096 = vmatmul.msk.bf16.gmra.mxu3 %vm372_vm1, %v5360_v4  ;;  %5113 = vmatmul.msk.bf16.gmra.mxu0 %vm372_vm1, %v2434_v1  ;;  %v2310_v1 = vrot.slane %v2308_v47, 4  ;;  %v978_v4 = vpack.c.b16 %v958_v42, %v957_v41  ;;  %v871_v41 = vshll.u32 %v6136_v29, 16  ;;  %v875_v42 = vshrl.u32 %v6136_v29, 16 }
  0xf6   : > { %2647 = vst [vmem:[%s5790_s22 + $0x18] sm:$0xff] %v2615_v15  ;;  %v854_v63 = vor.u32 %v853_v59, %v6117_v54  ;;  %v2435_v14 = vpack.c.b16 %v2415_v62, %v2414_v53  ;;  %v2302_v32 = vrot.slane %v2301_v13, 4  ;;  %v864_v47 = vrot.slane %v862_v33, 4 }
  0xf7   : > { %v1470_v27 = vpop.f32.mrf.mxu2  ;;  %v2311_v22 = vor.u32 %v2310_v1, %v6122_v0  ;;  %v2319_v51 = vshrl.u32 %v5012_v31, 16  ;;  %v2322_v52 = vshll.u32 %v5012_v31, 16  ;;  %v2328_v59 = vshll.u32 %v5013_v34, 16 }
  0xf8   : > { %v1576_v24 = vadd.f32 %v1470_v27, %v1159_v21  ;;  %v1840_v28 = vpop.f32.mrf.mxu3  ;;  %v845_v21 = vrot.slane %v844_v57, 4  ;;  %v855_v27 = vrot.slane %v854_v63, 4  ;;  %v2307_v44 = vsel %vm5611_vm6, %v2302_v32, %v6122_v0 }
  0xf9   : > { %v1055_v40 = vpop.f32.mrf.mxu1  ;;  %v2332_v60 = vshrl.u32 %v5013_v34, 16  ;;  %v6162_v62 = vrot.slane %v871_v41, 5  ;;  %v2416_v57 = vunpack.c.l.b16 %v2307_v44  ;;  %v868_v5 = vor.u32 %v867_v50, %v864_v47  ;;  %v5015_v34 = vld [vmem:[%s5553_s6 + $0xb4] sm:$0xf]  ;;  %v5016_v44 = vld [vmem:[%s5553_s6 + $0xb8] sm:$0xf] }
  0xfa   : > { %v1946_v46 = vadd.f32 %v1840_v28, %v1576_v24  ;;  %v2512_v48 = vpop.f32.mrf.mxu0  ;;  %v1160_v49 = vadd.f32 %v1055_v40, %v5929_v61  ;;  %v2312_v24 = vrot.slane %v2311_v22, 4  ;;  %v2316_v28 = vrot.slane %v2314_v18, 5 }
  0xfb   : > { %v850_v39 = vsel %vm5611_vm6, %v845_v21, %v6117_v54  ;;  %v1325_v40 = vsel %vm5617_vm7, %v4952_v25, %v1324_v6  ;;  %v2321_v10 = vrot.slane %v2319_v51, 4  ;;  %v6170_v63 = vrot.slane %v2328_v59, 5  ;;  %v5362_v25 = vld [vmem:[%s5553_s6 + $0x9c] sm:$0xff] }
  0xfc   : > { %v2616_v36 = vadd.f32 %v2510_v11, %v1946_v46  ;;  %v2317_v58 = vsel %vm5611_vm6, %v2312_v24, %v2316_v28  ;;  %v959_v56 = vunpack.c.l.b16 %v850_v39  ;;  %v1376_v53 = vunpack.c.l.b16 %v1325_v40  ;;  %v6179_v28 = vld [vmem:[%s5553_s6 + $0xa8] sm:$0xf]  ;;  %v1131_v39 = vld [vmem:[%s5790_s22 + $0x40] sm:$0xff] }
  0xfd   : > { %v2417_v6 = vunpack.c.l.b16 %v2317_v58  ;;  %v2334_v13 = vrot.slane %v2332_v60, 4  ;;  %v1331_v21 = vrot.slane %v6136_v29, 5  ;;  %v4953_v24 = vrot.slane %v6129_v17, 9 }
  0xfe   : > { %2648 = vst [vmem:[%s5790_s22 + $0x20] sm:$0xff] %v2616_v36  ;;  %v2343_v59 = vshrl.u32 %v5015_v34, 16  ;;  %v2346_v60 = vshll.u32 %v5015_v34, 16 }
  0xff   : > { %v1472_v3 = vpop.f32.mrf.mxu2  ;;  %v2335_v33 = vor.u32 %v2334_v13, %v6170_v63  ;;  %v1333_v31 = vrot.slane %v1331_v21, 4  ;;  %v1332_v50 = vsel %vm5617_vm7, %v4953_v24, %v1331_v21 }
 0x100   : > { %v1577_v45 = vadd.f32 %v1472_v3, %v1160_v49  ;;  %v1842_v11 = vpop.f32.mrf.mxu3  ;;  %v877_v49 = vrot.slane %v875_v42, 4 }
 0x101   : > { %v1058_v61 = vpop.f32.mrf.mxu1 }
 0x102   : > { %v1947_v15 = vadd.f32 %v1842_v11, %v1577_v45  ;;  %v2515_v55 = vpop.f32.mrf.mxu0  ;;  %v1161_v20 = vadd.f32 %v1058_v61, %v5953_v38  ;;  %v860_v38 = vsel %vm5611_vm6, %v855_v27, %v859_v16  ;;  %v2324_v45 = vrot.slane %v2322_v52, 5  ;;  %v5014_v11 = vld [vmem:[%s5553_s6 + $0xb0] sm:$0x1] }
 0x103   : > { %v960_v0 = vunpack.c.l.b16 %v860_v38  ;;  %v2338_v27 = vshll.u32 %v5014_v11, 16  ;;  %v889_v38 = vshll.u32 %v6179_v28, 16 }
 0x104   : > { %4935 = vmatmul.msk.bf16.gmra.mxu1 %vm372_vm1, %v978_v4  ;;  %4968 = vmatmul.msk.bf16.gmra.mxu2 %vm372_vm1, %v1395_v23  ;;  %v2617_v19 = vadd.f32 %v2512_v48, %v1947_v15  ;;  %v1328_v48 = vsel %vm5617_vm7, %v1326_v26, %v1327_v30  ;;  %v6165_v4 = vld [vmem:[%s5553_s6 + $0xa4] sm:$0x1]  ;;  %v2436_v26 = vpack.c.b16 %v2417_v6, %v2416_v57 }
 0x105   : > { %5097 = vmatmul.msk.bf16.gmra.mxu3 %vm372_vm1, %v5361_v12  ;;  %5114 = vmatmul.msk.bf16.gmra.mxu0 %vm372_vm1, %v2435_v14  ;;  %v1377_v1 = vunpack.c.l.b16 %v1328_v48  ;;  %v878_v12 = vor.u32 %v877_v49, %v6162_v62  ;;  %v881_v14 = vshll.u32 %v6165_v4, 16  ;;  %v1334_v17 = vrot.slane %v6165_v4, 5 }
 0x106   : > { %2649 = vst [vmem:[%s5790_s22 + $0x28] sm:$0xff] %v2617_v19  ;;  %v2325_v19 = vor.u32 %v2324_v45, %v2321_v10  ;;  %v2340_v42 = vrot.slane %v2338_v27, 5  ;;  %v2336_v48 = vrot.slane %v2335_v33, 4  ;;  %v2352_v49 = vshll.u32 %v5016_v44, 16  ;;  %v6212_v45 = vld [vmem:[%s5553_s6 + $0xb0] sm:$0x1] }
 0x107   : > { %v1475_v37 = vpop.f32.mrf.mxu2  ;;  %v1396_v22 = vpack.c.b16 %v1377_v1, %v1376_v53  ;;  %v879_v8 = vrot.slane %v878_v12, 4  ;;  %v1335_v53 = vsel %vm5617_vm7, %v1333_v31, %v1334_v17  ;;  %v891_v57 = vrot.slane %v889_v38, 5 }
 0x108   : > { %v1578_v35 = vadd.f32 %v1475_v37, %v1161_v20  ;;  %v1845_v46 = vpop.f32.mrf.mxu3  ;;  %v883_v20 = vrot.slane %v881_v14, 5  ;;  %v6184_v37 = vld [vmem:[%s5553_s6 + $0xac] sm:$0xf]  ;;  %v2326_v41 = vrot.slane %v2325_v19, 4  ;;  %v1378_v10 = vunpack.c.l.b16 %v1332_v50  ;;  %v6237_v50 = vld [vmem:[%s5553_s6 + $0xb8] sm:$0xf] }
 0x109   : > { %v1060_v43 = vpop.f32.mrf.mxu1  ;;  %v895_v51 = vshll.u32 %v6184_v37, 16  ;;  %v899_v52 = vshrl.u32 %v6184_v37, 16  ;;  %v2348_v12 = vrot.slane %v2346_v60, 5  ;;  %v1132_v14 = vld [vmem:[%s5790_s22 + $0x48] sm:$0xff]  ;;  %v1338_v27 = vrot.slane %v6184_v37, 5 }
 0x10a   : > { %v1948_v54 = vadd.f32 %v1845_v46, %v1578_v35  ;;  %v2517_v36 = vpop.f32.mrf.mxu0  ;;  %v1162_v23 = vadd.f32 %v1060_v43, %v5985_v9  ;;  %v869_v9 = vrot.slane %v868_v5, 4  ;;  %v886_v46 = vshrl.u32 %v6179_v28, 16 }
 0x10b   : > { %v884_v47 = vsel %vm5611_vm6, %v879_v8, %v883_v20  ;;  %v2341_v5 = vsel %vm5611_vm6, %v2336_v48, %v2340_v42  ;;  %v901_v11 = vrot.slane %v899_v52, 4  ;;  %v1340_v38 = vrot.slane %v1338_v27, 4 }
 0x10c   : > { %v2618_v3 = vadd.f32 %v2515_v55, %v1948_v54  ;;  %v979_v55 = vpack.c.b16 %v960_v0, %v959_v56  ;;  %v874_v40 = vsel %vm5611_vm6, %v869_v9, %v6162_v62  ;;  %v2331_v62 = vsel %vm5611_vm6, %v2326_v41, %v6170_v63  ;;  %v5017_v9 = vld [vmem:[%s5553_s6 + $0xbc] sm:$0x1] }
 0x10d   : > { %v961_v58 = vunpack.c.l.b16 %v874_v40  ;;  %v2356_v0 = vshrl.u32 %v5016_v44, 16  ;;  %v888_v4 = vrot.slane %v886_v46, 4  ;;  %v962_v6 = vunpack.c.l.b16 %v884_v47  ;;  %v1133_v44 = vld [vmem:[%s5790_s22 + $0x50] sm:$0xff] }
 0x10e   : > { %2650 = vst [vmem:[%s5790_s22 + $0x30] sm:$0xff] %v2618_v3  ;;  %v1379_v63 = vunpack.c.l.b16 %v1335_v53  ;;  %v2362_v40 = vshll.u32 %v5017_v9, 16  ;;  %v4954_v46 = vrot.slane %v6179_v28, 9  ;;  %v1341_v48 = vrot.slane %v6212_v45, 5 }
 0x10f   : > { %v1477_v61 = vpop.f32.mrf.mxu2 }
 0x110   : > { %v1579_v15 = vadd.f32 %v1477_v61, %v1162_v23  ;;  %v1847_v18 = vpop.f32.mrf.mxu3  ;;  %v6214_v23 = vrot.slane %v895_v51, 5  ;;  %v2345_v61 = vrot.slane %v2343_v59, 4  ;;  %v1397_v33 = vpack.c.b16 %v1379_v63, %v1378_v10  ;;  %v5412_v59 = vld [vmem:[%s5553_s6 + $0x10] sm:$0xf] }
 0x111   : > { %v1063_v16 = vpop.f32.mrf.mxu1  ;;  %v2694_v60 = vrot.slane %v5412_v59, 5 }
 0x112   : > { %v1949_v30 = vadd.f32 %v1847_v18, %v1579_v15  ;;  %v2520_v32 = vpop.f32.mrf.mxu0  ;;  %v1163_v35 = vadd.f32 %v1131_v39, %v1063_v16  ;;  %v2418_v15 = vunpack.c.l.b16 %v2331_v62  ;;  %v2358_v18 = vrot.slane %v2356_v0, 4 }
 0x113   : > { %v892_v16 = vor.u32 %v891_v57, %v888_v4  ;;  %v902_v19 = vor.u32 %v901_v11, %v6214_v23  ;;  %v2349_v20 = vor.u32 %v2348_v12, %v2345_v61  ;;  %v1339_v4 = vsel %vm5617_vm7, %v4954_v46, %v1338_v27 }
 0x114   : > { %4936 = vmatmul.msk.bf16.gmra.mxu1 %vm372_vm1, %v979_v55  ;;  %4969 = vmatmul.msk.bf16.gmra.mxu2 %vm372_vm1, %v1396_v22  ;;  %v2619_v29 = vadd.f32 %v2517_v36, %v1949_v30  ;;  %v2419_v55 = vunpack.c.l.b16 %v2341_v5  ;;  %v6217_v22 = vrot.slane %v2352_v49, 5  ;;  %v5018_v49 = vld [vmem:[%s5553_s6 + $0xc0] sm:$0xf]  ;;  %v1342_v57 = vsel %vm5617_vm7, %v1340_v38, %v1341_v48  ;;  %v5019_v5 = vld [vmem:[%s5553_s6 + $0xc4] sm:$0xf] }
 0x115   : > { %5098 = vmatmul.msk.bf16.gmra.mxu3 %vm372_vm1, %v5362_v25  ;;  %5115 = vmatmul.msk.bf16.gmra.mxu0 %vm372_vm1, %v2436_v26  ;;  %v905_v25 = vshll.u32 %v6212_v45, 16  ;;  %v893_v41 = vrot.slane %v892_v16, 4  ;;  %v903_v37 = vrot.slane %v902_v19, 4  ;;  %v2350_v47 = vrot.slane %v2349_v20, 4  ;;  %v5020_v48 = vld [vmem:[%s5553_s6 + $0xc8] sm:$0x1] }
 0x116   : > { %2651 = vst [vmem:[%s5790_s22 + $0x38] sm:$0xff] %v2619_v29  ;;  %v5363_v29 = vld [vmem:[%s5553_s6 + $0xa8] sm:$0xff]  ;;  %v2437_v31 = vpack.c.b16 %v2419_v55, %v2418_v15  ;;  %v2359_v39 = vor.u32 %v2358_v18, %v6217_v22  ;;  %v919_v45 = vshll.u32 %v6237_v50, 16  ;;  %v923_v11 = vshrl.u32 %v6237_v50, 16 }
 0x117   : > { %v1480_v43 = vpop.f32.mrf.mxu2  ;;  %v907_v42 = vrot.slane %v905_v25, 5  ;;  %v2370_v18 = vshll.u32 %v5018_v49, 16  ;;  %v2380_v16 = vshrl.u32 %v5019_v5, 16  ;;  %v1381_v19 = vunpack.c.l.b16 %v1342_v57  ;;  %v6288_v57 = vld [vmem:[%s5553_s6 + $0x18] sm:$0xf] }
 0x118   : > { %v1580_v54 = vadd.f32 %v1480_v43, %v1163_v35  ;;  %v1850_v36 = vpop.f32.mrf.mxu3  ;;  %v6227_v35 = vld [vmem:[%s5553_s6 + $0xb4] sm:$0xf]  ;;  %v2360_v52 = vrot.slane %v2359_v39, 4  ;;  %v1345_v38 = vrot.slane %v6237_v50, 5 }
 0x119   : > { %v1065_v56 = vpop.f32.mrf.mxu1  ;;  %v910_v28 = vshrl.u32 %v6227_v35, 16  ;;  %v913_v51 = vshll.u32 %v6227_v35, 16 }
 0x11a   : > { %v1950_v1 = vadd.f32 %v1850_v36, %v1580_v54  ;;  %v2522_v3 = vpop.f32.mrf.mxu0  ;;  %v1164_v21 = vadd.f32 %v1132_v14, %v1065_v56  ;;  %v2364_v54 = vrot.slane %v2362_v40, 5  ;;  %v5411_v36 = vld [vmem:[%s5553_s6 + $0xc] sm:$0xf]  ;;  %v5413_v56 = vld [vmem:[%s5553_s6 + $0x14] sm:$0x1]  ;;  %v2367_v14 = vshrl.u32 %v5018_v49, 16 }
 0x11b   : > { %v2697_v53 = vrot.slane %v5413_v56, 5  ;;  %v915_v61 = vrot.slane %v913_v51, 5  ;;  %v2372_v40 = vrot.slane %v2370_v18, 5 }
 0x11c   : > { %v2620_v13 = vadd.f32 %v2520_v32, %v1950_v1  ;;  %v980_v32 = vpack.c.b16 %v962_v6, %v961_v58  ;;  %v5119_v58 = vrot.slane %v5411_v36, 9  ;;  %v898_v1 = vsel %vm5611_vm6, %v893_v41, %v6214_v23 }
 0x11d   : > { %v2355_v23 = vsel %vm5611_vm6, %v2350_v47, %v6217_v22  ;;  %v2365_v12 = vsel %vm5611_vm6, %v2360_v52, %v2364_v54  ;;  %v963_v25 = vunpack.c.l.b16 %v898_v1  ;;  %v2696_v22 = vrot.slane %v2694_v60, 4  ;;  %v5364_v54 = vld [vmem:[%s5553_s6 + $0xb4] sm:$0xff] }
 0x11e   : > { %2652 = vst [vmem:[%s5790_s22 + $0x40] sm:$0xff] %v2620_v13  ;;  %v912_v13 = vrot.slane %v910_v28, 4  ;;  %v2382_v41 = vrot.slane %v2380_v16, 4  ;;  %v2695_v28 = vsel %vm5617_vm7, %v5119_v58, %v2694_v60 }
 0x11f   : > { %v1482_v26 = vpop.f32.mrf.mxu2  ;;  %v2698_v51 = vsel %vm5617_vm7, %v2696_v22, %v2697_v53  ;;  %v2806_v56 = vunpack.c.l.b16 %v2695_v28  ;;  %v4955_v53 = vrot.slane %v6227_v35, 9 }
 0x120   : > { %v1581_v30 = vadd.f32 %v1482_v26, %v1164_v21  ;;  %v1852_v8 = vpop.f32.mrf.mxu3  ;;  %v2376_v21 = vshll.u32 %v5019_v5, 16  ;;  %v1380_v26 = vunpack.c.l.b16 %v1339_v4  ;;  %v916_v20 = vor.u32 %v915_v61, %v912_v13  ;;  %v6291_v5 = vld [vmem:[%s5553_s6 + $0x1c] sm:$0xf] }
 0x121   : > { %v1068_v24 = vpop.f32.mrf.mxu1  ;;  %v2807_v50 = vunpack.c.l.b16 %v2698_v51  ;;  %v3474_v18 = vshrl.u32 %v6291_v5, 16 }
 0x122   : > { %v1951_v17 = vadd.f32 %v1852_v8, %v1581_v30  ;;  %v2525_v34 = vpop.f32.mrf.mxu0  ;;  %v1165_v62 = vadd.f32 %v1133_v44, %v1068_v24  ;;  %v6264_v30 = vld [vmem:[%s5553_s6 + $0xbc] sm:$0x1]  ;;  %v2420_v24 = vunpack.c.l.b16 %v2355_v23  ;;  %v917_v36 = vrot.slane %v916_v20, 4 }
 0x123   : > { %v1134_v8 = vld [vmem:[%s5790_s22 + $0x58] sm:$0xff]  ;;  %v929_v46 = vshll.u32 %v6264_v30, 16  ;;  %v6282_v4 = vpack.c.b16 %v2807_v50, %v2806_v56  ;;  %v1348_v23 = vrot.slane %v6264_v30, 5 }
 0x124   : > { %4937 = vmatmul.msk.bf16.gmra.mxu1 %vm372_vm1, %v980_v32  ;;  %4970 = vmatmul.msk.bf16.gmra.mxu2 %vm372_vm1, %v1397_v33  ;;  %v2621_v43 = vadd.f32 %v2522_v3, %v1951_v17  ;;  %v908_v3 = vsel %vm5611_vm6, %v903_v37, %v907_v42  ;;  %v6266_v32 = vrot.slane %v919_v45, 5  ;;  %v925_v33 = vrot.slane %v923_v11, 4 }
 0x125   : > { %5099 = vmatmul.msk.bf16.gmra.mxu3 %vm372_vm1, %v5363_v29  ;;  %5116 = vmatmul.msk.bf16.gmra.mxu0 %vm372_vm1, %v2437_v31  ;;  %v964_v9 = vunpack.c.l.b16 %v908_v3  ;;  %v2421_v29 = vunpack.c.l.b16 %v2365_v12  ;;  %v2369_v31 = vrot.slane %v2367_v14, 4  ;;  %v6270_v17 = vrot.slane %v2376_v21, 5 }
 0x126   : > { %2653 = vst [vmem:[%s5790_s22 + $0x48] sm:$0xff] %v2621_v43  ;;  %v1398_v37 = vpack.c.b16 %v1381_v19, %v1380_v26  ;;  %v926_v47 = vor.u32 %v925_v33, %v6266_v32  ;;  %v2386_v3 = vshll.u32 %v5020_v48, 16  ;;  %v931_v60 = vrot.slane %v929_v46, 5 }
 0x127   : > { %v1485_v0 = vpop.f32.mrf.mxu2  ;;  %v2438_v59 = vpack.c.b16 %v2421_v29, %v2420_v24  ;;  %v2383_v1 = vor.u32 %v2382_v41, %v6270_v17  ;;  %v1347_v11 = vrot.slane %v1345_v38, 4  ;;  %v3461_v14 = vshrl.u32 %v6288_v57, 16 }
 0x128   : > { %v1582_v6 = vadd.f32 %v1485_v0, %v1165_v62  ;;  %v1855_v10 = vpop.f32.mrf.mxu3  ;;  %v2373_v0 = vor.u32 %v2372_v40, %v2369_v31  ;;  %v927_v45 = vrot.slane %v926_v47, 4  ;;  %v2388_v61 = vrot.slane %v2386_v3, 5 }
 0x129   : > { %v1070_v63 = vpop.f32.mrf.mxu1  ;;  %v2384_v13 = vrot.slane %v2383_v1, 4  ;;  %v1346_v26 = vsel %vm5617_vm7, %v4955_v53, %v1345_v38  ;;  %v1349_v19 = vsel %vm5617_vm7, %v1347_v11, %v1348_v23  ;;  %v3476_v29 = vrot.slane %v3474_v18, 4 }
 0x12a   : > { %v1952_v15 = vadd.f32 %v1855_v10, %v1582_v6  ;;  %v2527_v55 = vpop.f32.mrf.mxu0  ;;  %v1166_v39 = vadd.f32 %v1134_v8, %v1070_v63  ;;  %v1135_v6 = vld [vmem:[%s5790_s22 + $0x60] sm:$0xff]  ;;  %v922_v10 = vsel %vm5611_vm6, %v917_v36, %v6266_v32  ;;  %v2374_v35 = vrot.slane %v2373_v0, 4 }
 0x12b   : > { %v2389_v33 = vsel %vm5611_vm6, %v2384_v13, %v2388_v61  ;;  %v3463_v8 = vrot.slane %v3461_v14, 4  ;;  %v1383_v40 = vunpack.c.l.b16 %v1349_v19 }
 0x12c   : > { %v2622_v27 = vadd.f32 %v2525_v34, %v1952_v15  ;;  %v981_v34 = vpack.c.b16 %v964_v9, %v963_v25  ;;  %v3464_v15 = vshll.u32 %v6288_v57, 16  ;;  %v932_v9 = vsel %vm5611_vm6, %v927_v45, %v931_v60  ;;  %v6332_v45 = vld [vmem:[%s5553_s6 + $0x28] sm:$0xf] }
 0x12d   : > { %v2379_v32 = vsel %vm5611_vm6, %v2374_v35, %v6270_v17  ;;  %v966_v31 = vunpack.c.l.b16 %v932_v9  ;;  %v2423_v46 = vunpack.c.l.b16 %v2389_v33  ;;  %v3498_v18 = vshrl.u32 %v6332_v45, 16 }
 0x12e   : > { %2654 = vst [vmem:[%s5790_s22 + $0x50] sm:$0xff] %v2622_v27  ;;  %v965_v27 = vunpack.c.l.b16 %v922_v10  ;;  %v3466_v20 = vrot.slane %v3464_v15, 5  ;;  %v6329_v10 = vld [vmem:[%s5553_s6 + $0x24] sm:$0xf] }
 0x12f   : > { %v1487_v42 = vpop.f32.mrf.mxu2  ;;  %v3485_v14 = vshrl.u32 %v6329_v10, 16  ;;  %v3488_v15 = vshll.u32 %v6329_v10, 16 }
 0x130   : > { %v1583_v44 = vadd.f32 %v1487_v42, %v1166_v39  ;;  %v1857_v43 = vpop.f32.mrf.mxu3  ;;  %v1382_v39 = vunpack.c.l.b16 %v1346_v26  ;;  %v5154_v42 = vld [vmem:[%s5553_s6 + $0x20] sm:$0x1]  ;;  %v3467_v17 = vor.u32 %v3466_v20, %v3463_v8  ;;  %v982_v28 = vpack.c.b16 %v966_v31, %v965_v27  ;;  %v1138_v27 = vld [vmem:[%s5790_s22 + $0x78] sm:$0xff] }
 0x131   : > { %v1073_v52 = vpop.f32.mrf.mxu1  ;;  %v4151_v53 = vrot.slane %v5154_v42, 5  ;;  %v3500_v8 = vrot.slane %v3498_v18, 4 }
 0x132   : > { %v1953_v62 = vadd.f32 %v1857_v43, %v1583_v44  ;;  %v2530_v49 = vpop.f32.mrf.mxu0  ;;  %v1167_v63 = vadd.f32 %v1135_v6, %v1073_v52  ;;  %v3480_v43 = vshll.u32 %v5154_v42, 16  ;;  %v1399_v51 = vpack.c.b16 %v1383_v40, %v1382_v39  ;;  %v5366_v39 = vld [vmem:[%s5553_s6 + $0x18] sm:$0xff] }
 0x134   : > { %4938 = vmatmul.msk.bf16.gmra.mxu1 %vm372_vm1, %v981_v34  ;;  %4971 = vmatmul.msk.bf16.gmra.mxu2 %vm372_vm1, %v1398_v37  ;;  %v2623_v58 = vadd.f32 %v2527_v55, %v1953_v62  ;;  %v3470_v55 = vshll.u32 %v6291_v5, 16  ;;  %v1136_v34 = vld [vmem:[%s5790_s22 + $0x68] sm:$0xff]  ;;  %v2422_v37 = vunpack.c.l.b16 %v2379_v32  ;;  %v3482_v1 = vrot.slane %v3480_v43, 5 }
 0x135   : > { %5100 = vmatmul.msk.bf16.gmra.mxu3 %vm372_vm1, %v5364_v54  ;;  %5117 = vmatmul.msk.bf16.gmra.mxu0 %vm372_vm1, %v2438_v59  ;;  %v4148_v54 = vrot.slane %v6291_v5, 5  ;;  %v5365_v59 = vld [vmem:[%s5553_s6 + $0xc0] sm:$0xff]  ;;  %v1137_v5 = vld [vmem:[%s5790_s22 + $0x70] sm:$0xff]  ;;  %v3490_v32 = vrot.slane %v3488_v15, 5 }
 0x136   : > { %2655 = vst [vmem:[%s5790_s22 + $0x58] sm:$0xff] %v2623_v58  ;;  %v3472_v24 = vrot.slane %v3470_v55, 5  ;;  %v2439_v56 = vpack.c.b16 %v2423_v46, %v2422_v37  ;;  %v5298_v58 = vrot.slane %v6288_v57, 9  ;;  %v3494_v55 = vshll.u32 %v6332_v45, 16  ;;  %v5414_v37 = vld [vmem:[%s5553_s6 + $0x1c] sm:$0xf] }
 0x137   : > { %v1490_v12 = vpop.f32.mrf.mxu2  ;;  %v4150_v60 = vrot.slane %v4148_v54, 4  ;;  %v2701_v46 = vrot.slane %v5414_v37, 5  ;;  %v5367_v37 = vld [vmem:[%s5553_s6 + $0x24] sm:$0xff] }
 0x138   : > { %v1584_v21 = vadd.f32 %v1490_v12, %v1167_v63  ;;  %v1860_v16 = vpop.f32.mrf.mxu3  ;;  %v3477_v44 = vor.u32 %v3476_v29, %v3472_v24  ;;  %v4149_v13 = vsel %vm5617_vm7, %v5298_v58, %v4148_v54  ;;  %v6347_v33 = vrot.slane %v3494_v55, 5  ;;  %v5416_v54 = vld [vmem:[%s5553_s6 + $0x18] sm:$0xf] }
 0x139   : > { %v1075_v25 = vpop.f32.mrf.mxu1  ;;  %v4152_v61 = vsel %vm5617_vm7, %v4150_v60, %v4151_v53  ;;  %v4260_v19 = vunpack.c.l.b16 %v4149_v13 }
 0x13a   : > { %v1954_v22 = vadd.f32 %v1860_v16, %v1584_v21  ;;  %v2532_v30 = vpop.f32.mrf.mxu0  ;;  %v1168_v38 = vadd.f32 %v1136_v34, %v1075_v25  ;;  %v3478_v0 = vrot.slane %v3477_v44, 4 }
 0x13c   : > { %v2624_v41 = vadd.f32 %v2530_v49, %v1954_v22  ;;  %v3468_v49 = vrot.slane %v3467_v17, 4  ;;  %v3483_v57 = vsel %vm5611_vm6, %v3478_v0, %v3482_v1  ;;  %v4261_v22 = vunpack.c.l.b16 %v4152_v61 }
 0x13d   : > { %v3847_v26 = vunpack.c.l.b16 %v3483_v57 }
 0x13e   : > { %2656 = vst [vmem:[%s5790_s22 + $0x60] sm:$0xff] %v2624_v41  ;;  %v3473_v23 = vsel %vm5611_vm6, %v3468_v49, %v3472_v24  ;;  %v5157_v24 = vld [vmem:[%s5553_s6 + $0x2c] sm:$0x1]  ;;  %v4292_v42 = vpack.c.b16 %v4261_v22, %v4260_v19  ;;  %v5160_v22 = vld [vmem:[%s5553_s6 + $0x38] sm:$0x1] }
 0x13f   : > { %v1492_v48 = vpop.f32.mrf.mxu2  ;;  %v3846_v25 = vunpack.c.l.b16 %v3473_v23  ;;  %v3504_v17 = vshll.u32 %v5157_v24, 16  ;;  %v4158_v60 = vrot.slane %v5157_v24, 5 }
 0x140   : > { %v1585_v47 = vadd.f32 %v1492_v48, %v1168_v38  ;;  %v1862_v52 = vpop.f32.mrf.mxu3  ;;  %v3501_v48 = vor.u32 %v3500_v8, %v6347_v33 }
 0x141   : > { %v1078_v36 = vpop.f32.mrf.mxu1  ;;  %v3878_v41 = vpack.c.b16 %v3847_v26, %v3846_v25  ;;  %v3506_v1 = vrot.slane %v3504_v17, 5 }
 0x142   : > { %v1955_v50 = vadd.f32 %v1862_v52, %v1585_v47  ;;  %v2535_v62 = vpop.f32.mrf.mxu0  ;;  %v1169_v6 = vadd.f32 %v1137_v5, %v1078_v36  ;;  %v4155_v47 = vrot.slane %v6332_v45, 5  ;;  %v5120_v36 = vrot.slane %v5416_v54, 9 }
 0x143   : > { %v3502_v0 = vrot.slane %v3501_v48, 4 }
 0x144   : > { %4939 = vmatmul.msk.bf16.gmra.mxu1 %vm372_vm1, %v982_v28  ;;  %4972 = vmatmul.msk.bf16.gmra.mxu2 %vm372_vm1, %v1399_v51  ;;  %v2625_v3 = vadd.f32 %v2532_v30, %v1955_v50  ;;  %v3487_v30 = vrot.slane %v3485_v14, 4  ;;  %v5415_v28 = vld [vmem:[%s5553_s6 + $0x20] sm:$0x1]  ;;  %v4157_v58 = vrot.slane %v4155_v47, 4  ;;  %v2702_v57 = vsel %vm5617_vm7, %v5120_v36, %v2701_v46 }
 0x145   : > { %5101 = vmatmul.msk.bf16.gmra.mxu3 %vm372_vm1, %v5365_v59  ;;  %5118 = vmatmul.msk.bf16.gmra.mxu0 %vm372_vm1, %v2439_v56  ;;  %v2704_v51 = vrot.slane %v5415_v28, 5  ;;  %v6361_v59 = vld [vmem:[%s5553_s6 + $0x30] sm:$0xf]  ;;  %v6364_v56 = vld [vmem:[%s5553_s6 + $0x34] sm:$0xf]  ;;  %v1139_v50 = vld [vmem:[%s5790_s22 + $0x80] sm:$0xff] }
 0x146   : > { %2657 = vst [vmem:[%s5790_s22 + $0x68] sm:$0xff] %v2625_v3  ;;  %v3491_v38 = vor.u32 %v3490_v32, %v3487_v30  ;;  %v3509_v5 = vshrl.u32 %v6361_v59, 16  ;;  %v3518_v45 = vshll.u32 %v6364_v56, 16  ;;  %v4159_v55 = vsel %vm5617_vm7, %v4157_v58, %v4158_v60  ;;  %v6407_v60 = vld [vmem:[%s5553_s6 + $0x3c] sm:$0xf] }
 0x147   : > { %v1495_v11 = vpop.f32.mrf.mxu2  ;;  %v4263_v8 = vunpack.c.l.b16 %v4159_v55 }
 0x148   : > { %v1586_v63 = vadd.f32 %v1495_v11, %v1169_v6  ;;  %v1865_v35 = vpop.f32.mrf.mxu3  ;;  %v3492_v49 = vrot.slane %v3491_v38, 4  ;;  %v3512_v6 = vshll.u32 %v6361_v59, 16  ;;  %v3522_v11 = vshrl.u32 %v6364_v56, 16 }
 0x149   : > { %v1080_v12 = vpop.f32.mrf.mxu1  ;;  %v3511_v18 = vrot.slane %v3509_v5, 4  ;;  %v4162_v38 = vrot.slane %v6364_v56, 5 }
 0x14a   : > { %v1956_v21 = vadd.f32 %v1865_v35, %v1586_v63  ;;  %v2537_v16 = vpop.f32.mrf.mxu0  ;;  %v1170_v20 = vadd.f32 %v1138_v27, %v1080_v12  ;;  %v3497_v13 = vsel %vm5611_vm6, %v3492_v49, %v6347_v33  ;;  %v3507_v12 = vsel %vm5611_vm6, %v3502_v0, %v3506_v1  ;;  %v1140_v27 = vld [vmem:[%s5790_s22 + $0x88] sm:$0xff] }
 0x14b   : > { %v3524_v25 = vrot.slane %v3522_v11, 4  ;;  %v3848_v30 = vunpack.c.l.b16 %v3497_v13  ;;  %v3849_v32 = vunpack.c.l.b16 %v3507_v12  ;;  %v5300_v0 = vrot.slane %v6361_v59, 9 }
 0x14c   : > { %v2626_v9 = vadd.f32 %v2535_v62, %v1956_v21  ;;  %v2703_v62 = vrot.slane %v2701_v46, 4  ;;  %v3514_v21 = vrot.slane %v3512_v6, 5  ;;  %v4164_v1 = vrot.slane %v4162_v38, 4 }
 0x14d   : > { %v3879_v17 = vpack.c.b16 %v3849_v32, %v3848_v30  ;;  %v3533_v13 = vshrl.u32 %v6407_v60, 16 }
 0x14e   : > { %2658 = vst [vmem:[%s5790_s22 + $0x70] sm:$0xff] %v2626_v9  ;;  %v2808_v9 = vunpack.c.l.b16 %v2702_v57 }
 0x14f   : > { %v1497_v29 = vpop.f32.mrf.mxu2 }
 0x150   : > { %v1587_v31 = vadd.f32 %v1497_v29, %v1170_v20  ;;  %v1867_v40 = vpop.f32.mrf.mxu3  ;;  %v5417_v29 = vld [vmem:[%s5553_s6 + $0x28] sm:$0xf] }
 0x151   : > { %v1083_v34 = vpop.f32.mrf.mxu1 }
 0x152   : > { %v1957_v44 = vadd.f32 %v1867_v40, %v1587_v31  ;;  %v2540_v43 = vpop.f32.mrf.mxu0  ;;  %v1171_v3 = vadd.f32 %v1139_v50, %v1083_v34  ;;  %v2708_v31 = vrot.slane %v5417_v29, 5 }
 0x154   : > { %5136 = vmatmul.msk.bf16.vlgmr.msra.gmra.mxu1 %vm372_vm1, %v6282_v4  ;;  %5265 = vmatmul.msk.bf16.vlgmr.msra.gmra.mxu2 %vm372_vm1, %v5366_v39  ;;  %v2627_v52 = vadd.f32 %v2537_v16, %v1957_v44  ;;  %v5299_v4 = vrot.slane %v6329_v10, 9  ;;  %v2705_v10 = vsel %vm5617_vm7, %v2703_v62, %v2704_v51  ;;  %v6388_v16 = vrot.slane %v3518_v45, 5  ;;  %v5419_v51 = vld [vmem:[%s5553_s6 + $0x24] sm:$0xf] }
 0x155   : > { %5282 = vmatmul.msk.bf16.vlgmr.msra.gmra.mxu3 %vm372_vm1, %v3878_v41  ;;  %5315 = vmatmul.msk.bf16.vlgmr.msra.gmra.mxu0 %vm372_vm1, %v4292_v42  ;;  %v2809_v26 = vunpack.c.l.b16 %v2705_v10  ;;  %v3515_v39 = vor.u32 %v3514_v21, %v3511_v18  ;;  %v3528_v41 = vshll.u32 %v5160_v22, 16  ;;  %v2710_v36 = vrot.slane %v2708_v31, 4 }
 0x156   : > { %2659 = vst [vmem:[%s5790_s22 + $0x78] sm:$0xff] %v2627_v52  ;;  %v4156_v15 = vsel %vm5617_vm7, %v5299_v4, %v4155_v47  ;;  %v3525_v40 = vor.u32 %v3524_v25, %v6388_v16  ;;  %v5121_v52 = vrot.slane %v5419_v51, 9  ;;  %v1141_v4 = vld [vmem:[%s5790_s22 + $0x90] sm:$0xff] }
 0x157   : > { %v1500_v53 = vpop.f32.mrf.mxu2  ;;  %v4262_v33 = vunpack.c.l.b16 %v4156_v15  ;;  %v2839_v34 = vpack.c.b16 %v2809_v26, %v2808_v9  ;;  %v3516_v50 = vrot.slane %v3515_v39, 4  ;;  %v3530_v49 = vrot.slane %v3528_v41, 5  ;;  %v5368_v39 = vld [vmem:[%s5553_s6 + $0x30] sm:$0xff] }
 0x158   : > { %v1588_v23 = vadd.f32 %v1500_v53, %v1171_v3  ;;  %v1870_v63 = vpop.f32.mrf.mxu3  ;;  %v3526_v62 = vrot.slane %v3525_v40, 4  ;;  %v4165_v3 = vrot.slane %v5160_v22, 5  ;;  %v6410_v53 = vld [vmem:[%s5553_s6 + $0x40] sm:$0xf]  ;;  %v2709_v6 = vsel %vm5617_vm7, %v5121_v52, %v2708_v31  ;;  %v1142_v22 = vld [vmem:[%s5790_s22 + $0x98] sm:$0xff] }
 0x159   : > { %v1085_v35 = vpop.f32.mrf.mxu1  ;;  %v4293_v44 = vpack.c.b16 %v4263_v8, %v4262_v33  ;;  %v3521_v45 = vsel %vm5611_vm6, %v3516_v50, %v6388_v16  ;;  %v3542_v12 = vshll.u32 %v6410_v53, 16  ;;  %v2810_v18 = vunpack.c.l.b16 %v2709_v6  ;;  %v6443_v50 = vld [vmem:[%s5553_s6 + $0x48] sm:$0xf] }
 0x15a   : > { %v1958_v61 = vadd.f32 %v1870_v63, %v1588_v23  ;;  %v2542_v14 = vpop.f32.mrf.mxu0  ;;  %v1172_v20 = vadd.f32 %v1140_v27, %v1085_v35  ;;  %v3531_v63 = vsel %vm5611_vm6, %v3526_v62, %v3530_v49  ;;  %v4163_v35 = vsel %vm5617_vm7, %v5300_v0, %v4162_v38  ;;  %v6446_v62 = vld [vmem:[%s5553_s6 + $0x4c] sm:$0xf]  ;;  %v1143_v49 = vld [vmem:[%s5790_s22 + $0xa0] sm:$0xff] }
 0x15b   : > { %v4166_v57 = vsel %vm5617_vm7, %v4164_v1, %v4165_v3  ;;  %v3850_v16 = vunpack.c.l.b16 %v3521_v45  ;;  %v3851_v9 = vunpack.c.l.b16 %v3531_v63  ;;  %v4264_v26 = vunpack.c.l.b16 %v4163_v35 }
 0x15c   : > { %v2628_v19 = vadd.f32 %v2540_v43, %v1958_v61  ;;  %v5418_v43 = vld [vmem:[%s5553_s6 + $0x2c] sm:$0x1]  ;;  %v3536_v61 = vshll.u32 %v6407_v60, 16  ;;  %v3535_v27 = vrot.slane %v3533_v13, 4  ;;  %v6430_v32 = vrot.slane %v3542_v12, 5 }
 0x15d   : > { %v2711_v47 = vrot.slane %v5418_v43, 5  ;;  %v3880_v41 = vpack.c.b16 %v3851_v9, %v3850_v16  ;;  %v3560_v45 = vshll.u32 %v6443_v50, 16 }
 0x15e   : > { %2660 = vst [vmem:[%s5790_s22 + $0x80] sm:$0xff] %v2628_v19  ;;  %v4265_v19 = vunpack.c.l.b16 %v4166_v57  ;;  %v3538_v30 = vrot.slane %v3536_v61, 5 }
 0x15f   : > { %v1502_v24 = vpop.f32.mrf.mxu2  ;;  %v2712_v59 = vsel %vm5617_vm7, %v2710_v36, %v2711_v47  ;;  %v4169_v47 = vrot.slane %v6410_v53, 5 }
 0x160   : > { %v1589_v42 = vadd.f32 %v1502_v24, %v1172_v20  ;;  %v1872_v46 = vpop.f32.mrf.mxu3  ;;  %v2811_v21 = vunpack.c.l.b16 %v2712_v59  ;;  %v5163_v20 = vld [vmem:[%s5553_s6 + $0x44] sm:$0x1]  ;;  %v3539_v38 = vor.u32 %v3538_v30, %v3535_v27  ;;  %v3557_v59 = vshrl.u32 %v6443_v50, 16  ;;  %v1144_v27 = vld [vmem:[%s5790_s22 + $0xa8] sm:$0xff] }
 0x161   : > { %v1088_v48 = vpop.f32.mrf.mxu1 }
 0x162   : > { %v1959_v28 = vadd.f32 %v1872_v46, %v1589_v42  ;;  %v2545_v54 = vpop.f32.mrf.mxu0  ;;  %v1173_v58 = vadd.f32 %v1141_v4, %v1088_v48  ;;  %v2840_v31 = vpack.c.b16 %v2811_v21, %v2810_v18  ;;  %v4294_v42 = vpack.c.b16 %v4265_v19, %v4264_v26 }
 0x163   : > { %v3540_v0 = vrot.slane %v3539_v38, 4  ;;  %v3559_v18 = vrot.slane %v3557_v59, 4  ;;  %v3562_v21 = vrot.slane %v3560_v45, 5  ;;  %v4176_v38 = vrot.slane %v6446_v62, 5 }
 0x164   : > { %5137 = vmatmul.msk.bf16.gmra.mxu1 %vm372_vm1, %v2839_v34  ;;  %5266 = vmatmul.msk.bf16.gmra.mxu2 %vm372_vm1, %v5367_v37  ;;  %v2629_v56 = vadd.f32 %v2542_v14, %v1959_v28  ;;  %v3546_v14 = vshrl.u32 %v6410_v53, 16  ;;  %v5420_v37 = vld [vmem:[%s5553_s6 + $0x34] sm:$0xf]  ;;  %v5421_v28 = vld [vmem:[%s5553_s6 + $0x38] sm:$0x1]  ;;  %v4171_v53 = vrot.slane %v4169_v47, 4 }
 0x165   : > { %5283 = vmatmul.msk.bf16.gmra.mxu3 %vm372_vm1, %v3879_v17  ;;  %5316 = vmatmul.msk.bf16.gmra.mxu0 %vm372_vm1, %v4293_v44  ;;  %v2715_v46 = vrot.slane %v5420_v37, 5  ;;  %v3552_v17 = vshll.u32 %v5163_v20, 16  ;;  %v2718_v51 = vrot.slane %v5421_v28, 5  ;;  %v3545_v13 = vsel %vm5611_vm6, %v3540_v0, %v6430_v32  ;;  %v5369_v37 = vld [vmem:[%s5553_s6 + $0x3c] sm:$0xff] }
 0x166   : > { %2661 = vst [vmem:[%s5790_s22 + $0x88] sm:$0xff] %v2629_v56  ;;  %v3548_v33 = vrot.slane %v3546_v14, 4  ;;  %v3852_v30 = vunpack.c.l.b16 %v3545_v13 }
 0x167   : > { %v1505_v5 = vpop.f32.mrf.mxu2  ;;  %v2717_v56 = vrot.slane %v2715_v46, 4  ;;  %v3554_v3 = vrot.slane %v3552_v17, 5 }
 0x168   : > { %v1590_v11 = vadd.f32 %v1505_v5, %v1173_v58  ;;  %v1875_v23 = vpop.f32.mrf.mxu3  ;;  %v3549_v48 = vor.u32 %v3548_v33, %v6430_v32  ;;  %v5301_v58 = vrot.slane %v6407_v60, 9  ;;  %v4172_v5 = vrot.slane %v5163_v20, 5 }
 0x169   : > { %v1090_v10 = vpop.f32.mrf.mxu1  ;;  %v2719_v60 = vsel %vm5617_vm7, %v2717_v56, %v2718_v51  ;;  %v5425_v51 = vld [vmem:[%s5553_s6 + $0x3c] sm:$0xf] }
 0x16a   : > { %v1960_v15 = vadd.f32 %v1875_v23, %v1590_v11  ;;  %v2547_v55 = vpop.f32.mrf.mxu0  ;;  %v1174_v8 = vadd.f32 %v1142_v22, %v1090_v10  ;;  %v3550_v1 = vrot.slane %v3549_v48, 4  ;;  %v3566_v11 = vshll.u32 %v6446_v62, 16  ;;  %v5166_v22 = vld [vmem:[%s5553_s6 + $0x50] sm:$0x1] }
 0x16b   : > { %v3570_v23 = vshrl.u32 %v6446_v62, 16  ;;  %v2813_v26 = vunpack.c.l.b16 %v2719_v60 }
 0x16c   : > { %v2630_v25 = vadd.f32 %v2545_v54, %v1960_v15  ;;  %v5422_v54 = vld [vmem:[%s5553_s6 + $0x30] sm:$0xf]  ;;  %v3555_v12 = vsel %vm5611_vm6, %v3550_v1, %v3554_v3  ;;  %v4170_v15 = vsel %vm5617_vm7, %v5301_v58, %v4169_v47  ;;  %v6470_v16 = vrot.slane %v3566_v11, 5 }
 0x16d   : > { %v5122_v36 = vrot.slane %v5422_v54, 9  ;;  %v3853_v32 = vunpack.c.l.b16 %v3555_v12  ;;  %v4266_v33 = vunpack.c.l.b16 %v4170_v15  ;;  %v5302_v1 = vrot.slane %v6443_v50, 9  ;;  %v1145_v58 = vld [vmem:[%s5790_s22 + $0xb0] sm:$0xff] }
 0x16e   : > { %2662 = vst [vmem:[%s5790_s22 + $0x90] sm:$0xff] %v2630_v25  ;;  %v3572_v25 = vrot.slane %v3570_v23, 4  ;;  %v4178_v3 = vrot.slane %v4176_v38, 4 }
 0x16f   : > { %v1507_v24 = vpop.f32.mrf.mxu2  ;;  %v2716_v10 = vsel %vm5617_vm7, %v5122_v36, %v2715_v46  ;;  %v3881_v17 = vpack.c.b16 %v3853_v32, %v3852_v30 }
 0x170   : > { %v1591_v29 = vadd.f32 %v1507_v24, %v1174_v8  ;;  %v1877_v40 = vpop.f32.mrf.mxu3  ;;  %v2812_v9 = vunpack.c.l.b16 %v2716_v10 }
 0x171   : > { %v1093_v34 = vpop.f32.mrf.mxu1 }
 0x172   : > { %v1961_v44 = vadd.f32 %v1877_v40, %v1591_v29  ;;  %v2550_v43 = vpop.f32.mrf.mxu0  ;;  %v1175_v4 = vadd.f32 %v1143_v49, %v1093_v34  ;;  %v5423_v29 = vld [vmem:[%s5553_s6 + $0x40] sm:$0xf]  ;;  %v3573_v40 = vor.u32 %v3572_v25, %v6470_v16  ;;  %v2841_v34 = vpack.c.b16 %v2813_v26, %v2812_v9 }
 0x174   : > { %5138 = vmatmul.msk.bf16.gmra.mxu1 %vm372_vm1, %v2840_v31  ;;  %5267 = vmatmul.msk.bf16.gmra.mxu2 %vm372_vm1, %v5368_v39  ;;  %v2631_v52 = vadd.f32 %v2547_v55, %v1961_v44  ;;  %v4173_v55 = vsel %vm5617_vm7, %v4171_v53, %v4172_v5  ;;  %v2722_v31 = vrot.slane %v5423_v29, 5  ;;  %v3563_v39 = vor.u32 %v3562_v21, %v3559_v18  ;;  %v6489_v5 = vld [vmem:[%s5553_s6 + $0x54] sm:$0xf] }
 0x175   : > { %5284 = vmatmul.msk.bf16.gmra.mxu3 %vm372_vm1, %v3880_v41  ;;  %5317 = vmatmul.msk.bf16.gmra.mxu0 %vm372_vm1, %v4294_v42  ;;  %v4267_v8 = vunpack.c.l.b16 %v4173_v55  ;;  %v3576_v41 = vshll.u32 %v5166_v22, 16  ;;  %v3574_v56 = vrot.slane %v3573_v40, 4  ;;  %v3581_v13 = vshrl.u32 %v6489_v5, 16 }
 0x176   : > { %2663 = vst [vmem:[%s5790_s22 + $0x98] sm:$0xff] %v2631_v52  ;;  %v5123_v52 = vrot.slane %v5425_v51, 9  ;;  %v2724_v36 = vrot.slane %v2722_v31, 4  ;;  %v3564_v49 = vrot.slane %v3563_v39, 4  ;;  %v5370_v39 = vld [vmem:[%s5553_s6 + $0x48] sm:$0xff] }
 0x177   : > { %v1510_v6 = vpop.f32.mrf.mxu2  ;;  %v4295_v44 = vpack.c.b16 %v4267_v8, %v4266_v33  ;;  %v3578_v0 = vrot.slane %v3576_v41, 5 }
 0x178   : > { %v1592_v63 = vadd.f32 %v1510_v6, %v1175_v4  ;;  %v1880_v35 = vpop.f32.mrf.mxu3  ;;  %v4179_v4 = vrot.slane %v5166_v22, 5  ;;  %v6492_v6 = vld [vmem:[%s5553_s6 + $0x58] sm:$0xf]  ;;  %v2723_v45 = vsel %vm5617_vm7, %v5123_v52, %v2722_v31  ;;  %v3569_v11 = vsel %vm5611_vm6, %v3564_v49, %v6470_v16  ;;  %v6525_v49 = vld [vmem:[%s5553_s6 + $0x60] sm:$0xf] }
 0x179   : > { %v1095_v57 = vpop.f32.mrf.mxu1  ;;  %v3590_v12 = vshll.u32 %v6492_v6, 16  ;;  %v2814_v18 = vunpack.c.l.b16 %v2723_v45  ;;  %v3854_v16 = vunpack.c.l.b16 %v3569_v11  ;;  %v1146_v22 = vld [vmem:[%s5790_s22 + $0xb8] sm:$0xff]  ;;  %v3608_v11 = vshll.u32 %v6525_v49, 16 }
 0x17a   : > { %v1962_v61 = vadd.f32 %v1880_v35, %v1592_v63  ;;  %v2552_v14 = vpop.f32.mrf.mxu0  ;;  %v1176_v20 = vadd.f32 %v1144_v27, %v1095_v57  ;;  %v3579_v35 = vsel %vm5611_vm6, %v3574_v56, %v3578_v0  ;;  %v4177_v57 = vsel %vm5617_vm7, %v5302_v1, %v4176_v38  ;;  %v6528_v56 = vld [vmem:[%s5553_s6 + $0x64] sm:$0xf] }
 0x17b   : > { %v4180_v10 = vsel %vm5617_vm7, %v4178_v3, %v4179_v4  ;;  %v3855_v9 = vunpack.c.l.b16 %v3579_v35  ;;  %v4268_v26 = vunpack.c.l.b16 %v4177_v57  ;;  %v3583_v27 = vrot.slane %v3581_v13, 4  ;;  %v1147_v0 = vld [vmem:[%s5790_s22 + $0xc0] sm:$0xff] }
 0x17c   : > { %v2632_v19 = vadd.f32 %v2550_v43, %v1962_v61  ;;  %v5424_v43 = vld [vmem:[%s5553_s6 + $0x44] sm:$0x1]  ;;  %v3584_v61 = vshll.u32 %v6489_v5, 16  ;;  %v6512_v32 = vrot.slane %v3590_v12, 5 }
 0x17d   : > { %v2725_v47 = vrot.slane %v5424_v43, 5  ;;  %v3882_v41 = vpack.c.b16 %v3855_v9, %v3854_v16 }
 0x17e   : > { %2664 = vst [vmem:[%s5790_s22 + $0xa0] sm:$0xff] %v2632_v19  ;;  %v4269_v19 = vunpack.c.l.b16 %v4180_v10  ;;  %v3586_v30 = vrot.slane %v3584_v61, 5 }
 0x17f   : > { %v1512_v24 = vpop.f32.mrf.mxu2  ;;  %v2726_v50 = vsel %vm5617_vm7, %v2724_v36, %v2725_v47  ;;  %v4183_v47 = vrot.slane %v6492_v6, 5 }
 0x180   : > { %v1593_v42 = vadd.f32 %v1512_v24, %v1176_v20  ;;  %v1882_v46 = vpop.f32.mrf.mxu3  ;;  %v2815_v21 = vunpack.c.l.b16 %v2726_v50  ;;  %v5169_v20 = vld [vmem:[%s5553_s6 + $0x5c] sm:$0x1]  ;;  %v3587_v38 = vor.u32 %v3586_v30, %v3583_v27  ;;  %v3605_v50 = vshrl.u32 %v6525_v49, 16  ;;  %v1148_v27 = vld [vmem:[%s5790_s22 + $0xc8] sm:$0xff] }
 0x181   : > { %v1098_v48 = vpop.f32.mrf.mxu1 }
 0x182   : > { %v1963_v28 = vadd.f32 %v1882_v46, %v1593_v42  ;;  %v2555_v54 = vpop.f32.mrf.mxu0  ;;  %v1177_v53 = vadd.f32 %v1145_v58, %v1098_v48  ;;  %v2842_v31 = vpack.c.b16 %v2815_v21, %v2814_v18  ;;  %v4296_v42 = vpack.c.b16 %v4269_v19, %v4268_v26 }
 0x183   : > { %v3588_v1 = vrot.slane %v3587_v38, 4  ;;  %v3607_v18 = vrot.slane %v3605_v50, 4  ;;  %v3610_v21 = vrot.slane %v3608_v11, 5  ;;  %v4190_v38 = vrot.slane %v6528_v56, 5 }
 0x184   : > { %5139 = vmatmul.msk.bf16.gmra.mxu1 %vm372_vm1, %v2841_v34  ;;  %5268 = vmatmul.msk.bf16.gmra.mxu2 %vm372_vm1, %v5369_v37  ;;  %v2633_v62 = vadd.f32 %v2552_v14, %v1963_v28  ;;  %v3594_v14 = vshrl.u32 %v6492_v6, 16  ;;  %v5426_v37 = vld [vmem:[%s5553_s6 + $0x4c] sm:$0xf]  ;;  %v5427_v28 = vld [vmem:[%s5553_s6 + $0x50] sm:$0x1]  ;;  %v4185_v6 = vrot.slane %v4183_v47, 4 }
 0x185   : > { %5285 = vmatmul.msk.bf16.gmra.mxu3 %vm372_vm1, %v3881_v17  ;;  %5318 = vmatmul.msk.bf16.gmra.mxu0 %vm372_vm1, %v4295_v44  ;;  %v2729_v46 = vrot.slane %v5426_v37, 5  ;;  %v3600_v17 = vshll.u32 %v5169_v20, 16  ;;  %v2732_v51 = vrot.slane %v5427_v28, 5  ;;  %v3593_v13 = vsel %vm5611_vm6, %v3588_v1, %v6512_v32  ;;  %v5371_v37 = vld [vmem:[%s5553_s6 + $0x54] sm:$0xff] }
 0x186   : > { %2665 = vst [vmem:[%s5790_s22 + $0xa8] sm:$0xff] %v2633_v62  ;;  %v3596_v33 = vrot.slane %v3594_v14, 4  ;;  %v3856_v30 = vunpack.c.l.b16 %v3593_v13 }
 0x187   : > { %v1515_v59 = vpop.f32.mrf.mxu2  ;;  %v2731_v62 = vrot.slane %v2729_v46, 4  ;;  %v3602_v4 = vrot.slane %v3600_v17, 5 }
 0x188   : > { %v1594_v23 = vadd.f32 %v1515_v59, %v1177_v53  ;;  %v1885_v63 = vpop.f32.mrf.mxu3  ;;  %v3597_v48 = vor.u32 %v3596_v33, %v6512_v32  ;;  %v5303_v53 = vrot.slane %v6489_v5, 9  ;;  %v4186_v59 = vrot.slane %v5169_v20, 5 }
 0x189   : > { %v1100_v60 = vpop.f32.mrf.mxu1  ;;  %v2733_v5 = vsel %vm5617_vm7, %v2731_v62, %v2732_v51  ;;  %v5431_v51 = vld [vmem:[%s5553_s6 + $0x54] sm:$0xf] }
 0x18a   : > { %v1964_v15 = vadd.f32 %v1885_v63, %v1594_v23  ;;  %v2557_v55 = vpop.f32.mrf.mxu0  ;;  %v1178_v8 = vadd.f32 %v1146_v22, %v1100_v60  ;;  %v3598_v3 = vrot.slane %v3597_v48, 4  ;;  %v3614_v23 = vshll.u32 %v6528_v56, 16  ;;  %v5172_v22 = vld [vmem:[%s5553_s6 + $0x68] sm:$0x1] }
 0x18b   : > { %v3618_v63 = vshrl.u32 %v6528_v56, 16  ;;  %v2817_v26 = vunpack.c.l.b16 %v2733_v5 }
 0x18c   : > { %v2634_v25 = vadd.f32 %v2555_v54, %v1964_v15  ;;  %v5428_v54 = vld [vmem:[%s5553_s6 + $0x48] sm:$0xf]  ;;  %v3603_v12 = vsel %vm5611_vm6, %v3598_v3, %v3602_v4  ;;  %v4184_v15 = vsel %vm5617_vm7, %v5303_v53, %v4183_v47  ;;  %v6552_v16 = vrot.slane %v3614_v23, 5  ;;  %v1149_v53 = vld [vmem:[%s5790_s22 + $0xd0] sm:$0xff] }
 0x18d   : > { %v5124_v36 = vrot.slane %v5428_v54, 9  ;;  %v3857_v32 = vunpack.c.l.b16 %v3603_v12  ;;  %v4270_v33 = vunpack.c.l.b16 %v4184_v15  ;;  %v5304_v3 = vrot.slane %v6525_v49, 9 }
 0x18e   : > { %2666 = vst [vmem:[%s5790_s22 + $0xb0] sm:$0xff] %v2634_v25  ;;  %v3620_v25 = vrot.slane %v3618_v63, 4  ;;  %v4192_v4 = vrot.slane %v4190_v38, 4 }
 0x18f   : > { %v1517_v24 = vpop.f32.mrf.mxu2  ;;  %v2730_v60 = vsel %vm5617_vm7, %v5124_v36, %v2729_v46  ;;  %v3883_v17 = vpack.c.b16 %v3857_v32, %v3856_v30 }
 0x190   : > { %v1595_v29 = vadd.f32 %v1517_v24, %v1178_v8  ;;  %v1887_v40 = vpop.f32.mrf.mxu3  ;;  %v2816_v9 = vunpack.c.l.b16 %v2730_v60 }
 0x191   : > { %v1103_v34 = vpop.f32.mrf.mxu1 }
 0x192   : > { %v1965_v44 = vadd.f32 %v1887_v40, %v1595_v29  ;;  %v2560_v43 = vpop.f32.mrf.mxu0  ;;  %v1179_v58 = vadd.f32 %v1147_v0, %v1103_v34  ;;  %v5429_v29 = vld [vmem:[%s5553_s6 + $0x58] sm:$0xf]  ;;  %v3621_v40 = vor.u32 %v3620_v25, %v6552_v16  ;;  %v2843_v34 = vpack.c.b16 %v2817_v26, %v2816_v9 }
 0x194   : > { %5140 = vmatmul.msk.bf16.gmra.mxu1 %vm372_vm1, %v2842_v31  ;;  %5269 = vmatmul.msk.bf16.gmra.mxu2 %vm372_vm1, %v5370_v39  ;;  %v2635_v52 = vadd.f32 %v2557_v55, %v1965_v44  ;;  %v4187_v55 = vsel %vm5617_vm7, %v4185_v6, %v4186_v59  ;;  %v2736_v31 = vrot.slane %v5429_v29, 5  ;;  %v3611_v39 = vor.u32 %v3610_v21, %v3607_v18  ;;  %v6571_v59 = vld [vmem:[%s5553_s6 + $0x6c] sm:$0xf] }
 0x195   : > { %5286 = vmatmul.msk.bf16.gmra.mxu3 %vm372_vm1, %v3882_v41  ;;  %5319 = vmatmul.msk.bf16.gmra.mxu0 %vm372_vm1, %v4296_v42  ;;  %v4271_v8 = vunpack.c.l.b16 %v4187_v55  ;;  %v3624_v41 = vshll.u32 %v5172_v22, 16  ;;  %v3622_v62 = vrot.slane %v3621_v40, 4  ;;  %v3629_v13 = vshrl.u32 %v6571_v59, 16 }
 0x196   : > { %2667 = vst [vmem:[%s5790_s22 + $0xb8] sm:$0xff] %v2635_v52  ;;  %v5125_v52 = vrot.slane %v5431_v51, 9  ;;  %v2738_v36 = vrot.slane %v2736_v31, 4  ;;  %v3612_v0 = vrot.slane %v3611_v39, 4  ;;  %v5372_v39 = vld [vmem:[%s5553_s6 + $0x60] sm:$0xff] }
 0x197   : > { %v1520_v45 = vpop.f32.mrf.mxu2  ;;  %v4297_v44 = vpack.c.b16 %v4271_v8, %v4270_v33  ;;  %v3626_v1 = vrot.slane %v3624_v41, 5 }
 0x198   : > { %v1596_v35 = vadd.f32 %v1520_v45, %v1179_v58  ;;  %v1890_v57 = vpop.f32.mrf.mxu3  ;;  %v4193_v58 = vrot.slane %v5172_v22, 5  ;;  %v6574_v45 = vld [vmem:[%s5553_s6 + $0x70] sm:$0xf]  ;;  %v2737_v11 = vsel %vm5617_vm7, %v5125_v52, %v2736_v31  ;;  %v3617_v23 = vsel %vm5611_vm6, %v3612_v0, %v6552_v16  ;;  %v1150_v22 = vld [vmem:[%s5790_s22 + $0xd8] sm:$0xff] }
 0x199   : > { %v1105_v10 = vpop.f32.mrf.mxu1  ;;  %v3638_v12 = vshll.u32 %v6574_v45, 16  ;;  %v2818_v18 = vunpack.c.l.b16 %v2737_v11  ;;  %v3858_v16 = vunpack.c.l.b16 %v3617_v23  ;;  %v6607_v0 = vld [vmem:[%s5553_s6 + $0x78] sm:$0xf] }
 0x19a   : > { %v1966_v61 = vadd.f32 %v1890_v57, %v1596_v35  ;;  %v2562_v14 = vpop.f32.mrf.mxu0  ;;  %v1180_v20 = vadd.f32 %v1148_v27, %v1105_v10  ;;  %v3627_v57 = vsel %vm5611_vm6, %v3622_v62, %v3626_v1  ;;  %v4191_v10 = vsel %vm5617_vm7, %v5304_v3, %v4190_v38  ;;  %v6610_v62 = vld [vmem:[%s5553_s6 + $0x7c] sm:$0xf]  ;;  %v1151_v1 = vld [vmem:[%s5790_s22 + $0xe0] sm:$0xff] }
 0x19b   : > { %v4194_v60 = vsel %vm5617_vm7, %v4192_v4, %v4193_v58  ;;  %v3859_v9 = vunpack.c.l.b16 %v3627_v57  ;;  %v4272_v26 = vunpack.c.l.b16 %v4191_v10  ;;  %v3631_v27 = vrot.slane %v3629_v13, 4 }
 0x19c   : > { %v2636_v19 = vadd.f32 %v2560_v43, %v1966_v61  ;;  %v5430_v43 = vld [vmem:[%s5553_s6 + $0x5c] sm:$0x1]  ;;  %v3632_v61 = vshll.u32 %v6571_v59, 16  ;;  %v6594_v32 = vrot.slane %v3638_v12, 5  ;;  %v3656_v23 = vshll.u32 %v6607_v0, 16 }
 0x19d   : > { %v2739_v47 = vrot.slane %v5430_v43, 5  ;;  %v3884_v41 = vpack.c.b16 %v3859_v9, %v3858_v16 }
 0x19e   : > { %2668 = vst [vmem:[%s5790_s22 + $0xc0] sm:$0xff] %v2636_v19  ;;  %v4273_v19 = vunpack.c.l.b16 %v4194_v60  ;;  %v3634_v30 = vrot.slane %v3632_v61, 5 }
 0x19f   : > { %v1522_v24 = vpop.f32.mrf.mxu2  ;;  %v2740_v49 = vsel %vm5617_vm7, %v2738_v36, %v2739_v47  ;;  %v4197_v47 = vrot.slane %v6574_v45, 5 }
 0x1a0   : > { %v1597_v42 = vadd.f32 %v1522_v24, %v1180_v20  ;;  %v1892_v46 = vpop.f32.mrf.mxu3  ;;  %v2819_v21 = vunpack.c.l.b16 %v2740_v49  ;;  %v5175_v20 = vld [vmem:[%s5553_s6 + $0x74] sm:$0x1]  ;;  %v3635_v38 = vor.u32 %v3634_v30, %v3631_v27  ;;  %v3653_v49 = vshrl.u32 %v6607_v0, 16  ;;  %v1152_v27 = vld [vmem:[%s5790_s22 + $0xe8] sm:$0xff] }
 0x1a1   : > { %v1108_v48 = vpop.f32.mrf.mxu1 }
 0x1a2   : > { %v1967_v28 = vadd.f32 %v1892_v46, %v1597_v42  ;;  %v2565_v54 = vpop.f32.mrf.mxu0  ;;  %v1181_v6 = vadd.f32 %v1149_v53, %v1108_v48  ;;  %v2844_v31 = vpack.c.b16 %v2819_v21, %v2818_v18  ;;  %v4298_v42 = vpack.c.b16 %v4273_v19, %v4272_v26 }
 0x1a3   : > { %v3636_v3 = vrot.slane %v3635_v38, 4  ;;  %v3655_v18 = vrot.slane %v3653_v49, 4  ;;  %v3658_v21 = vrot.slane %v3656_v23, 5  ;;  %v4204_v38 = vrot.slane %v6610_v62, 5 }
 0x1a4   : > { %5141 = vmatmul.msk.bf16.gmra.mxu1 %vm372_vm1, %v2843_v34  ;;  %5270 = vmatmul.msk.bf16.gmra.mxu2 %vm372_vm1, %v5371_v37  ;;  %v2637_v56 = vadd.f32 %v2562_v14, %v1967_v28  ;;  %v3642_v14 = vshrl.u32 %v6574_v45, 16  ;;  %v5432_v37 = vld [vmem:[%s5553_s6 + $0x64] sm:$0xf]  ;;  %v5433_v28 = vld [vmem:[%s5553_s6 + $0x68] sm:$0x1]  ;;  %v4199_v45 = vrot.slane %v4197_v47, 4 }
 0x1a5   : > { %5287 = vmatmul.msk.bf16.gmra.mxu3 %vm372_vm1, %v3883_v17  ;;  %5320 = vmatmul.msk.bf16.gmra.mxu0 %vm372_vm1, %v4297_v44  ;;  %v2743_v46 = vrot.slane %v5432_v37, 5  ;;  %v3648_v17 = vshll.u32 %v5175_v20, 16  ;;  %v2746_v51 = vrot.slane %v5433_v28, 5  ;;  %v3641_v13 = vsel %vm5611_vm6, %v3636_v3, %v6594_v32  ;;  %v5373_v37 = vld [vmem:[%s5553_s6 + $0x6c] sm:$0xff] }
 0x1a6   : > { %2669 = vst [vmem:[%s5790_s22 + $0xc8] sm:$0xff] %v2637_v56  ;;  %v3644_v33 = vrot.slane %v3642_v14, 4  ;;  %v3860_v30 = vunpack.c.l.b16 %v3641_v13 }
 0x1a7   : > { %v1525_v50 = vpop.f32.mrf.mxu2  ;;  %v2745_v56 = vrot.slane %v2743_v46, 4  ;;  %v3650_v58 = vrot.slane %v3648_v17, 5 }
 0x1a8   : > { %v1598_v63 = vadd.f32 %v1525_v50, %v1181_v6  ;;  %v1895_v35 = vpop.f32.mrf.mxu3  ;;  %v3645_v48 = vor.u32 %v3644_v33, %v6594_v32  ;;  %v5305_v6 = vrot.slane %v6571_v59, 9  ;;  %v4200_v50 = vrot.slane %v5175_v20, 5 }
 0x1a9   : > { %v1110_v5 = vpop.f32.mrf.mxu1  ;;  %v2747_v59 = vsel %vm5617_vm7, %v2745_v56, %v2746_v51 }
 0x1aa   : > { %v1968_v15 = vadd.f32 %v1895_v35, %v1598_v63  ;;  %v2567_v55 = vpop.f32.mrf.mxu0  ;;  %v1182_v8 = vadd.f32 %v1150_v22, %v1110_v5  ;;  %v3646_v4 = vrot.slane %v3645_v48, 4  ;;  %v3662_v63 = vshll.u32 %v6610_v62, 16  ;;  %v5178_v22 = vld [vmem:[%s5553_s6 + $0x80] sm:$0x1] }
 0x1ab   : > { %v3666_v35 = vshrl.u32 %v6610_v62, 16  ;;  %v2821_v26 = vunpack.c.l.b16 %v2747_v59 }
 0x1ac   : > { %v2638_v25 = vadd.f32 %v2565_v54, %v1968_v15  ;;  %v5434_v54 = vld [vmem:[%s5553_s6 + $0x60] sm:$0xf]  ;;  %v3651_v12 = vsel %vm5611_vm6, %v3646_v4, %v3650_v58  ;;  %v4198_v15 = vsel %vm5617_vm7, %v5305_v6, %v4197_v47  ;;  %v6634_v16 = vrot.slane %v3662_v63, 5  ;;  %v5436_v47 = vld [vmem:[%s5553_s6 + $0x6c] sm:$0xf]  ;;  %v1153_v6 = vld [vmem:[%s5790_s22 + $0xf0] sm:$0xff] }
 0x1ad   : > { %v5126_v36 = vrot.slane %v5434_v54, 9  ;;  %v3861_v32 = vunpack.c.l.b16 %v3651_v12  ;;  %v4274_v33 = vunpack.c.l.b16 %v4198_v15  ;;  %v5127_v28 = vrot.slane %v5436_v47, 9  ;;  %v5437_v54 = vld [vmem:[%s5553_s6 + $0x74] sm:$0x1] }
 0x1ae   : > { %2670 = vst [vmem:[%s5790_s22 + $0xd0] sm:$0xff] %v2638_v25  ;;  %v3668_v25 = vrot.slane %v3666_v35, 4  ;;  %v5306_v4 = vrot.slane %v6607_v0, 9  ;;  %v4206_v58 = vrot.slane %v4204_v38, 4 }
 0x1af   : > { %v1527_v24 = vpop.f32.mrf.mxu2  ;;  %v2744_v5 = vsel %vm5617_vm7, %v5126_v36, %v2743_v46  ;;  %v3885_v17 = vpack.c.b16 %v3861_v32, %v3860_v30  ;;  %v2753_v36 = vrot.slane %v5437_v54, 5 }
 0x1b0   : > { %v1599_v29 = vadd.f32 %v1527_v24, %v1182_v8  ;;  %v1897_v40 = vpop.f32.mrf.mxu3  ;;  %v2820_v9 = vunpack.c.l.b16 %v2744_v5  ;;  %v5435_v24 = vld [vmem:[%s5553_s6 + $0x70] sm:$0xf] }
 0x1b1   : > { %v1113_v34 = vpop.f32.mrf.mxu1 }
 0x1b2   : > { %v1969_v44 = vadd.f32 %v1897_v40, %v1599_v29  ;;  %v2570_v43 = vpop.f32.mrf.mxu0  ;;  %v1183_v53 = vadd.f32 %v1151_v1, %v1113_v34  ;;  %v2750_v29 = vrot.slane %v5435_v24, 5  ;;  %v3669_v40 = vor.u32 %v3668_v25, %v6634_v16 }
 0x1b3   : > { %v2845_v34 = vpack.c.b16 %v2821_v26, %v2820_v9 }
 0x1b4   : > { %5142 = vmatmul.msk.bf16.gmra.mxu1 %vm372_vm1, %v2844_v31  ;;  %5271 = vmatmul.msk.bf16.gmra.mxu2 %vm372_vm1, %v5372_v39  ;;  %v2639_v52 = vadd.f32 %v2567_v55, %v1969_v44  ;;  %v4201_v55 = vsel %vm5617_vm7, %v4199_v45, %v4200_v50  ;;  %v3659_v39 = vor.u32 %v3658_v21, %v3655_v18  ;;  %v2752_v51 = vrot.slane %v2750_v29, 4  ;;  %v6653_v50 = vld [vmem:[%s5553_s6 + $0x84] sm:$0xf] }
 0x1b5   : > { %5288 = vmatmul.msk.bf16.gmra.mxu3 %vm372_vm1, %v3884_v41  ;;  %5321 = vmatmul.msk.bf16.gmra.mxu0 %vm372_vm1, %v4298_v42  ;;  %v4275_v8 = vunpack.c.l.b16 %v4201_v55  ;;  %v3672_v41 = vshll.u32 %v5178_v22, 16  ;;  %v3670_v56 = vrot.slane %v3669_v40, 4  ;;  %v2751_v23 = vsel %vm5617_vm7, %v5127_v28, %v2750_v29 }
 0x1b6   : > { %2671 = vst [vmem:[%s5790_s22 + $0xd8] sm:$0xff] %v2639_v52  ;;  %v3660_v1 = vrot.slane %v3659_v39, 4  ;;  %v2754_v0 = vsel %vm5617_vm7, %v2752_v51, %v2753_v36  ;;  %v3677_v13 = vshrl.u32 %v6653_v50, 16  ;;  %v2822_v18 = vunpack.c.l.b16 %v2751_v23  ;;  %v5374_v39 = vld [vmem:[%s5553_s6 + $0x78] sm:$0xff]  ;;  %v6688_v36 = vld [vmem:[%s5553_s6 + $0x90] sm:$0xf] }
 0x1b7   : > { %v1530_v11 = vpop.f32.mrf.mxu2  ;;  %v4299_v44 = vpack.c.b16 %v4275_v8, %v4274_v33  ;;  %v3674_v3 = vrot.slane %v3672_v41, 5  ;;  %v2823_v21 = vunpack.c.l.b16 %v2754_v0  ;;  %v5439_v51 = vld [vmem:[%s5553_s6 + $0x78] sm:$0xf]  ;;  %v3701_v0 = vshrl.u32 %v6688_v36, 16 }
 0x1b8   : > { %v1600_v57 = vadd.f32 %v1530_v11, %v1183_v53  ;;  %v1900_v10 = vpop.f32.mrf.mxu3  ;;  %v4207_v53 = vrot.slane %v5178_v22, 5  ;;  %v6656_v11 = vld [vmem:[%s5553_s6 + $0x88] sm:$0xf]  ;;  %v3665_v63 = vsel %vm5611_vm6, %v3660_v1, %v6634_v16  ;;  %v1154_v22 = vld [vmem:[%s5790_s22 + $0xf8] sm:$0xff]  ;;  %v6691_v1 = vld [vmem:[%s5553_s6 + $0x94] sm:$0xf] }
 0x1b9   : > { %v1115_v60 = vpop.f32.mrf.mxu1  ;;  %v3686_v12 = vshll.u32 %v6656_v11, 16  ;;  %v3862_v16 = vunpack.c.l.b16 %v3665_v63  ;;  %v4211_v47 = vrot.slane %v6656_v11, 5  ;;  %v3704_v63 = vshll.u32 %v6688_v36, 16 }
 0x1ba   : > { %v1970_v61 = vadd.f32 %v1900_v10, %v1600_v57  ;;  %v2572_v14 = vpop.f32.mrf.mxu0  ;;  %v1184_v20 = vadd.f32 %v1152_v27, %v1115_v60  ;;  %v3675_v10 = vsel %vm5611_vm6, %v3670_v56, %v3674_v3  ;;  %v4205_v60 = vsel %vm5617_vm7, %v5306_v4, %v4204_v38  ;;  %v2994_v56 = vld [vmem:[%s5790_s22] sm:$0xff] }
 0x1bb   : > { %v4208_v5 = vsel %vm5617_vm7, %v4206_v58, %v4207_v53  ;;  %v3863_v9 = vunpack.c.l.b16 %v3675_v10  ;;  %v4276_v26 = vunpack.c.l.b16 %v4205_v60  ;;  %v3679_v27 = vrot.slane %v3677_v13, 4  ;;  %v5440_v3 = vld [vmem:[%s5553_s6 + $0x80] sm:$0x1] }
 0x1bc   : > { %v2640_v19 = vadd.f32 %v2570_v43, %v1970_v61  ;;  %v3680_v61 = vshll.u32 %v6653_v50, 16  ;;  %v6676_v32 = vrot.slane %v3686_v12, 5 }
 0x1bd   : > { %v3886_v41 = vpack.c.b16 %v3863_v9, %v3862_v16 }
 0x1be   : > { %2672 = vst [vmem:[%s5790_s22 + $0xe0] sm:$0xff] %v2640_v19  ;;  %v4277_v19 = vunpack.c.l.b16 %v4208_v5  ;;  %v3682_v30 = vrot.slane %v3680_v61, 5 }
 0x1bf   : > { %v1532_v31 = vpop.f32.mrf.mxu2 }
 0x1c0   : > { %v1601_v42 = vadd.f32 %v1532_v31, %v1184_v20  ;;  %v1902_v46 = vpop.f32.mrf.mxu3  ;;  %v5181_v20 = vld [vmem:[%s5553_s6 + $0x8c] sm:$0x1]  ;;  %v2846_v31 = vpack.c.b16 %v2823_v21, %v2822_v18  ;;  %v3703_v18 = vrot.slane %v3701_v0, 4  ;;  %v3706_v21 = vrot.slane %v3704_v63, 5 }
 0x1c1   : > { %v1118_v48 = vpop.f32.mrf.mxu1 }
 0x1c2   : > { %v1971_v43 = vadd.f32 %v1902_v46, %v1601_v42  ;;  %v2575_v52 = vpop.f32.mrf.mxu0  ;;  %v1185_v45 = vadd.f32 %v1153_v6, %v1118_v48  ;;  %v5438_v42 = vld [vmem:[%s5553_s6 + $0x7c] sm:$0xf]  ;;  %v3683_v46 = vor.u32 %v3682_v30, %v3679_v27  ;;  %v3696_v48 = vshll.u32 %v5181_v20, 16  ;;  %v2995_v27 = vld [vmem:[%s5790_s22 + $0x8] sm:$0xff] }
 0x1c4   : > { %5143 = vmatmul.msk.bf16.gmra.mxu1 %vm372_vm1, %v2845_v34  ;;  %5272 = vmatmul.msk.bf16.gmra.mxu2 %vm372_vm1, %v5373_v37  ;;  %v2641_v62 = vadd.f32 %v2572_v14, %v1971_v43  ;;  %v3690_v14 = vshrl.u32 %v6656_v11, 16  ;;  %v2757_v34 = vrot.slane %v5438_v42, 5  ;;  %v3684_v4 = vrot.slane %v3683_v46, 4 }
 0x1c5   : > { %5289 = vmatmul.msk.bf16.gmra.mxu3 %vm372_vm1, %v3885_v17  ;;  %5322 = vmatmul.msk.bf16.gmra.mxu0 %vm372_vm1, %v4299_v44  ;;  %v4300_v17 = vpack.c.b16 %v4277_v19, %v4276_v26  ;;  %v3698_v53 = vrot.slane %v3696_v48, 5  ;;  %v4213_v11 = vrot.slane %v4211_v47, 4 }
 0x1c6   : > { %2673 = vst [vmem:[%s5790_s22 + $0xe8] sm:$0xff] %v2641_v62  ;;  %v3692_v33 = vrot.slane %v3690_v14, 4  ;;  %v2759_v54 = vrot.slane %v2757_v34, 4  ;;  %v2760_v62 = vrot.slane %v5440_v3, 5  ;;  %v3689_v13 = vsel %vm5611_vm6, %v3684_v4, %v6676_v32 }
 0x1c7   : > { %v1535_v49 = vpop.f32.mrf.mxu2  ;;  %v3864_v30 = vunpack.c.l.b16 %v3689_v13 }
 0x1c8   : > { %v1602_v35 = vadd.f32 %v1535_v49, %v1185_v45  ;;  %v1905_v57 = vpop.f32.mrf.mxu3  ;;  %v3693_v38 = vor.u32 %v3692_v33, %v6676_v32  ;;  %v5307_v45 = vrot.slane %v6653_v50, 9  ;;  %v4214_v49 = vrot.slane %v5181_v20, 5 }
 0x1c9   : > { %v1120_v59 = vpop.f32.mrf.mxu1  ;;  %v2761_v50 = vsel %vm5617_vm7, %v2759_v54, %v2760_v62  ;;  %v5443_v54 = vld [vmem:[%s5553_s6 + $0x8c] sm:$0x1] }
 0x1ca   : > { %v1972_v15 = vadd.f32 %v1905_v57, %v1602_v35  ;;  %v2577_v55 = vpop.f32.mrf.mxu0  ;;  %v1186_v8 = vadd.f32 %v1154_v22, %v1120_v59  ;;  %v3694_v58 = vrot.slane %v3693_v38, 4  ;;  %v3710_v35 = vshll.u32 %v6691_v1, 16  ;;  %v6719_v22 = vld [vmem:[%s5553_s6 + $0x98] sm:$0x1] }
 0x1cb   : > { %v3714_v57 = vshrl.u32 %v6691_v1, 16  ;;  %v2825_v26 = vunpack.c.l.b16 %v2761_v50 }
 0x1cc   : > { %v2642_v25 = vadd.f32 %v2575_v52, %v1972_v15  ;;  %v5128_v52 = vrot.slane %v5439_v51, 9  ;;  %v3699_v12 = vsel %vm5611_vm6, %v3694_v58, %v3698_v53  ;;  %v4212_v15 = vsel %vm5617_vm7, %v5307_v45, %v4211_v47  ;;  %v5442_v47 = vld [vmem:[%s5553_s6 + $0x84] sm:$0xf]  ;;  %v2996_v53 = vld [vmem:[%s5790_s22 + $0x10] sm:$0xff] }
 0x1cd   : > { %v6716_v16 = vrot.slane %v3710_v35, 5  ;;  %v3865_v32 = vunpack.c.l.b16 %v3699_v12  ;;  %v4278_v33 = vunpack.c.l.b16 %v4212_v15  ;;  %v6742_v35 = vld [vmem:[%s5553_s6 + $0xa0] sm:$0xf] }
 0x1ce   : > { %2674 = vst [vmem:[%s5790_s22 + $0xf0] sm:$0xff] %v2642_v25  ;;  %v2758_v59 = vsel %vm5617_vm7, %v5128_v52, %v2757_v34  ;;  %v3716_v25 = vrot.slane %v3714_v57, 4  ;;  %v3734_v15 = vshll.u32 %v6742_v35, 16 }
 0x1cf   : > { %v1537_v24 = vpop.f32.mrf.mxu2  ;;  %v2824_v9 = vunpack.c.l.b16 %v2758_v59  ;;  %v3887_v48 = vpack.c.b16 %v3865_v32, %v3864_v30 }
 0x1d0   : > { %v1603_v29 = vadd.f32 %v1537_v24, %v1186_v8  ;;  %v1907_v40 = vpop.f32.mrf.mxu3  ;;  %v5441_v24 = vld [vmem:[%s5553_s6 + $0x88] sm:$0xf] }
 0x1d1   : > { %v2914_v37 = vpop.f32.mrf.mxu1  ;;  %v2847_v34 = vpack.c.b16 %v2825_v26, %v2824_v9 }
 0x1d2   : > { %v1973_v44 = vadd.f32 %v1907_v40, %v1603_v29  ;;  %v4368_v43 = vpop.f32.mrf.mxu0  ;;  %v3026_v6 = vadd.f32 %v2994_v56, %v2914_v37  ;;  %v2764_v29 = vrot.slane %v5441_v24, 5  ;;  %v3717_v40 = vor.u32 %v3716_v25, %v6716_v16  ;;  %v5375_v37 = vld [vmem:[%s5553_s6 + $0x84] sm:$0xff] }
 0x1d3   : > { %v2767_v56 = vrot.slane %v5443_v54, 5 }
 0x1d4   : > { %5144 = vmatmul.msk.bf16.gmra.mxu1 %vm372_vm1, %v2846_v31  ;;  %5273 = vmatmul.msk.bf16.gmra.mxu2 %vm372_vm1, %v5374_v39  ;;  %v2643_v28 = vadd.f32 %v2577_v55, %v1973_v44  ;;  %v4215_v55 = vsel %vm5617_vm7, %v4213_v11, %v4214_v49  ;;  %v3707_v39 = vor.u32 %v3706_v21, %v3703_v18  ;;  %v4218_v44 = vrot.slane %v6691_v1, 5  ;;  %v6736_v1 = vld [vmem:[%s5553_s6 + $0x9c] sm:$0xf] }
 0x1d5   : > { %5290 = vmatmul.msk.bf16.gmra.mxu3 %vm372_vm1, %v3886_v41  ;;  %5323 = vmatmul.msk.bf16.gmra.mxu0 %vm372_vm1, %v4300_v17  ;;  %v4279_v8 = vunpack.c.l.b16 %v4215_v55  ;;  %v3720_v41 = vshll.u32 %v6719_v22, 16  ;;  %v2766_v51 = vrot.slane %v2764_v29, 4  ;;  %v3718_v62 = vrot.slane %v3717_v40, 4 }
 0x1d6   : > { %2675 = vst [vmem:[%s5790_s22 + $0xf8] sm:$0xff] %v2643_v28  ;;  %v5129_v28 = vrot.slane %v5442_v47, 9  ;;  %v3708_v3 = vrot.slane %v3707_v39, 4  ;;  %v4220_v45 = vrot.slane %v4218_v44, 4  ;;  %v4221_v11 = vrot.slane %v6719_v22, 5 }
 0x1d7   : > { %v3284_v23 = vpop.f32.mrf.mxu2  ;;  %v4301_v17 = vpack.c.b16 %v4279_v8, %v4278_v33  ;;  %v3722_v4 = vrot.slane %v3720_v41, 5  ;;  %v3728_v12 = vshll.u32 %v6736_v1, 16  ;;  %v3738_v55 = vshrl.u32 %v6742_v35, 16  ;;  %v2997_v33 = vld [vmem:[%s5790_s22 + $0x18] sm:$0xff]  ;;  %v5187_v41 = vld [vmem:[%s5553_s6 + $0xa4] sm:$0x1] }
 0x1d8   : > { %v3396_v10 = vadd.f32 %v3284_v23, %v3026_v6  ;;  %v3954_v60 = vpop.f32.mrf.mxu3  ;;  %v5308_v6 = vrot.slane %v6688_v36, 9  ;;  %v3713_v36 = vsel %vm5611_vm6, %v3708_v3, %v6716_v16  ;;  %v4222_v25 = vsel %vm5617_vm7, %v4220_v45, %v4221_v11  ;;  %v5446_v45 = vld [vmem:[%s5553_s6 + $0x98] sm:$0x1] }
 0x1d9   : > { %v2916_v5 = vpop.f32.mrf.mxu1  ;;  %v3730_v32 = vrot.slane %v3728_v12, 5  ;;  %v6762_v8 = vrot.slane %v3734_v15, 5  ;;  %v2774_v11 = vrot.slane %v5446_v45, 5 }
 0x1da   : > { %v4066_v61 = vadd.f32 %v3954_v60, %v3396_v10  ;;  %v4370_v14 = vpop.f32.mrf.mxu0  ;;  %v3027_v20 = vadd.f32 %v2995_v27, %v2916_v5  ;;  %v2765_v10 = vsel %vm5617_vm7, %v5129_v28, %v2764_v29  ;;  %v2768_v60 = vsel %vm5617_vm7, %v2766_v51, %v2767_v56 }
 0x1db   : > { %v3723_v5 = vsel %vm5611_vm6, %v3718_v62, %v3722_v4  ;;  %v4219_v16 = vsel %vm5617_vm7, %v5308_v6, %v4218_v44  ;;  %v2826_v9 = vunpack.c.l.b16 %v2765_v10  ;;  %v2827_v26 = vunpack.c.l.b16 %v2768_v60  ;;  %v5444_v44 = vld [vmem:[%s5553_s6 + $0x94] sm:$0xf]  ;;  %v5445_v4 = vld [vmem:[%s5553_s6 + $0x90] sm:$0xf] }
 0x1dc   : > { %v4480_v19 = vadd.f32 %v4368_v43, %v4066_v61  ;;  %v3725_v61 = vshrl.u32 %v6736_v1, 16  ;;  %v3867_v22 = vunpack.c.l.b16 %v3723_v5  ;;  %v4280_v24 = vunpack.c.l.b16 %v4219_v16 }
 0x1dd   : > { %v4281_v29 = vunpack.c.l.b16 %v4222_v25  ;;  %v4225_v56 = vrot.slane %v6742_v35, 5 }
 0x1de   : > { %4512 = vst [vmem:[%s5790_s22] sm:$0xff] %v4480_v19  ;;  %v4623_v23 = vmul.f32 %v4480_v19, %v4480_v19  ;;  %v3727_v30 = vrot.slane %v3725_v61, 4 }
 0x1df   : > { %v3286_v31 = vpop.f32.mrf.mxu2  ;;  %v4302_v54 = vpack.c.b16 %v4281_v29, %v4280_v24  ;;  %v4227_v10 = vrot.slane %v4225_v56, 4 }
 0x1e0   : > { %v3397_v42 = vadd.f32 %v3286_v31, %v3027_v20  ;;  %v3956_v46 = vpop.f32.mrf.mxu3  ;;  %v3740_v20 = vrot.slane %v3738_v55, 4  ;;  %v3731_v47 = vor.u32 %v3730_v32, %v3727_v30 }
 0x1e1   : > { %v2919_v38 = vpop.f32.mrf.mxu1 }
 0x1e2   : > { %v4067_v43 = vadd.f32 %v3956_v46, %v3397_v42  ;;  %v4373_v52 = vpop.f32.mrf.mxu0  ;;  %v3028_v49 = vadd.f32 %v2996_v53, %v2919_v38  ;;  %v5376_v38 = vld [vmem:[%s5553_s6 + $0x90] sm:$0xff]  ;;  %v3741_v51 = vor.u32 %v3740_v20, %v6762_v8 }
 0x1e4   : > { %5145 = vmatmul.msk.bf16.gmra.mxu1 %vm372_vm1, %v2847_v34  ;;  %5274 = vmatmul.msk.bf16.gmra.mxu2 %vm372_vm1, %v5375_v37  ;;  %v4481_v58 = vadd.f32 %v4370_v14, %v4067_v43  ;;  %v2848_v34 = vpack.c.b16 %v2827_v26, %v2826_v9  ;;  %v2771_v43 = vrot.slane %v5444_v44, 5  ;;  %v5447_v44 = vld [vmem:[%s5553_s6 + $0xa0] sm:$0xf] }
 0x1e5   : > { %5291 = vmatmul.msk.bf16.gmra.mxu3 %vm372_vm1, %v3887_v48  ;;  %5324 = vmatmul.msk.bf16.gmra.mxu0 %vm372_vm1, %v4301_v17 }
 0x1e6   : > { %4513 = vst [vmem:[%s5790_s22 + $0x8] sm:$0xff] %v4481_v58  ;;  %v4583_v0 = vadd.f32 %v4481_v58, %v4480_v19  ;;  %v4624_v63 = vmul.f32 %v4481_v58, %v4481_v58  ;;  %v3866_v19 = vunpack.c.l.b16 %v3713_v36  ;;  %v5130_v58 = vrot.slane %v5445_v4, 9 }
 0x1e7   : > { %v3289_v57 = vpop.f32.mrf.mxu2  ;;  %v2773_v6 = vrot.slane %v2771_v43, 4 }
 0x1e8   : > { %v3398_v59 = vadd.f32 %v3289_v57, %v3028_v49  ;;  %v3959_v50 = vpop.f32.mrf.mxu3  ;;  %v4655_v13 = vadd.f32 %v4624_v63, %v4623_v23  ;;  %v3888_v37 = vpack.c.b16 %v3867_v22, %v3866_v19  ;;  %v3732_v49 = vrot.slane %v3731_v47, 4  ;;  %v6775_v23 = vld [vmem:[%s5553_s6 + $0xa8] sm:$0xf] }
 0x1e9   : > { %v2921_v14 = vpop.f32.mrf.mxu1  ;;  %v3742_v63 = vrot.slane %v3741_v51, 4  ;;  %v5309_v57 = vrot.slane %v6736_v1, 9  ;;  %v3749_v61 = vshrl.u32 %v6775_v23, 16  ;;  %v3752_v12 = vshll.u32 %v6775_v23, 16 }
 0x1ea   : > { %v4068_v18 = vadd.f32 %v3959_v50, %v3398_v59  ;;  %v4375_v21 = vpop.f32.mrf.mxu0  ;;  %v3029_v31 = vadd.f32 %v2997_v33, %v2921_v14  ;;  %v6783_v59 = vld [vmem:[%s5553_s6 + $0xac] sm:$0xf]  ;;  %v4228_v50 = vrot.slane %v5187_v41, 5  ;;  %v2775_v1 = vsel %vm5617_vm7, %v2773_v6, %v2774_v11 }
 0x1eb   : > { %v3737_v16 = vsel %vm5611_vm6, %v3732_v49, %v6762_v8  ;;  %v3758_v9 = vshll.u32 %v6783_v59, 16  ;;  %v3762_v26 = vshrl.u32 %v6783_v59, 16  ;;  %v3751_v33 = vrot.slane %v3749_v61, 4  ;;  %v5448_v49 = vld [vmem:[%s5553_s6 + $0x9c] sm:$0xf] }
 0x1ec   : > { %v4482_v27 = vadd.f32 %v4373_v52, %v4068_v18  ;;  %v3744_v52 = vshll.u32 %v5187_v41, 16  ;;  %v2772_v18 = vsel %vm5617_vm7, %v5130_v58, %v2771_v43  ;;  %v4229_v30 = vsel %vm5617_vm7, %v4227_v10, %v4228_v50 }
 0x1ed   : > { %v2828_v32 = vunpack.c.l.b16 %v2772_v18  ;;  %v3754_v8 = vrot.slane %v3752_v12, 5  ;;  %v2829_v20 = vunpack.c.l.b16 %v2775_v1  ;;  %v3868_v29 = vunpack.c.l.b16 %v3737_v16 }
 0x1ee   : > { %4514 = vst [vmem:[%s5790_s22 + $0x10] sm:$0xff] %v4482_v27  ;;  %v4584_v39 = vadd.f32 %v4583_v0, %v4482_v27  ;;  %v4625_v40 = vmul.f32 %v4482_v27, %v4482_v27  ;;  %v2998_v0 = vld [vmem:[%s5790_s22 + $0x20] sm:$0xff]  ;;  %v3746_v35 = vrot.slane %v3744_v52, 5  ;;  %v4226_v27 = vsel %vm5617_vm7, %v5309_v57, %v4225_v56 }
 0x1ef   : > { %v3291_v42 = vpop.f32.mrf.mxu2  ;;  %v3764_v41 = vrot.slane %v3762_v26, 4  ;;  %v2778_v43 = vrot.slane %v5447_v44, 5  ;;  %v3755_v47 = vor.u32 %v3754_v8, %v3751_v33  ;;  %v2849_v51 = vpack.c.b16 %v2829_v20, %v2828_v32  ;;  %v5377_v52 = vld [vmem:[%s5553_s6 + $0x9c] sm:$0xff] }
 0x1f0   : > { %v3399_v46 = vadd.f32 %v3291_v42, %v3029_v31  ;;  %v3961_v48 = vpop.f32.mrf.mxu3  ;;  %v4656_v17 = vadd.f32 %v4655_v13, %v4625_v40  ;;  %v3747_v25 = vsel %vm5611_vm6, %v3742_v63, %v3746_v35  ;;  %v6803_v40 = vrot.slane %v3758_v9, 5  ;;  %v5449_v35 = vld [vmem:[%s5553_s6 + $0xa4] sm:$0x1] }
 0x1f1   : > { %v2924_v28 = vpop.f32.mrf.mxu1  ;;  %v3869_v31 = vunpack.c.l.b16 %v3747_v25  ;;  %v4282_v42 = vunpack.c.l.b16 %v4226_v27  ;;  %v4232_v11 = vrot.slane %v6783_v59, 5  ;;  %v2780_v63 = vrot.slane %v2778_v43, 4  ;;  %v6819_v59 = vld [vmem:[%s5553_s6 + $0xb4] sm:$0xf] }
 0x1f2   : > { %v4069_v3 = vadd.f32 %v3961_v48, %v3399_v46  ;;  %v4378_v62 = vpop.f32.mrf.mxu0  ;;  %v3030_v60 = vadd.f32 %v2998_v0, %v2924_v28  ;;  %v5190_v48 = vld [vmem:[%s5553_s6 + $0xb0] sm:$0x1]  ;;  %v3765_v4 = vor.u32 %v3764_v41, %v6803_v40  ;;  %v5131_v0 = vrot.slane %v5448_v49, 9 }
 0x1f3   : > { %v3768_v58 = vshll.u32 %v5190_v48, 16  ;;  %v2781_v57 = vrot.slane %v5449_v35, 5  ;;  %v3756_v10 = vrot.slane %v3755_v47, 4  ;;  %v4235_v61 = vrot.slane %v5190_v48, 5 }
 0x1f4   : > { %5146 = vmatmul.msk.bf16.gmra.mxu1 %vm372_vm1, %v2848_v34  ;;  %5275 = vmatmul.msk.bf16.gmra.mxu2 %vm372_vm1, %v5376_v38  ;;  %v4483_v53 = vadd.f32 %v4375_v21, %v4069_v3  ;;  %v4283_v34 = vunpack.c.l.b16 %v4229_v30  ;;  %v4234_v18 = vrot.slane %v4232_v11, 4 }
 0x1f5   : > { %5292 = vmatmul.msk.bf16.gmra.mxu3 %vm372_vm1, %v3888_v37  ;;  %5325 = vmatmul.msk.bf16.gmra.mxu0 %vm372_vm1, %v4302_v54  ;;  %v3770_v50 = vrot.slane %v3768_v58, 5  ;;  %v2782_v16 = vsel %vm5617_vm7, %v2780_v63, %v2781_v57  ;;  %v3761_v25 = vsel %vm5611_vm6, %v3756_v10, %v6803_v40  ;;  %v5450_v58 = vld [vmem:[%s5553_s6 + $0xac] sm:$0xf] }
 0x1f6   : > { %4515 = vst [vmem:[%s5790_s22 + $0x18] sm:$0xff] %v4483_v53  ;;  %v4585_v36 = vadd.f32 %v4584_v39, %v4483_v53  ;;  %v4626_v5 = vmul.f32 %v4483_v53, %v4483_v53  ;;  %v2999_v39 = vld [vmem:[%s5790_s22 + $0x28] sm:$0xff]  ;;  %v4303_v53 = vpack.c.b16 %v4283_v34, %v4282_v42  ;;  %v3870_v40 = vunpack.c.l.b16 %v3761_v25 }
 0x1f7   : > { %v3294_v13 = vpop.f32.mrf.mxu2 }
 0x1f8   : > { %v3400_v14 = vadd.f32 %v3294_v13, %v3030_v60  ;;  %v3964_v15 = vpop.f32.mrf.mxu3  ;;  %v4657_v55 = vadd.f32 %v4656_v17, %v4626_v5  ;;  %v3000_v60 = vld [vmem:[%s5790_s22 + $0x30] sm:$0xff]  ;;  %v3766_v5 = vrot.slane %v3765_v4, 4  ;;  %v5310_v13 = vrot.slane %v6775_v23, 9 }
 0x1f9   : > { %v2926_v21 = vpop.f32.mrf.mxu1 }
 0x1fa   : > { %v4070_v19 = vadd.f32 %v3964_v15, %v3400_v14  ;;  %v4380_v22 = vpop.f32.mrf.mxu0  ;;  %v3031_v37 = vadd.f32 %v2999_v39, %v2926_v21  ;;  %v2779_v21 = vsel %vm5617_vm7, %v5131_v0, %v2778_v43  ;;  %v3771_v30 = vsel %vm5611_vm6, %v3766_v5, %v3770_v50 }
 0x1fb   : > { %v2831_v39 = vunpack.c.l.b16 %v2782_v16  ;;  %v3871_v42 = vunpack.c.l.b16 %v3771_v30 }
 0x1fc   : > { %v4484_v24 = vadd.f32 %v4378_v62, %v4070_v19  ;;  %v3889_v62 = vpack.c.b16 %v3869_v31, %v3868_v29  ;;  %v3773_v19 = vshrl.u32 %v6819_v59, 16  ;;  %v4236_v29 = vsel %vm5617_vm7, %v4234_v18, %v4235_v61 }
 0x1fd   : > { %v2830_v31 = vunpack.c.l.b16 %v2779_v21  ;;  %v4285_v44 = vunpack.c.l.b16 %v4236_v29 }
 0x1fe   : > { %4516 = vst [vmem:[%s5790_s22 + $0x20] sm:$0xff] %v4484_v24  ;;  %v4586_v46 = vadd.f32 %v4585_v36, %v4484_v24  ;;  %v4627_v38 = vmul.f32 %v4484_v24, %v4484_v24  ;;  %v4233_v24 = vsel %vm5617_vm7, %v5310_v13, %v4232_v11  ;;  %v3775_v34 = vrot.slane %v3773_v19, 4  ;;  %v5452_v13 = vld [vmem:[%s5553_s6 + $0xb0] sm:$0x1] }
 0x1ff   : > { %v3296_v17 = vpop.f32.mrf.mxu2  ;;  %v3890_v11 = vpack.c.b16 %v3871_v42, %v3870_v40  ;;  %v2788_v61 = vrot.slane %v5452_v13, 5 }
 0x200   : > { %v3401_v28 = vadd.f32 %v3296_v17, %v3031_v37  ;;  %v3966_v54 = vpop.f32.mrf.mxu3  ;;  %v4658_v56 = vadd.f32 %v4657_v55, %v4627_v38  ;;  %v6824_v55 = vld [vmem:[%s5553_s6 + $0xb8] sm:$0xf]  ;;  %v4284_v17 = vunpack.c.l.b16 %v4233_v24 }
 0x201   : > { %v2929_v3 = vpop.f32.mrf.mxu1  ;;  %v3782_v32 = vshll.u32 %v6824_v55, 16  ;;  %v3786_v33 = vshrl.u32 %v6824_v55, 16  ;;  %v4239_v10 = vrot.slane %v6824_v55, 5 }
 0x202   : > { %v4071_v6 = vadd.f32 %v3966_v54, %v3401_v28  ;;  %v4383_v45 = vpop.f32.mrf.mxu0  ;;  %v3032_v12 = vadd.f32 %v3000_v60, %v2929_v3  ;;  %v2850_v54 = vpack.c.b16 %v2831_v39, %v2830_v31  ;;  %v5378_v3 = vld [vmem:[%s5553_s6 + $0xa8] sm:$0xff]  ;;  %v4304_v63 = vpack.c.b16 %v4285_v44, %v4284_v17 }
 0x203   : > { %v6844_v38 = vrot.slane %v3782_v32, 5  ;;  %v3788_v48 = vrot.slane %v3786_v33, 4  ;;  %v5451_v60 = vld [vmem:[%s5553_s6 + $0xa8] sm:$0xf] }
 0x204   : > { %5147 = vmatmul.msk.bf16.gmra.mxu1 %vm372_vm1, %v2849_v51  ;;  %5276 = vmatmul.msk.bf16.gmra.mxu2 %vm372_vm1, %v5377_v52  ;;  %v4485_v36 = vadd.f32 %v4380_v22, %v4071_v6  ;;  %v3776_v22 = vshll.u32 %v6819_v59, 16  ;;  %v5193_v51 = vld [vmem:[%s5553_s6 + $0xbc] sm:$0x1] }
 0x205   : > { %5293 = vmatmul.msk.bf16.gmra.mxu3 %vm372_vm1, %v3889_v62  ;;  %5326 = vmatmul.msk.bf16.gmra.mxu0 %vm372_vm1, %v4303_v53  ;;  %v2785_v53 = vrot.slane %v5450_v58, 5  ;;  %v3789_v49 = vor.u32 %v3788_v48, %v6844_v38  ;;  %v3792_v0 = vshll.u32 %v5193_v51, 16  ;;  %v4242_v21 = vrot.slane %v5193_v51, 5 }
 0x206   : > { %4517 = vst [vmem:[%s5790_s22 + $0x28] sm:$0xff] %v4485_v36  ;;  %v4587_v14 = vadd.f32 %v4586_v46, %v4485_v36  ;;  %v4628_v15 = vmul.f32 %v4485_v36, %v4485_v36  ;;  %v3778_v37 = vrot.slane %v3776_v22, 5  ;;  %v3001_v46 = vld [vmem:[%s5790_s22 + $0x38] sm:$0xff]  ;;  %v5132_v36 = vrot.slane %v5451_v60, 9 }
 0x207   : > { %v3299_v1 = vpop.f32.mrf.mxu2  ;;  %v2787_v50 = vrot.slane %v2785_v53, 4  ;;  %v3790_v18 = vrot.slane %v3789_v49, 4  ;;  %v3794_v55 = vrot.slane %v3792_v0, 5  ;;  %v5379_v0 = vld [vmem:[%s5553_s6 + $0xb4] sm:$0xff] }
 0x208   : > { %v3402_v23 = vadd.f32 %v3299_v1, %v3032_v12  ;;  %v3969_v9 = vpop.f32.mrf.mxu3  ;;  %v4659_v26 = vadd.f32 %v4658_v56, %v4628_v15  ;;  %v3779_v6 = vor.u32 %v3778_v37, %v3775_v34  ;;  %v3002_v15 = vld [vmem:[%s5790_s22 + $0x40] sm:$0xff]  ;;  %v5311_v1 = vrot.slane %v6819_v59, 9 }
 0x209   : > { %v2931_v27 = vpop.f32.mrf.mxu1  ;;  %v2789_v59 = vsel %vm5617_vm7, %v2787_v50, %v2788_v61  ;;  %v3795_v29 = vsel %vm5611_vm6, %v3790_v18, %v3794_v55  ;;  %v5455_v55 = vld [vmem:[%s5553_s6 + $0xbc] sm:$0x1] }
 0x20a   : > { %v4072_v8 = vadd.f32 %v3969_v9, %v3402_v23  ;;  %v4385_v20 = vpop.f32.mrf.mxu0  ;;  %v3033_v43 = vadd.f32 %v3001_v46, %v2931_v27  ;;  %v3780_v12 = vrot.slane %v3779_v6, 4  ;;  %v6865_v9 = vld [vmem:[%s5553_s6 + $0xc4] sm:$0xf]  ;;  %v4240_v42 = vsel %vm5617_vm7, %v5311_v1, %v4239_v10 }
 0x20b   : > { %v3806_v31 = vshll.u32 %v6865_v9, 16  ;;  %v3810_v39 = vshrl.u32 %v6865_v9, 16  ;;  %v2833_v48 = vunpack.c.l.b16 %v2789_v59  ;;  %v4246_v61 = vrot.slane %v6865_v9, 5  ;;  %v6901_v9 = vld [vmem:[%s5553_s6 + $0xcc] sm:$0xf] }
 0x20c   : > { %v4486_v41 = vadd.f32 %v4383_v45, %v4072_v8  ;;  %v2786_v8 = vsel %vm5617_vm7, %v5132_v36, %v2785_v53  ;;  %v3785_v24 = vsel %vm5611_vm6, %v3780_v12, %v6844_v38  ;;  %v5453_v53 = vld [vmem:[%s5553_s6 + $0xb8] sm:$0xf]  ;;  %v5454_v12 = vld [vmem:[%s5553_s6 + $0xb4] sm:$0xf]  ;;  %v2795_v1 = vrot.slane %v5455_v55, 5 }
 0x20d   : > { %v2832_v37 = vunpack.c.l.b16 %v2786_v8  ;;  %v3872_v44 = vunpack.c.l.b16 %v3785_v24  ;;  %v3812_v51 = vrot.slane %v3810_v39, 4  ;;  %v2792_v6 = vrot.slane %v5453_v53, 5 }
 0x20e   : > { %4518 = vst [vmem:[%s5790_s22 + $0x30] sm:$0xff] %v4486_v41  ;;  %v4588_v47 = vadd.f32 %v4587_v14, %v4486_v41  ;;  %v4629_v28 = vmul.f32 %v4486_v41, %v4486_v41  ;;  %v6857_v14 = vld [vmem:[%s5553_s6 + $0xc0] sm:$0xf]  ;;  %v4248_v8 = vrot.slane %v4246_v61, 4 }
 0x20f   : > { %v3301_v52 = vpop.f32.mrf.mxu2  ;;  %v3797_v22 = vshrl.u32 %v6857_v14, 16  ;;  %v3800_v27 = vshll.u32 %v6857_v14, 16  ;;  %v2851_v49 = vpack.c.b16 %v2833_v48, %v2832_v37  ;;  %v2794_v18 = vrot.slane %v2792_v6, 4 }
 0x210   : > { %v3403_v56 = vadd.f32 %v3301_v52, %v3033_v43  ;;  %v3971_v62 = vpop.f32.mrf.mxu3  ;;  %v4660_v4 = vadd.f32 %v4659_v26, %v4629_v28  ;;  %v4241_v26 = vrot.slane %v4239_v10, 4  ;;  %v3873_v43 = vunpack.c.l.b16 %v3795_v29 }
 0x211   : > { %v2934_v45 = vpop.f32.mrf.mxu1  ;;  %v3799_v46 = vrot.slane %v3797_v22, 4  ;;  %v3802_v38 = vrot.slane %v3800_v27, 5  ;;  %v6885_v28 = vrot.slane %v3806_v31, 5  ;;  %v4286_v52 = vunpack.c.l.b16 %v4240_v42 }
 0x212   : > { %v4073_v35 = vadd.f32 %v3971_v62, %v3403_v56  ;;  %v4388_v57 = vpop.f32.mrf.mxu0  ;;  %v3034_v16 = vadd.f32 %v3002_v15, %v2934_v45  ;;  %v4243_v34 = vsel %vm5617_vm7, %v4241_v26, %v4242_v21  ;;  %v3891_v10 = vpack.c.b16 %v3873_v43, %v3872_v44 }
 0x213   : > { %v3803_v45 = vor.u32 %v3802_v38, %v3799_v46  ;;  %v3813_v60 = vor.u32 %v3812_v51, %v6885_v28  ;;  %v5133_v15 = vrot.slane %v5454_v12, 9  ;;  %v2796_v24 = vsel %vm5617_vm7, %v2794_v18, %v2795_v1 }
 0x214   : > { %5148 = vmatmul.msk.bf16.gmra.mxu1 %vm372_vm1, %v2850_v54  ;;  %5277 = vmatmul.msk.bf16.gmra.mxu2 %vm372_vm1, %v5378_v3  ;;  %v4487_v5 = vadd.f32 %v4385_v20, %v4073_v35  ;;  %v4287_v54 = vunpack.c.l.b16 %v4243_v34 }
 0x215   : > { %5294 = vmatmul.msk.bf16.gmra.mxu3 %vm372_vm1, %v3890_v11  ;;  %5327 = vmatmul.msk.bf16.gmra.mxu0 %vm372_vm1, %v4304_v63  ;;  %v3804_v21 = vrot.slane %v3803_v45, 4 }
 0x216   : > { %4519 = vst [vmem:[%s5790_s22 + $0x38] sm:$0xff] %v4487_v5  ;;  %v4589_v25 = vadd.f32 %v4588_v47, %v4487_v5  ;;  %v4630_v23 = vmul.f32 %v4487_v5, %v4487_v5  ;;  %v3003_v47 = vld [vmem:[%s5790_s22 + $0x48] sm:$0xff]  ;;  %v4305_v5 = vpack.c.b16 %v4287_v54, %v4286_v52 }
 0x217   : > { %v3304_v19 = vpop.f32.mrf.mxu2  ;;  %v3809_v29 = vsel %vm5611_vm6, %v3804_v21, %v6885_v28 }
 0x218   : > { %v3404_v30 = vadd.f32 %v3304_v19, %v3034_v16  ;;  %v3974_v32 = vpop.f32.mrf.mxu3  ;;  %v4661_v33 = vadd.f32 %v4660_v4, %v4630_v23  ;;  %v5196_v4 = vld [vmem:[%s5553_s6 + $0xc8] sm:$0x1]  ;;  %v3004_v16 = vld [vmem:[%s5790_s22 + $0x50] sm:$0xff]  ;;  %v3814_v23 = vrot.slane %v3813_v60, 4  ;;  %v5312_v19 = vrot.slane %v6857_v14, 9 }
 0x219   : > { %v2936_v20 = vpop.f32.mrf.mxu1  ;;  %v3816_v36 = vshll.u32 %v5196_v4, 16  ;;  %v4249_v22 = vrot.slane %v5196_v4, 5  ;;  %v3874_v28 = vunpack.c.l.b16 %v3809_v29 }
 0x21a   : > { %v4074_v40 = vadd.f32 %v3974_v32, %v3404_v30  ;;  %v4390_v41 = vpop.f32.mrf.mxu0  ;;  %v3035_v56 = vadd.f32 %v3003_v47, %v2936_v20  ;;  %v2793_v20 = vsel %vm5617_vm7, %v5133_v15, %v2792_v6  ;;  %v2835_v47 = vunpack.c.l.b16 %v2796_v24 }
 0x21b   : > { %v3818_v26 = vrot.slane %v3816_v36, 5  ;;  %v4250_v44 = vsel %vm5617_vm7, %v4248_v8, %v4249_v22  ;;  %v2834_v43 = vunpack.c.l.b16 %v2793_v20  ;;  %v5456_v36 = vld [vmem:[%s5553_s6 + $0xc4] sm:$0xf] }
 0x21c   : > { %v4488_v17 = vadd.f32 %v4388_v57, %v4074_v40  ;;  %v3821_v40 = vshrl.u32 %v6901_v9, 16  ;;  %v4289_v53 = vunpack.c.l.b16 %v4250_v44 }
 0x21d   : > { %v3819_v34 = vsel %vm5611_vm6, %v3814_v23, %v3818_v26 }
 0x21e   : > { %4520 = vst [vmem:[%s5790_s22 + $0x40] sm:$0xff] %v4488_v17  ;;  %v4590_v3 = vadd.f32 %v4589_v25, %v4488_v17  ;;  %v4631_v62 = vmul.f32 %v4488_v17, %v4488_v17  ;;  %v4247_v17 = vsel %vm5617_vm7, %v5312_v19, %v4246_v61  ;;  %v3875_v52 = vunpack.c.l.b16 %v3819_v34  ;;  %v5458_v19 = vld [vmem:[%s5553_s6 + $0xc8] sm:$0x1] }
 0x21f   : > { %v3306_v58 = vpop.f32.mrf.mxu2  ;;  %v3823_v54 = vrot.slane %v3821_v40, 4  ;;  %v2802_v22 = vrot.slane %v5458_v19, 5 }
 0x220   : > { %v3405_v11 = vadd.f32 %v3306_v58, %v3035_v56  ;;  %v3976_v63 = vpop.f32.mrf.mxu3  ;;  %v4662_v35 = vadd.f32 %v4661_v33, %v4631_v62  ;;  %v6906_v33 = vld [vmem:[%s5553_s6 + $0xd0] sm:$0xf]  ;;  %v4288_v58 = vunpack.c.l.b16 %v4247_v17  ;;  %v3892_v61 = vpack.c.b16 %v3875_v52, %v3874_v28 }
 0x221   : > { %v2939_v57 = vpop.f32.mrf.mxu1  ;;  %v3830_v37 = vshll.u32 %v6906_v33, 16  ;;  %v3834_v46 = vshrl.u32 %v6906_v33, 16  ;;  %v4253_v21 = vrot.slane %v6906_v33, 5  ;;  %v5313_v33 = vrot.slane %v6901_v9, 9 }
 0x222   : > { %v4075_v50 = vadd.f32 %v3976_v63, %v3405_v11  ;;  %v4393_v13 = vpop.f32.mrf.mxu0  ;;  %v3036_v27 = vadd.f32 %v3004_v16, %v2939_v57  ;;  %v2852_v63 = vpack.c.b16 %v2835_v47, %v2834_v43  ;;  %v5380_v57 = vld [vmem:[%s5553_s6 + $0xc0] sm:$0xff]  ;;  %v4306_v18 = vpack.c.b16 %v4289_v53, %v4288_v58 }
 0x223   : > { %v6926_v62 = vrot.slane %v3830_v37, 5  ;;  %v3836_v4 = vrot.slane %v3834_v46, 4  ;;  %v5457_v16 = vld [vmem:[%s5553_s6 + $0xc0] sm:$0xf]  ;;  %v4254_v17 = vsel %vm5617_vm7, %v5313_v33, %v4253_v21 }
 0x224   : > { %5149 = vmatmul.msk.bf16.gmra.mxu1 %vm372_vm1, %v2851_v49  ;;  %5278 = vmatmul.msk.bf16.gmra.mxu2 %vm372_vm1, %v5379_v0  ;;  %v4489_v25 = vadd.f32 %v4390_v41, %v4075_v50  ;;  %v3824_v41 = vshll.u32 %v6901_v9, 16  ;;  %v5199_v49 = vld [vmem:[%s5553_s6 + $0xd4] sm:$0x1] }
 0x225   : > { %5295 = vmatmul.msk.bf16.gmra.mxu3 %vm372_vm1, %v3891_v10  ;;  %5328 = vmatmul.msk.bf16.gmra.mxu0 %vm372_vm1, %v4305_v5  ;;  %v2799_v5 = vrot.slane %v5456_v36, 5  ;;  %v3837_v12 = vor.u32 %v3836_v4, %v6926_v62  ;;  %v3840_v15 = vshll.u32 %v5199_v49, 16 }
 0x226   : > { %4521 = vst [vmem:[%s5790_s22 + $0x48] sm:$0xff] %v4489_v25  ;;  %v4591_v30 = vadd.f32 %v4590_v3, %v4489_v25  ;;  %v4632_v32 = vmul.f32 %v4489_v25, %v4489_v25  ;;  %v3826_v56 = vrot.slane %v3824_v41, 5  ;;  %v3005_v3 = vld [vmem:[%s5790_s22 + $0x58] sm:$0xff]  ;;  %v5134_v25 = vrot.slane %v5457_v16, 9 }
 0x227   : > { %v3309_v59 = vpop.f32.mrf.mxu2  ;;  %v2801_v26 = vrot.slane %v2799_v5, 4  ;;  %v3842_v8 = vrot.slane %v3840_v15, 5  ;;  %v3009_v16 = vld [vmem:[%s5790_s22 + $0x78] sm:$0xff] }
 0x228   : > { %v3406_v14 = vadd.f32 %v3309_v59, %v3036_v27  ;;  %v3979_v31 = vpop.f32.mrf.mxu3  ;;  %v4663_v39 = vadd.f32 %v4662_v35, %v4632_v32  ;;  %v3827_v50 = vor.u32 %v3826_v56, %v3823_v54  ;;  %v3838_v32 = vrot.slane %v3837_v12, 4 }
 0x229   : > { %v2941_v42 = vpop.f32.mrf.mxu1  ;;  %v4256_v59 = vrot.slane %v5199_v49, 5  ;;  %v2800_v34 = vsel %vm5617_vm7, %v5134_v25, %v2799_v5  ;;  %v2803_v37 = vsel %vm5617_vm7, %v2801_v26, %v2802_v22  ;;  %v4290_v56 = vunpack.c.l.b16 %v4254_v17 }
 0x22a   : > { %v4076_v38 = vadd.f32 %v3979_v31, %v3406_v14  ;;  %v4395_v48 = vpop.f32.mrf.mxu0  ;;  %v3037_v6 = vadd.f32 %v3005_v3, %v2941_v42  ;;  %v3828_v27 = vrot.slane %v3827_v50, 4  ;;  %v4255_v14 = vrot.slane %v4253_v21, 4 }
 0x22b   : > { %v2836_v43 = vunpack.c.l.b16 %v2800_v34  ;;  %v2837_v47 = vunpack.c.l.b16 %v2803_v37 }
 0x22c   : > { %v4490_v51 = vadd.f32 %v4393_v13, %v4076_v38  ;;  %v3833_v9 = vsel %vm5611_vm6, %v3828_v27, %v6926_v62  ;;  %v3843_v38 = vsel %vm5611_vm6, %v3838_v32, %v3842_v8  ;;  %v4257_v44 = vsel %vm5617_vm7, %v4255_v14, %v4256_v59 }
 0x22d   : > { %v3876_v52 = vunpack.c.l.b16 %v3833_v9  ;;  %v3877_v54 = vunpack.c.l.b16 %v3843_v38  ;;  %v4291_v3 = vunpack.c.l.b16 %v4257_v44 }
 0x22e   : > { %4522 = vst [vmem:[%s5790_s22 + $0x50] sm:$0xff] %v4490_v51  ;;  %v4592_v45 = vadd.f32 %v4591_v30, %v4490_v51  ;;  %v4633_v11 = vmul.f32 %v4490_v51, %v4490_v51  ;;  %v3006_v30 = vld [vmem:[%s5790_s22 + $0x60] sm:$0xff]  ;;  %v3007_v51 = vld [vmem:[%s5790_s22 + $0x68] sm:$0xff] }
 0x22f   : > { %v3311_v0 = vpop.f32.mrf.mxu2 }
 0x230   : > { %v3407_v35 = vadd.f32 %v3311_v0, %v3037_v6  ;;  %v3981_v10 = vpop.f32.mrf.mxu3  ;;  %v4664_v60 = vadd.f32 %v4663_v39, %v4633_v11  ;;  %v2853_v6 = vpack.c.b16 %v2837_v47, %v2836_v43  ;;  %v3893_v0 = vpack.c.b16 %v3877_v54, %v3876_v52 }
 0x231   : > { %v2944_v13 = vpop.f32.mrf.mxu1 }
 0x232   : > { %v4077_v55 = vadd.f32 %v3981_v10, %v3407_v35  ;;  %v4398_v1 = vpop.f32.mrf.mxu0  ;;  %v3038_v20 = vadd.f32 %v3006_v30, %v2944_v13 }
 0x234   : > { %5150 = vmatmul.msk.bf16.gmra.mxu1 %vm372_vm1, %v2852_v63  ;;  %5279 = vmatmul.msk.bf16.gmra.mxu2 %vm372_vm1, %v5380_v57  ;;  %v4491_v23 = vadd.f32 %v4395_v48, %v4077_v55  ;;  %v4307_v63 = vpack.c.b16 %v4291_v3, %v4290_v56  ;;  %v3012_v3 = vld [vmem:[%s5790_s22 + $0x90] sm:$0xff] }
 0x235   : > { %5296 = vmatmul.msk.bf16.gmra.mxu3 %vm372_vm1, %v3892_v61  ;;  %5329 = vmatmul.msk.bf16.gmra.mxu0 %vm372_vm1, %v4306_v18 }
 0x236   : > { %4523 = vst [vmem:[%s5790_s22 + $0x58] sm:$0xff] %v4491_v23  ;;  %v4593_v24 = vadd.f32 %v4592_v45, %v4491_v23  ;;  %v4634_v29 = vmul.f32 %v4491_v23, %v4491_v23 }
 0x237   : > { %v3314_v31 = vpop.f32.mrf.mxu2 }
 0x238   : > { %v3408_v39 = vadd.f32 %v3314_v31, %v3038_v20  ;;  %v3984_v40 = vpop.f32.mrf.mxu3  ;;  %v4665_v41 = vadd.f32 %v4664_v60, %v4634_v29  ;;  %v3008_v60 = vld [vmem:[%s5790_s22 + $0x70] sm:$0xff]  ;;  %v3010_v20 = vld [vmem:[%s5790_s22 + $0x80] sm:$0xff] }
 0x239   : > { %v2946_v42 = vpop.f32.mrf.mxu1 }
 0x23a   : > { %v4078_v46 = vadd.f32 %v3984_v40, %v3408_v39  ;;  %v4400_v48 = vpop.f32.mrf.mxu0  ;;  %v3039_v62 = vadd.f32 %v3007_v51, %v2946_v42 }
 0x23c   : > { %v4492_v28 = vadd.f32 %v4398_v1, %v4078_v46  ;;  %v3011_v46 = vld [vmem:[%s5790_s22 + $0x88] sm:$0xff] }
 0x23e   : > { %4524 = vst [vmem:[%s5790_s22 + $0x60] sm:$0xff] %v4492_v28  ;;  %v4594_v2 = vadd.f32 %v4593_v24, %v4492_v28  ;;  %v4635_v4 = vmul.f32 %v4492_v28, %v4492_v28 }
 0x23f   : > { %v3316_v58 = vpop.f32.mrf.mxu2 }
 0x240   : > { %v3409_v53 = vadd.f32 %v3316_v58, %v3039_v62  ;;  %v3986_v45 = vpop.f32.mrf.mxu3  ;;  %v4666_v11 = vadd.f32 %v4665_v41, %v4635_v4 }
 0x241   : > { %v2949_v49 = vpop.f32.mrf.mxu1 }
 0x242   : > { %v4079_v35 = vadd.f32 %v3986_v45, %v3409_v53  ;;  %v4403_v57 = vpop.f32.mrf.mxu0  ;;  %v3040_v36 = vadd.f32 %v3008_v60, %v2949_v49 }
 0x244   : > { %5151 = vmatmul.msk.bf16.gmra.mxu1 %vm372_vm1, %v2853_v6  ;;  %5280 = vmatmul.msk.bf16.gmra.mxu2 %vm372_vm1, %v5381_v7  ;;  %v4493_v10 = vadd.f32 %v4400_v48, %v4079_v35 }
 0x245   : > { %5297 = vmatmul.msk.bf16.gmra.mxu3 %vm372_vm1, %v3893_v0  ;;  %5330 = vmatmul.msk.bf16.gmra.mxu0 %vm372_vm1, %v4307_v63  ;;  %v3013_v63 = vld [vmem:[%s5790_s22 + $0x98] sm:$0xff] }
 0x246   : > { %4525 = vst [vmem:[%s5790_s22 + $0x68] sm:$0xff] %v4493_v10  ;;  %v4595_v5 = vadd.f32 %v4594_v2, %v4493_v10  ;;  %v4636_v50 = vmul.f32 %v4493_v10, %v4493_v10 }
 0x247   : > { %v3319_v13 = vpop.f32.mrf.mxu2 }
 0x248   : > { %v3410_v61 = vadd.f32 %v3319_v13, %v3040_v36  ;;  %v3989_v12 = vpop.f32.mrf.mxu3  ;;  %v4667_v15 = vadd.f32 %v4666_v11, %v4636_v50 }
 0x249   : > { %v2951_v18 = vpop.f32.mrf.mxu1 }
 0x24a   : > { %v4080_v55 = vadd.f32 %v3989_v12, %v3410_v61  ;;  %v4405_v1 = vpop.f32.mrf.mxu0  ;;  %v3041_v25 = vadd.f32 %v3009_v16, %v2951_v18  ;;  %v3014_v18 = vld [vmem:[%s5790_s22 + $0xa0] sm:$0xff] }
 0x24c   : > { %v4494_v21 = vadd.f32 %v4403_v57, %v4080_v55 }
 0x24e   : > { %4526 = vst [vmem:[%s5790_s22 + $0x70] sm:$0xff] %v4494_v21  ;;  %v4596_v23 = vadd.f32 %v4595_v5, %v4494_v21  ;;  %v4637_v26 = vmul.f32 %v4494_v21, %v4494_v21 }
 0x24f   : > { %v3321_v19 = vpop.f32.mrf.mxu2 }
 0x250   : > { %v3411_v22 = vadd.f32 %v3321_v19, %v3041_v25  ;;  %v3991_v27 = vpop.f32.mrf.mxu3  ;;  %v4668_v30 = vadd.f32 %v4667_v15, %v4637_v26 }
 0x251   : > { %v2954_v32 = vpop.f32.mrf.mxu1 }
 0x252   : > { %v4081_v8 = vadd.f32 %v3991_v27, %v3411_v22  ;;  %v4408_v33 = vpop.f32.mrf.mxu0  ;;  %v3042_v24 = vadd.f32 %v3010_v20, %v2954_v32  ;;  %v3015_v32 = vld [vmem:[%s5790_s22 + $0xa8] sm:$0xff] }
 0x254   : > { %v4495_v59 = vadd.f32 %v4405_v1, %v4081_v8 }
 0x256   : > { %4527 = vst [vmem:[%s5790_s22 + $0x78] sm:$0xff] %v4495_v59  ;;  %v4597_v29 = vadd.f32 %v4596_v23, %v4495_v59  ;;  %v4638_v14 = vmul.f32 %v4495_v59, %v4495_v59 }
 0x257   : > { %v3324_v31 = vpop.f32.mrf.mxu2 }
 0x258   : > { %v3412_v39 = vadd.f32 %v3324_v31, %v3042_v24  ;;  %v3994_v40 = vpop.f32.mrf.mxu3  ;;  %v4669_v41 = vadd.f32 %v4668_v30, %v4638_v14 }
 0x259   : > { %v2956_v42 = vpop.f32.mrf.mxu1 }
 0x25a   : > { %v4082_v34 = vadd.f32 %v3994_v40, %v3412_v39  ;;  %v4410_v37 = vpop.f32.mrf.mxu0  ;;  %v3043_v38 = vadd.f32 %v3011_v46, %v2956_v42  ;;  %v3016_v42 = vld [vmem:[%s5790_s22 + $0xb0] sm:$0xff] }
 0x25c   : > { %v4496_v9 = vadd.f32 %v4408_v33, %v4082_v34 }
 0x25e   : > { %4528 = vst [vmem:[%s5790_s22 + $0x80] sm:$0xff] %v4496_v9  ;;  %v4598_v48 = vadd.f32 %v4597_v29, %v4496_v9  ;;  %v4639_v17 = vmul.f32 %v4496_v9, %v4496_v9 }
 0x25f   : > { %v3326_v44 = vpop.f32.mrf.mxu2 }
 0x260   : > { %v3413_v43 = vadd.f32 %v3326_v44, %v3043_v38  ;;  %v3996_v47 = vpop.f32.mrf.mxu3  ;;  %v4670_v28 = vadd.f32 %v4669_v41, %v4639_v17 }
 0x261   : > { %v2959_v51 = vpop.f32.mrf.mxu1 }
 0x262   : > { %v4083_v52 = vadd.f32 %v3996_v47, %v3413_v43  ;;  %v4413_v54 = vpop.f32.mrf.mxu0  ;;  %v3044_v62 = vadd.f32 %v3012_v3, %v2959_v51  ;;  %v3017_v43 = vld [vmem:[%s5790_s22 + $0xb8] sm:$0xff] }
 0x264   : > { %v4497_v56 = vadd.f32 %v4410_v37, %v4083_v52 }
 0x266   : > { %4529 = vst [vmem:[%s5790_s22 + $0x88] sm:$0xff] %v4497_v56  ;;  %v4599_v2 = vadd.f32 %v4598_v48, %v4497_v56  ;;  %v4640_v4 = vmul.f32 %v4497_v56, %v4497_v56 }
 0x267   : > { %v3329_v58 = vpop.f32.mrf.mxu2 }
 0x268   : > { %v3414_v53 = vadd.f32 %v3329_v58, %v3044_v62  ;;  %v3999_v6 = vpop.f32.mrf.mxu3  ;;  %v4671_v7 = vadd.f32 %v4670_v28, %v4640_v4 }
 0x269   : > { %v2961_v45 = vpop.f32.mrf.mxu1 }
 0x26a   : > { %v4084_v11 = vadd.f32 %v3999_v6, %v3414_v53  ;;  %v4415_v49 = vpop.f32.mrf.mxu0  ;;  %v3045_v35 = vadd.f32 %v3013_v63, %v2961_v45 }
 0x26c   : > { %v4498_v0 = vadd.f32 %v4413_v54, %v4084_v11 }
 0x26e   : > { %4530 = vst [vmem:[%s5790_s22 + $0x90] sm:$0xff] %v4498_v0  ;;  %v4600_v57 = vadd.f32 %v4599_v2, %v4498_v0  ;;  %v4641_v10 = vmul.f32 %v4498_v0, %v4498_v0  ;;  %v3018_v2 = vld [vmem:[%s5790_s22 + $0xc0] sm:$0xff]  ;;  %v3019_v0 = vld [vmem:[%s5790_s22 + $0xc8] sm:$0xff] }
 0x26f   : > { %v3331_v60 = vpop.f32.mrf.mxu2 }
 0x270   : > { %v3415_v36 = vadd.f32 %v3331_v60, %v3045_v35  ;;  %v4001_v5 = vpop.f32.mrf.mxu3  ;;  %v4672_v50 = vadd.f32 %v4671_v7, %v4641_v10 }
 0x271   : > { %v2964_v13 = vpop.f32.mrf.mxu1 }
 0x272   : > { %v4085_v61 = vadd.f32 %v4001_v5, %v3415_v36  ;;  %v4418_v12 = vpop.f32.mrf.mxu0  ;;  %v3046_v55 = vadd.f32 %v3014_v18, %v2964_v13  ;;  %v3020_v13 = vld [vmem:[%s5790_s22 + $0xd0] sm:$0xff] }
 0x274   : > { %v4499_v15 = vadd.f32 %v4415_v49, %v4085_v61 }
 0x276   : > { %4531 = vst [vmem:[%s5790_s22 + $0x98] sm:$0xff] %v4499_v15  ;;  %v4601_v1 = vadd.f32 %v4600_v57, %v4499_v15  ;;  %v4642_v21 = vmul.f32 %v4499_v15, %v4499_v15 }
 0x277   : > { %v3334_v16 = vpop.f32.mrf.mxu2 }
 0x278   : > { %v3416_v25 = vadd.f32 %v3334_v16, %v3046_v55  ;;  %v4004_v23 = vpop.f32.mrf.mxu3  ;;  %v4673_v26 = vadd.f32 %v4672_v50, %v4642_v21 }
 0x279   : > { %v2966_v19 = vpop.f32.mrf.mxu1 }
 0x27a   : > { %v4086_v22 = vadd.f32 %v4004_v23, %v3416_v25  ;;  %v4420_v27 = vpop.f32.mrf.mxu0  ;;  %v3047_v8 = vadd.f32 %v3015_v32, %v2966_v19  ;;  %v3021_v25 = vld [vmem:[%s5790_s22 + $0xd8] sm:$0xff] }
 0x27c   : > { %v4500_v30 = vadd.f32 %v4418_v12, %v4086_v22 }
 0x27e   : > { %4532 = vst [vmem:[%s5790_s22 + $0xa0] sm:$0xff] %v4500_v30  ;;  %v6979_v33 = vadd.f32 %v4601_v1, %v4500_v30  ;;  %v4643_v59 = vmul.f32 %v4500_v30, %v4500_v30 }
 0x27f   : > { %v3336_v20 = vpop.f32.mrf.mxu2 }
 0x280   : > { %v3417_v24 = vadd.f32 %v3336_v20, %v3047_v8  ;;  %v4006_v29 = vpop.f32.mrf.mxu3  ;;  %v6981_v14 = vadd.f32 %v4673_v26, %v4643_v59  ;;  %v3022_v8 = vld [vmem:[%s5790_s22 + $0xe0] sm:$0xff] }
 0x281   : > { %v2969_v31 = vpop.f32.mrf.mxu1 }
 0x282   : > { %v4087_v39 = vadd.f32 %v4006_v29, %v3417_v24  ;;  %v4423_v40 = vpop.f32.mrf.mxu0  ;;  %v3048_v34 = vadd.f32 %v3016_v42, %v2969_v31  ;;  %v5483_v29 = vmov 0.0  }
 0x283   : > { %4580 = vst [vmem:[%s7014_s25] sm:$0x1] %v5483_v29 }
 0x284   : > { %v6983_v41 = vadd.f32 %v4420_v27, %v4087_v39  ;;  %4581 = vst [vmem:[%s7021_s28] sm:$0x1] %v5483_v29 }
 0x286   : > { %4533 = vst [vmem:[%s5790_s22 + $0xa8] sm:$0xff] %v6983_v41 }
 0x287   : > { %v3339_v37 = vpop.f32.mrf.mxu2 }
 0x288   : > { %v3418_v9 = vadd.f32 %v3339_v37, %v3048_v34  ;;  %v4009_v46 = vpop.f32.mrf.mxu3  ;;  %v3023_v37 = vld [vmem:[%s5790_s22 + $0xe8] sm:$0xff] }
 0x289   : > { %v2971_v38 = vpop.f32.mrf.mxu1 }
 0x28a   : > { %v4088_v48 = vadd.f32 %v4009_v46, %v3418_v9  ;;  %v4425_v17 = vpop.f32.mrf.mxu0  ;;  %v3049_v47 = vadd.f32 %v3017_v43, %v2971_v38 }
 0x28c   : > { %v6988_v44 = vadd.f32 %v4423_v40, %v4088_v48  ;;  %v4644_v48 = vmul.f32 %v6983_v41, %v6983_v41 }
 0x28e   : > { %4534 = vst [vmem:[%s5790_s22 + $0xb0] sm:$0xff] %v6988_v44 }
 0x28f   : > { %v3341_v28 = vpop.f32.mrf.mxu2 }
 0x290   : > { %v3419_v51 = vadd.f32 %v3341_v28, %v3049_v47  ;;  %v4011_v52 = vpop.f32.mrf.mxu3  ;;  %v4603_v28 = vadd.f32 %v6979_v33, %v6983_v41 }
 0x291   : > { %v2974_v54 = vpop.f32.mrf.mxu1 }
 0x292   : > { %v4089_v56 = vadd.f32 %v4011_v52, %v3419_v51  ;;  %v4428_v3 = vpop.f32.mrf.mxu0  ;;  %v3050_v4 = vadd.f32 %v3018_v2, %v2974_v54  ;;  %v4645_v51 = vmul.f32 %v6988_v44, %v6988_v44  ;;  %v4675_v54 = vadd.f32 %v6981_v14, %v4644_v48  ;;  %v4582_v48 = vld [vmem:[%s7014_s25] sm:$0x1] }
 0x294   : > { %v6993_v62 = vadd.f32 %v4425_v17, %v4089_v56  ;;  %v4604_v56 = vadd.f32 %v4603_v28, %v6988_v44 }
 0x296   : > { %4535 = vst [vmem:[%s5790_s22 + $0xb8] sm:$0xff] %v6993_v62 }
 0x297   : > { %v3344_v58 = vpop.f32.mrf.mxu2 }
 0x298   : > { %v3420_v53 = vadd.f32 %v3344_v58, %v3050_v4  ;;  %v4014_v6 = vpop.f32.mrf.mxu3  ;;  %v3024_v4 = vld [vmem:[%s5790_s22 + $0xf0] sm:$0xff]  ;;  %v4676_v58 = vadd.f32 %v4675_v54, %v4645_v51 }
 0x299   : > { %v2976_v7 = vpop.f32.mrf.mxu1 }
 0x29a   : > { %v4090_v45 = vadd.f32 %v4014_v6, %v3420_v53  ;;  %v4430_v11 = vpop.f32.mrf.mxu0  ;;  %v3051_v63 = vadd.f32 %v3019_v0, %v2976_v7  ;;  %v4605_v53 = vadd.f32 %v4604_v56, %v6993_v62 }
 0x29c   : > { %v6998_v49 = vadd.f32 %v4428_v3, %v4090_v45  ;;  %v4646_v3 = vmul.f32 %v6993_v62, %v6993_v62 }
 0x29e   : > { %4536 = vst [vmem:[%s5790_s22 + $0xc0] sm:$0xff] %v6998_v49  ;;  %v4647_v6 = vmul.f32 %v6998_v49, %v6998_v49  ;;  %v4677_v7 = vadd.f32 %v4676_v58, %v4646_v3  ;;  %v4606_v14 = vadd.f32 %v4605_v53, %v6998_v49 }
 0x29f   : > { %v3346_v35 = vpop.f32.mrf.mxu2 }
 0x2a0   : > { %v3421_v57 = vadd.f32 %v3346_v35, %v3051_v63  ;;  %v4016_v10 = vpop.f32.mrf.mxu3  ;;  %v4678_v63 = vadd.f32 %v4677_v7, %v4647_v6 }
 0x2a1   : > { %v2979_v60 = vpop.f32.mrf.mxu1 }
 0x2a2   : > { %v4091_v36 = vadd.f32 %v4016_v10, %v3421_v57  ;;  %v4433_v5 = vpop.f32.mrf.mxu0  ;;  %v3052_v61 = vadd.f32 %v3020_v13, %v2979_v60 }
 0x2a4   : > { %v7003_v50 = vadd.f32 %v4430_v11, %v4091_v36 }
 0x2a6   : > { %4537 = vst [vmem:[%s5790_s22 + $0xc8] sm:$0xff] %v7003_v50  ;;  %v4648_v44 = vmul.f32 %v7003_v50, %v7003_v50  ;;  %v4607_v62 = vadd.f32 %v4606_v14, %v7003_v50 }
 0x2a7   : > { %v3349_v12 = vpop.f32.mrf.mxu2 }
 0x2a8   : > { %v3422_v15 = vadd.f32 %v3349_v12, %v3052_v61  ;;  %v4019_v18 = vpop.f32.mrf.mxu3  ;;  %v4679_v60 = vadd.f32 %v4678_v63, %v4648_v44  ;;  %v3025_v61 = vld [vmem:[%s5790_s22 + $0xf8] sm:$0xff] }
 0x2a9   : > { %v2981_v55 = vpop.f32.mrf.mxu1 }
 0x2aa   : > { %v4092_v1 = vadd.f32 %v4019_v18, %v3422_v15  ;;  %v4435_v21 = vpop.f32.mrf.mxu0  ;;  %v3053_v23 = vadd.f32 %v3021_v25, %v2981_v55 }
 0x2ac   : > { %v4506_v16 = vadd.f32 %v4433_v5, %v4092_v1 }
 0x2ae   : > { %4538 = vst [vmem:[%s5790_s22 + $0xd0] sm:$0xff] %v4506_v16  ;;  %v4649_v35 = vmul.f32 %v4506_v16, %v4506_v16  ;;  %v4608_v36 = vadd.f32 %v4607_v62, %v4506_v16 }
 0x2af   : > { %v3351_v26 = vpop.f32.mrf.mxu2 }
 0x2b0   : > { %v3423_v19 = vadd.f32 %v3351_v26, %v3053_v23  ;;  %v4021_v22 = vpop.f32.mrf.mxu3  ;;  %v4680_v12 = vadd.f32 %v4679_v60, %v4649_v35 }
 0x2b1   : > { %v2984_v27 = vpop.f32.mrf.mxu1 }
 0x2b2   : > { %v4093_v30 = vadd.f32 %v4021_v22, %v3423_v19  ;;  %v4438_v59 = vpop.f32.mrf.mxu0  ;;  %v3054_v20 = vadd.f32 %v3022_v8, %v2984_v27 }
 0x2b4   : > { %v4507_v32 = vadd.f32 %v4435_v21, %v4093_v30 }
 0x2b6   : > { %4539 = vst [vmem:[%s5790_s22 + $0xd8] sm:$0xff] %v4507_v32  ;;  %v4650_v5 = vmul.f32 %v4507_v32, %v4507_v32  ;;  %v4609_v49 = vadd.f32 %v4608_v36, %v4507_v32 }
 0x2b7   : > { %v3354_v24 = vpop.f32.mrf.mxu2 }
 0x2b8   : > { %v3424_v31 = vadd.f32 %v3354_v24, %v3054_v20  ;;  %v4024_v39 = vpop.f32.mrf.mxu3  ;;  %v4681_v1 = vadd.f32 %v4680_v12, %v4650_v5 }
 0x2b9   : > { %v2986_v40 = vpop.f32.mrf.mxu1 }
 0x2ba   : > { %v4094_v42 = vadd.f32 %v4024_v39, %v3424_v31  ;;  %v3055_v9 = vadd.f32 %v3023_v37, %v2986_v40  ;;  %v4440_v38 = vpop.f32.mrf.mxu0 }
 0x2bc   : > { %v4508_v34 = vadd.f32 %v4438_v59, %v4094_v42 }
 0x2be   : > { %4540 = vst [vmem:[%s5790_s22 + $0xe0] sm:$0xff] %v4508_v34  ;;  %v4651_v15 = vmul.f32 %v4508_v34, %v4508_v34  ;;  %v4610_v21 = vadd.f32 %v4609_v49, %v4508_v34 }
 0x2bf   : > { %v3356_v46 = vpop.f32.mrf.mxu2 }
 0x2c0   : > { %v3425_v17 = vadd.f32 %v3356_v46, %v3055_v9  ;;  %v4026_v43 = vpop.f32.mrf.mxu3  ;;  %v4682_v26 = vadd.f32 %v4681_v1, %v4651_v15 }
 0x2c1   : > { %v2989_v47 = vpop.f32.mrf.mxu1 }
 0x2c2   : > { %v4095_v52 = vadd.f32 %v4026_v43, %v3425_v17  ;;  %v3056_v33 = vadd.f32 %v3024_v4, %v2989_v47  ;;  %v4443_v0 = vpop.f32.mrf.mxu0  ;;  %v4622_v47 = vld [vmem:[%s7021_s28] sm:$0x1] }
 0x2c4   : > { %v4509_v2 = vadd.f32 %v4440_v38, %v4095_v52 }
 0x2c6   : > { %4541 = vst [vmem:[%s5790_s22 + $0xe8] sm:$0xff] %v4509_v2  ;;  %v4652_v23 = vmul.f32 %v4509_v2, %v4509_v2  ;;  %v4611_v19 = vadd.f32 %v4610_v21, %v4509_v2 }
 0x2c7   : > { %v3359_v41 = vpop.f32.mrf.mxu2 }
 0x2c8   : > { %v3426_v45 = vadd.f32 %v3359_v41, %v3056_v33  ;;  %v4029_v11 = vpop.f32.mrf.mxu3  ;;  %v4683_v30 = vadd.f32 %v4682_v26, %v4652_v23 }
 0x2c9   : > { %v2991_v10 = vpop.f32.mrf.mxu1 }
 0x2ca   : > { %v4096_v57 = vadd.f32 %v4029_v11, %v3426_v45  ;;  %v3057_v18 = vadd.f32 %v3025_v61, %v2991_v10  ;;  %v4445_v16 = vpop.f32.mrf.mxu0 }
 0x2cc   : > { %v4510_v13 = vadd.f32 %v4443_v0, %v4096_v57 }
 0x2ce   : > { %4542 = vst [vmem:[%s5790_s22 + $0xf0] sm:$0xff] %v4510_v13  ;;  %v4653_v27 = vmul.f32 %v4510_v13, %v4510_v13  ;;  %v4612_v8 = vadd.f32 %v4611_v19, %v4510_v13 }
 0x2cf   : > { %v3361_v55 = vpop.f32.mrf.mxu2 }
 0x2d0   : > { %v3427_v25 = vadd.f32 %v3361_v55, %v3057_v18  ;;  %v4031_v50 = vpop.f32.mrf.mxu3  ;;  %v4684_v32 = vadd.f32 %v4683_v30, %v4653_v27 }
 0x2d2   : > { %v4097_v22 = vadd.f32 %v4031_v50, %v3427_v25 }
 0x2d4   : > { %v4511_v59 = vadd.f32 %v4445_v16, %v4097_v22 }
 0x2d6   : > { %4543 = vst [vmem:[%s5790_s22 + $0xf8] sm:$0xff] %v4511_v59  ;;  %v4613_v20 = vadd.f32 %v4612_v8, %v4511_v59  ;;  %v4654_v24 = vmul.f32 %v4511_v59, %v4511_v59 }
 0x2d8   : > { %v4614_v29 = vrot.slane %v4613_v20, 4  ;;  %v4685_v31 = vadd.f32 %v4684_v32, %v4654_v24 }
 0x2da   : > { %v4615_v39 = vadd.f32 %v4614_v29, %v4613_v20  ;;  %v4686_v40 = vrot.slane %v4685_v31, 4 }
 0x2dc   : > { %v4616_v42 = vrot.slane %v4615_v39, 2  ;;  %v4687_v34 = vadd.f32 %v4686_v40, %v4685_v31 }
 0x2de   : > { %v4617_v37 = vadd.f32 %v4616_v42, %v4615_v39  ;;  %v4688_v9 = vrot.slane %v4687_v34, 2 }
 0x2e0   : > { %v4618_v46 = vrot.slane %v4617_v37, 1  ;;  %v4689_v38 = vadd.f32 %v4688_v9, %v4687_v34 }
 0x2e2   : > { %v4619_v17 = vadd.f32 %v4618_v46, %v4617_v37  ;;  %v4690_v43 = vrot.slane %v4689_v38, 1 }
 0x2e4   : > { %v4620_v28 = vadd.f32 %v4619_v17, %v4582_v48  ;;  %v4691_v51 = vadd.f32 %v4690_v43, %v4689_v38 }
 0x2e6   : > { %4621 = vst [vmem:[%s7014_s25] sm:$0x1] %v4620_v28  ;;  %v4692_v52 = vadd.f32 %v4691_v51, %v4622_v47 }
 0x2e8   : > { %4693 = vst [vmem:[%s7021_s28] sm:$0x1] %v4692_v52 }
 0x2e9 PF: > { %s15_s17 = sadd.s32 1, %s5481_s17   ;;  %s7072_s15 = smov %s5477_s16 }
 0x2ea   : > { %p12_p5 = scmp.ge.s32.totalorder %s15_s17, 4   ;;  %s7073_s16 = smov %s7075_s18 }
 0x2ec   :  { %14 = sbr.rel (!%p12_p5) target bundleno = 2 (0x2), region = 97 }

</bundles_post_ra>
